<compile_context>
chip_gen: v7x
topology: tpu7x:2x2x1
jax: 0.10.0
libtpu: 0.0.40
codegen_flags: <defaults>
</compile_context>

<pallas_src>
import math
from functools import partial

import numpy as np
import jax
import jax.numpy as jnp
from jax import lax
from jax.experimental import pallas as pl
from jax.experimental.pallas import tpu as pltpu

NEG_INF = -1e10


# ----------------------------------------------------------------------------
# Fused Pallas kernel: pos-encode + num_layers x GraphAttention + LayerNorm
# (single invocation, whole batch stacked on the sublane axis)
# ----------------------------------------------------------------------------
def inter_graph_kernel(seq_ref, wqkv_ref, wo_ref, consts_ref, mask_ref, o_ref,
                       *, num_layers, num_heads, batch, seq_len, embed_scale, eps):
    """Whole InterGraph forward for the full batch.

    seq_ref    : (B*L, D)        raw concatenated modality node sequences, batch-major
    wqkv_ref   : (NL, D, 3D)     fused [q|k|v] projection weights (q scale pre-folded)
    wo_ref     : (NL, D, D)      output projection weights
    consts_ref : (2*NL+2+B, 3D)  packed small constants:
                   rows [0, NL)           fused qkv bias (full 3D width)
                   rows [NL, 2NL)         out-proj bias          (cols [0, D))
                   row  2NL               LayerNorm gamma        (cols [0, D))
                   row  2NL + 1           LayerNorm beta         (cols [0, D))
                   rows [2NL+2, 2NL+2+B)  per-batch positional code (cols [0, D))
    mask_ref   : (B*L, B*L)      additive edge mask: within a batch 0 across modalities,
                                 NEG_INF on same-modality blocks; NEG_INF across batches
    o_ref      : (B*L, D)
    """
    BL, D = seq_ref.shape
    H, NL, B, L = num_heads, num_layers, batch, seq_len
    dh = D // H

    cst = consts_ref[...].astype(jnp.float32)       # (2NL+2+B, 3D), loaded once
    mask = mask_ref[...]                            # (BL, BL),      loaded once

    # --- positional encoding: embed_scale*seq + per-batch positional code ----------
    # (the sinusoidal code indexes the *batch* position and is constant over L)
    seq = seq_ref[...].astype(jnp.float32)
    pe_row0 = 2 * NL + 2
    parts = [embed_scale * seq[b * L:(b + 1) * L, :]
             + cst[pe_row0 + b:pe_row0 + b + 1, 0:D] for b in range(B)]
    x = jnp.concatenate(parts, axis=0) if B > 1 else parts[0]       # (BL, D)

    for layer in range(NL):
        # --- fused QKV projection: one wide matmul for the whole batch ------------
        qkv = (jnp.dot(x, wqkv_ref[layer], preferred_element_type=jnp.float32)
               + cst[layer:layer + 1, :])                            # (BL, 3D)

        # --- per-head attention (no stacked (H*L, L) concat / softmax) ------------
        head_outs = []
        for h in range(H):
            q_h = qkv[:, h * dh:(h + 1) * dh]           # q scale folded into weights
            k_h = qkv[:, D + h * dh:D + (h + 1) * dh]
            v_h = qkv[:, 2 * D + h * dh:2 * D + (h + 1) * dh]
            s = lax.dot_general(q_h, k_h, (((1,), (1,)), ((), ())),
                                preferred_element_type=jnp.float32) + mask  # (BL, BL)
            s = s - jnp.max(s, axis=-1, keepdims=True)
            p = jnp.exp(s)
            denom = jnp.sum(p, axis=-1, keepdims=True)
            # normalize the small (BL, dh) head output, not the (BL, BL) probabilities
            head_outs.append(
                jnp.dot(p, v_h, preferred_element_type=jnp.float32) / denom)

        # --- fused output projection: lane-concat heads, single (D, D) matmul -----
        ho = jnp.concatenate(head_outs, axis=-1)                     # (BL, D)
        x = (jnp.dot(ho, wo_ref[layer], preferred_element_type=jnp.float32)
             + cst[NL + layer:NL + layer + 1, 0:D])                  # (BL, D)

    # --- final LayerNorm over D -----------------------------------------------------
    gamma = cst[2 * NL:2 * NL + 1, 0:D]
    beta = cst[2 * NL + 1:2 * NL + 2, 0:D]
    mean = jnp.mean(x, axis=-1, keepdims=True)
    var = jnp.mean((x - mean) ** 2, axis=-1, keepdims=True)
    y = (x - mean) * lax.rsqrt(var + eps)
    o_ref[...] = (y * gamma + beta).astype(o_ref.dtype)


# ----------------------------------------------------------------------------
# pallas_call wrapper
# ----------------------------------------------------------------------------
def inter_graph_forward(inter_cat_seq, inter_split, params, cfg):
    D = cfg["text_embed"]
    H = cfg["inter_num_heads"]
    NL = cfg["num_inter_graph_layers"]

    seq = jnp.concatenate(inter_cat_seq, axis=1)                 # (B, L, D)
    B, L, _ = seq.shape
    BL = B * L

    pe = batchwise_pos_encoding(B, D)                            # (B, D)
    mask = jnp.asarray(build_batched_mask(cfg["inter_seq_lens"], B), jnp.float32)
    consts = pack_consts(params, pe, NL, D)                      # (2NL+2+B, 3D)
    seq_flat = seq.reshape(BL, D)

    kernel = partial(inter_graph_kernel, num_layers=NL, num_heads=H,
                     batch=B, seq_len=L, embed_scale=math.sqrt(D), eps=1e-5)

    # Single grid step: batch is stacked on the sublane axis inside the kernel.
    # TODO(synk): on v7x, a grid=(B,) "parallel" variant (one batch element per
    # TensorCore) may win if per-core prologue < per-element compute; measure both.
    out_flat = pl.pallas_call(
        kernel,
        out_shape=jax.ShapeDtypeStruct((BL, D), seq.dtype),
        grid=(1,),
        in_specs=[
            pl.BlockSpec((BL, D), lambda i: (0, 0)),                 # seq (flattened)
            pl.BlockSpec((NL, D, 3 * D), lambda i: (0, 0, 0)),       # wqkv
            pl.BlockSpec((NL, D, D), lambda i: (0, 0, 0)),           # wo
            pl.BlockSpec((2 * NL + 2 + B, 3 * D), lambda i: (0, 0)), # packed consts
            pl.BlockSpec((BL, BL), lambda i: (0, 0)),                # batched edge mask
        ],
        out_specs=pl.BlockSpec((BL, D), lambda i: (0, 0)),
        compiler_params=pltpu.CompilerParams(dimension_semantics=("arbitrary",)),
    )(seq_flat, params["wqkv"], params["wo"], consts, mask)

    out = out_flat.reshape(B, L, D)
    split_pts = np.cumsum(np.asarray(inter_split))[:-1].tolist()
    return {
        "output_tensor": out,
        "split_output": list(jnp.split(out, split_pts, axis=1)),
    }


# ----------------------------------------------------------------------------
# Plain-JAX / numpy glue: positional encoding, edge mask, parameter packing
# ----------------------------------------------------------------------------
def sinusoidal_weights(num_embeddings, embedding_dim, padding_idx=0):
    half_dim = embedding_dim // 2
    e = math.log(10000.0) / (half_dim - 1)
    e = np.exp(np.arange(half_dim, dtype=np.float32) * -e)
    pos = np.arange(num_embeddings, dtype=np.float32)[:, None] * e[None, :]
    emb = np.concatenate([np.sin(pos), np.cos(pos)], axis=1)
    if embedding_dim % 2 == 1:
        emb = np.concatenate([emb, np.zeros((num_embeddings, 1), np.float32)], axis=1)
    if padding_idx is not None:
        emb[padding_idx, :] = 0.0
    return jnp.asarray(emb, jnp.float32)


def batchwise_pos_encoding(batch_size, dim, padding_idx=0):
    # Reproduces pos_embed(seq.transpose(0,1)[:, :, 0]).transpose(0,1):
    # positional index = padding_idx + 1 + batch index, constant across the sequence.
    w = sinusoidal_weights(padding_idx + 1 + batch_size + 1, dim, padding_idx)
    return w[padding_idx + 1 + jnp.arange(batch_size)]           # (B, D)


def inter_mask_neginf_np(seq_lens):
    # get_intra_mask_0_1: 0 on same-modality blocks, 1 elsewhere.
    # get_intra_mask_neginf_0: NEG_INF where 0, else 0 -> attend only across modalities.
    total = int(sum(seq_lens))
    m = np.ones((total, total), dtype=np.float32)
    off = 0
    for ln in seq_lens:
        m[off:off + ln, off:off + ln] = 0.0
        off += ln
    return np.where(m == 0.0, np.float32(NEG_INF), np.float32(0.0))


def build_batched_mask(seq_lens, batch):
    # Block-diagonal per-batch layout for the (B*L, B*L) score tile: within a batch the
    # usual cross-modality mask; across batches always NEG_INF (exp -> exactly 0 in f32,
    # so the batched softmax equals the per-batch softmax).
    L = int(sum(seq_lens))
    m = inter_mask_neginf_np(seq_lens)
    full = np.full((batch * L, batch * L), np.float32(NEG_INF), np.float32)
    for b in range(batch):
        full[b * L:(b + 1) * L, b * L:(b + 1) * L] = m
    return full


def pack_consts(params, pe, num_layers, d):
    """Pack bqkv / bo / gamma / beta / positional codes into one small array."""
    B = pe.shape[0]
    rows = 2 * num_layers + 2 + B
    consts = jnp.zeros((rows, 3 * d), jnp.float32)
    consts = consts.at[0:num_layers, :].set(params["bqkv"])                   # (NL, 3D)
    consts = consts.at[num_layers:2 * num_layers, 0:d].set(params["bo"])      # (NL, D)
    consts = consts.at[2 * num_layers, 0:d].set(params["ln_gamma"])
    consts = consts.at[2 * num_layers + 1, 0:d].set(params["ln_beta"])
    consts = consts.at[2 * num_layers + 2:2 * num_layers + 2 + B, 0:d].set(pe)
    return consts


def init_linear(key, d_in, d_out):
    kw, kb = jax.random.split(key)
    bound = 1.0 / math.sqrt(d_in)
    w = jax.random.uniform(kw, (d_in, d_out), jnp.float32, -bound, bound)
    b = jax.random.uniform(kb, (d_out,), jnp.float32, -bound, bound)
    return w, b


def init_inter_graph(key, d, num_heads, num_layers):
    """Pack per-layer q/k/v/out Linear params into stacked, MXU-friendly tensors."""
    dh = d // num_heads
    scale = dh ** -0.5                       # q scale folded into wq / bq (exact)
    wqkv_l, bqkv_l, wo_l, bo_l = [], [], [], []
    for k in jax.random.split(key, num_layers):
        kq, kk, kv, ko = jax.random.split(k, 4)
        wq, bq = init_linear(kq, d, d)
        wk, bk = init_linear(kk, d, d)
        wv, bv = init_linear(kv, d, d)
        wo, bo = init_linear(ko, d, d)
        wqkv_l.append(jnp.concatenate([wq * scale, wk, wv], axis=1))   # (D, 3D)
        bqkv_l.append(jnp.concatenate([bq * scale, bk, bv]))           # (3D,)
        wo_l.append(wo)                                                # (D, D)
        bo_l.append(bo)                                                # (D,)
    return {
        "wqkv": jnp.stack(wqkv_l),           # (NL, D, 3D)
        "bqkv": jnp.stack(bqkv_l),           # (NL, 3D)
        "wo": jnp.stack(wo_l),               # (NL, D, D)
        "bo": jnp.stack(bo_l),               # (NL, D)
        "ln_gamma": jnp.ones((d,), jnp.float32),
        "ln_beta": jnp.zeros((d,), jnp.float32),
    }


# ----------------------------------------------------------------------------
# Pure-JAX reference (same math, per-batch / per-head) for correctness checking
# ----------------------------------------------------------------------------
def inter_graph_reference(inter_cat_seq, params, cfg):
    D = cfg["text_embed"]
    H = cfg["inter_num_heads"]
    NL = cfg["num_inter_graph_layers"]
    dh = D // H
    hp = lax.Precision.HIGHEST

    seq = jnp.concatenate(inter_cat_seq, axis=1)                 # (B, L, D)
    B = seq.shape[0]
    pe = batchwise_pos_encoding(B, D)                            # (B, D)
    mask = jnp.asarray(inter_mask_neginf_np(cfg["inter_seq_lens"]), jnp.float32)

    x = math.sqrt(D) * seq + pe[:, None, :]                      # (B, L, D)
    for layer in range(NL):
        qkv = jnp.einsum("bld,de->ble", x, params["wqkv"][layer],
                         precision=hp) + params["bqkv"][layer]
        q, k, v = qkv[..., :D], qkv[..., D:2 * D], qkv[..., 2 * D:]
        outs = []
        for h in range(H):
            qh, kh, vh = (q[..., h * dh:(h + 1) * dh],
                          k[..., h * dh:(h + 1) * dh],
                          v[..., h * dh:(h + 1) * dh])
            s = jnp.einsum("bid,bjd->bij", qh, kh, precision=hp) + mask
            p = jax.nn.softmax(s, axis=-1)
            outs.append(jnp.einsum("bij,bjd->bid", p, vh, precision=hp))
        ho = jnp.concatenate(outs, axis=-1)
        x = jnp.einsum("bld,de->ble", ho, params["wo"][layer],
                       precision=hp) + params["bo"][layer]
    mean = jnp.mean(x, -1, keepdims=True)
    var = jnp.mean((x - mean) ** 2, -1, keepdims=True)
    y = (x - mean) * lax.rsqrt(var + 1e-5)
    return y * params["ln_gamma"] + params["ln_beta"]


# ----------------------------------------------------------------------------
# Main
# ----------------------------------------------------------------------------
if __name__ == "__main__":
    cfg = {
        "text_embed": 32,
        "inter_seq_lens": [8, 8, 8],
        "inter_num_heads": 4,
        "num_inter_graph_layers": 2,
    }
    B = 2

    root = jax.random.PRNGKey(0)
    keys = jax.random.split(root, len(cfg["inter_seq_lens"]) + 1)
    inter_cat_seq = [
        jax.random.normal(keys[i], (B, ln, cfg["text_embed"]), jnp.float32)
        for i, ln in enumerate(cfg["inter_seq_lens"])
    ]

    params = init_inter_graph(keys[-1], cfg["text_embed"],
                              cfg["inter_num_heads"], cfg["num_inter_graph_layers"])

    out = inter_graph_forward(inter_cat_seq, cfg["inter_seq_lens"], params, cfg)
    jax.block_until_ready(out["output_tensor"])

    L = sum(cfg["inter_seq_lens"])
    assert out["output_tensor"].shape == (B, L, cfg["text_embed"])
    assert len(out["split_output"]) == len(cfg["inter_seq_lens"])
    assert out["split_output"][0].shape == (B, cfg["inter_seq_lens"][0], cfg["text_embed"])
    assert bool(jnp.all(jnp.isfinite(out["output_tensor"])))

    ref = inter_graph_reference(inter_cat_seq, params, cfg)
    np.testing.assert_allclose(np.asarray(out["output_tensor"]), np.asarray(ref),
                               rtol=5e-3, atol=5e-3)

    print("KERNEL_OK")
</pallas_src>

<mosaic_0001>
module attributes {stable_mosaic.version = 11 : i64} {
  func.func @inter_graph_kernel(%arg0: i32, %arg1: memref<48x32xf32, #tpu.memory_space<vmem>>, %arg2: memref<2x32x96xf32, #tpu.memory_space<vmem>>, %arg3: memref<2x32x32xf32, #tpu.memory_space<vmem>>, %arg4: memref<8x96xf32, #tpu.memory_space<vmem>>, %arg5: memref<48x48xf32, #tpu.memory_space<vmem>>, %arg6: memref<48x32xf32, #tpu.memory_space<vmem>>) attributes {dimension_semantics = [#tpu.dimension_semantics<arbitrary>], iteration_bounds = array<i64: 1>, scalar_prefetch = 0 : i64, scratch_operands = 0 : i64, tpu.core_type = #tpu.core_type<tc>, window_params = [{pipeline_mode = #tpu.pipeline_mode<synchronous>, transform_indices = @transform_0, window_bounds = array<i64: 48, 32>}, {pipeline_mode = #tpu.pipeline_mode<synchronous>, transform_indices = @transform_1, window_bounds = array<i64: 2, 32, 96>}, {pipeline_mode = #tpu.pipeline_mode<synchronous>, transform_indices = @transform_2, window_bounds = array<i64: 2, 32, 32>}, {pipeline_mode = #tpu.pipeline_mode<synchronous>, transform_indices = @transform_3, window_bounds = array<i64: 8, 96>}, {pipeline_mode = #tpu.pipeline_mode<synchronous>, transform_indices = @transform_4, window_bounds = array<i64: 48, 48>}, {pipeline_mode = #tpu.pipeline_mode<synchronous>, transform_indices = @transform_5, window_bounds = array<i64: 48, 32>}]} {
    %c0 = arith.constant 0 : index
    %c0_0 = arith.constant 0 : index
    %0 = vector.load %arg4[%c0, %c0_0] : memref<8x96xf32, #tpu.memory_space<vmem>>, vector<8x96xf32>
    %c0_1 = arith.constant 0 : index
    %c0_2 = arith.constant 0 : index
    %1 = vector.load %arg5[%c0_1, %c0_2] : memref<48x48xf32, #tpu.memory_space<vmem>>, vector<48x48xf32>
    %c0_3 = arith.constant 0 : index
    %c0_4 = arith.constant 0 : index
    %2 = vector.load %arg1[%c0_3, %c0_4] : memref<48x32xf32, #tpu.memory_space<vmem>>, vector<48x32xf32>
    %3 = vector.extract_strided_slice %2 {offsets = [0, 0], sizes = [24, 32], strides = [1, 1]} : vector<48x32xf32> to vector<24x32xf32>
    %cst = arith.constant 5.65685415 : f32
    %4 = vector.broadcast %cst : f32 to vector<24x32xf32>
    %5 = arith.mulf %4, %3 : vector<24x32xf32>
    %6 = vector.extract_strided_slice %0 {offsets = [6, 0], sizes = [1, 32], strides = [1, 1]} : vector<8x96xf32> to vector<1x32xf32>
    %7 = vector.broadcast %6 : vector<1x32xf32> to vector<24x32xf32>
    %8 = arith.addf %5, %7 : vector<24x32xf32>
    %9 = vector.extract_strided_slice %2 {offsets = [24, 0], sizes = [24, 32], strides = [1, 1]} : vector<48x32xf32> to vector<24x32xf32>
    %cst_5 = arith.constant 5.65685415 : f32
    %10 = vector.broadcast %cst_5 : f32 to vector<24x32xf32>
    %11 = arith.mulf %10, %9 : vector<24x32xf32>
    %12 = vector.extract_strided_slice %0 {offsets = [7, 0], sizes = [1, 32], strides = [1, 1]} : vector<8x96xf32> to vector<1x32xf32>
    %13 = vector.broadcast %12 : vector<1x32xf32> to vector<24x32xf32>
    %14 = arith.addf %11, %13 : vector<24x32xf32>
    %15 = tpu.concatenate %8, %14 in 0 : vector<24x32xf32>, vector<24x32xf32> -> vector<48x32xf32>
    %c0_6 = arith.constant 0 : index
    %c0_7 = arith.constant 0 : index
    %c0_8 = arith.constant 0 : index
    %16 = vector.load %arg2[%c0_6, %c0_7, %c0_8] : memref<2x32x96xf32, #tpu.memory_space<vmem>>, vector<1x32x96xf32>
    %17 = vector.shape_cast %16 : vector<1x32x96xf32> to vector<32x96xf32>
    %cst_9 = arith.constant dense<0.000000e+00> : vector<48x96xf32>
    %18 = tpu.matmul %15, %17, %cst_9 {dimension_numbers = #tpu.dot_dimension_numbers<[1], [0], [0], [1], [0, 0, 1, 1], [], []>} : vector<48x32xf32>, vector<32x96xf32>, vector<48x96xf32> -> vector<48x96xf32>
    %19 = vector.extract_strided_slice %0 {offsets = [0, 0], sizes = [1, 96], strides = [1, 1]} : vector<8x96xf32> to vector<1x96xf32>
    %20 = vector.broadcast %19 : vector<1x96xf32> to vector<48x96xf32>
    %21 = arith.addf %18, %20 : vector<48x96xf32>
    %22 = vector.extract_strided_slice %21 {offsets = [0, 0], sizes = [48, 8], strides = [1, 1]} : vector<48x96xf32> to vector<48x8xf32>
    %23 = vector.extract_strided_slice %21 {offsets = [0, 32], sizes = [48, 8], strides = [1, 1]} : vector<48x96xf32> to vector<48x8xf32>
    %24 = vector.extract_strided_slice %21 {offsets = [0, 64], sizes = [48, 8], strides = [1, 1]} : vector<48x96xf32> to vector<48x8xf32>
    %cst_10 = arith.constant dense<0.000000e+00> : vector<48x48xf32>
    %25 = tpu.matmul %22, %23, %cst_10 {dimension_numbers = #tpu.dot_dimension_numbers<[1], [1], [0], [0], [0, 0, 1, 0], [], []>} : vector<48x8xf32>, vector<48x8xf32>, vector<48x48xf32> -> vector<48x48xf32>
    %26 = arith.addf %25, %1 : vector<48x48xf32>
    %cst_11 = arith.constant dense<0xFF800000> : vector<48xf32>
    %27 = vector.multi_reduction <maximumf>, %26, %cst_11 [1] : vector<48x48xf32> to vector<48xf32>
    %28 = vector.shape_cast %27 : vector<48xf32> to vector<48x1xf32>
    %29 = vector.broadcast %28 : vector<48x1xf32> to vector<48x48xf32>
    %30 = arith.subf %26, %29 : vector<48x48xf32>
    %31 = math.exp %30 : vector<48x48xf32>
    %cst_12 = arith.constant dense<0.000000e+00> : vector<48xf32>
    %32 = vector.multi_reduction <add>, %31, %cst_12 [1] : vector<48x48xf32> to vector<48xf32>
    %33 = vector.shape_cast %32 : vector<48xf32> to vector<48x1xf32>
    %cst_13 = arith.constant dense<0.000000e+00> : vector<48x8xf32>
    %34 = tpu.matmul %31, %24, %cst_13 {dimension_numbers = #tpu.dot_dimension_numbers<[1], [0], [0], [1], [0, 0, 1, 1], [], []>} : vector<48x48xf32>, vector<48x8xf32>, vector<48x8xf32> -> vector<48x8xf32>
    %35 = vector.broadcast %33 : vector<48x1xf32> to vector<48x8xf32>
    %36 = arith.divf %34, %35 : vector<48x8xf32>
    %37 = vector.extract_strided_slice %21 {offsets = [0, 8], sizes = [48, 8], strides = [1, 1]} : vector<48x96xf32> to vector<48x8xf32>
    %38 = vector.extract_strided_slice %21 {offsets = [0, 40], sizes = [48, 8], strides = [1, 1]} : vector<48x96xf32> to vector<48x8xf32>
    %39 = vector.extract_strided_slice %21 {offsets = [0, 72], sizes = [48, 8], strides = [1, 1]} : vector<48x96xf32> to vector<48x8xf32>
    %cst_14 = arith.constant dense<0.000000e+00> : vector<48x48xf32>
    %40 = tpu.matmul %37, %38, %cst_14 {dimension_numbers = #tpu.dot_dimension_numbers<[1], [1], [0], [0], [0, 0, 1, 0], [], []>} : vector<48x8xf32>, vector<48x8xf32>, vector<48x48xf32> -> vector<48x48xf32>
    %41 = arith.addf %40, %1 : vector<48x48xf32>
    %cst_15 = arith.constant dense<0xFF800000> : vector<48xf32>
    %42 = vector.multi_reduction <maximumf>, %41, %cst_15 [1] : vector<48x48xf32> to vector<48xf32>
    %43 = vector.shape_cast %42 : vector<48xf32> to vector<48x1xf32>
    %44 = vector.broadcast %43 : vector<48x1xf32> to vector<48x48xf32>
    %45 = arith.subf %41, %44 : vector<48x48xf32>
    %46 = math.exp %45 : vector<48x48xf32>
    %cst_16 = arith.constant dense<0.000000e+00> : vector<48xf32>
    %47 = vector.multi_reduction <add>, %46, %cst_16 [1] : vector<48x48xf32> to vector<48xf32>
    %48 = vector.shape_cast %47 : vector<48xf32> to vector<48x1xf32>
    %cst_17 = arith.constant dense<0.000000e+00> : vector<48x8xf32>
    %49 = tpu.matmul %46, %39, %cst_17 {dimension_numbers = #tpu.dot_dimension_numbers<[1], [0], [0], [1], [0, 0, 1, 1], [], []>} : vector<48x48xf32>, vector<48x8xf32>, vector<48x8xf32> -> vector<48x8xf32>
    %50 = vector.broadcast %48 : vector<48x1xf32> to vector<48x8xf32>
    %51 = arith.divf %49, %50 : vector<48x8xf32>
    %52 = vector.extract_strided_slice %21 {offsets = [0, 16], sizes = [48, 8], strides = [1, 1]} : vector<48x96xf32> to vector<48x8xf32>
    %53 = vector.extract_strided_slice %21 {offsets = [0, 48], sizes = [48, 8], strides = [1, 1]} : vector<48x96xf32> to vector<48x8xf32>
    %54 = vector.extract_strided_slice %21 {offsets = [0, 80], sizes = [48, 8], strides = [1, 1]} : vector<48x96xf32> to vector<48x8xf32>
    %cst_18 = arith.constant dense<0.000000e+00> : vector<48x48xf32>
    %55 = tpu.matmul %52, %53, %cst_18 {dimension_numbers = #tpu.dot_dimension_numbers<[1], [1], [0], [0], [0, 0, 1, 0], [], []>} : vector<48x8xf32>, vector<48x8xf32>, vector<48x48xf32> -> vector<48x48xf32>
    %56 = arith.addf %55, %1 : vector<48x48xf32>
    %cst_19 = arith.constant dense<0xFF800000> : vector<48xf32>
    %57 = vector.multi_reduction <maximumf>, %56, %cst_19 [1] : vector<48x48xf32> to vector<48xf32>
    %58 = vector.shape_cast %57 : vector<48xf32> to vector<48x1xf32>
    %59 = vector.broadcast %58 : vector<48x1xf32> to vector<48x48xf32>
    %60 = arith.subf %56, %59 : vector<48x48xf32>
    %61 = math.exp %60 : vector<48x48xf32>
    %cst_20 = arith.constant dense<0.000000e+00> : vector<48xf32>
    %62 = vector.multi_reduction <add>, %61, %cst_20 [1] : vector<48x48xf32> to vector<48xf32>
    %63 = vector.shape_cast %62 : vector<48xf32> to vector<48x1xf32>
    %cst_21 = arith.constant dense<0.000000e+00> : vector<48x8xf32>
    %64 = tpu.matmul %61, %54, %cst_21 {dimension_numbers = #tpu.dot_dimension_numbers<[1], [0], [0], [1], [0, 0, 1, 1], [], []>} : vector<48x48xf32>, vector<48x8xf32>, vector<48x8xf32> -> vector<48x8xf32>
    %65 = vector.broadcast %63 : vector<48x1xf32> to vector<48x8xf32>
    %66 = arith.divf %64, %65 : vector<48x8xf32>
    %67 = vector.extract_strided_slice %21 {offsets = [0, 24], sizes = [48, 8], strides = [1, 1]} : vector<48x96xf32> to vector<48x8xf32>
    %68 = vector.extract_strided_slice %21 {offsets = [0, 56], sizes = [48, 8], strides = [1, 1]} : vector<48x96xf32> to vector<48x8xf32>
    %69 = vector.extract_strided_slice %21 {offsets = [0, 88], sizes = [48, 8], strides = [1, 1]} : vector<48x96xf32> to vector<48x8xf32>
    %cst_22 = arith.constant dense<0.000000e+00> : vector<48x48xf32>
    %70 = tpu.matmul %67, %68, %cst_22 {dimension_numbers = #tpu.dot_dimension_numbers<[1], [1], [0], [0], [0, 0, 1, 0], [], []>} : vector<48x8xf32>, vector<48x8xf32>, vector<48x48xf32> -> vector<48x48xf32>
    %71 = arith.addf %70, %1 : vector<48x48xf32>
    %cst_23 = arith.constant dense<0xFF800000> : vector<48xf32>
    %72 = vector.multi_reduction <maximumf>, %71, %cst_23 [1] : vector<48x48xf32> to vector<48xf32>
    %73 = vector.shape_cast %72 : vector<48xf32> to vector<48x1xf32>
    %74 = vector.broadcast %73 : vector<48x1xf32> to vector<48x48xf32>
    %75 = arith.subf %71, %74 : vector<48x48xf32>
    %76 = math.exp %75 : vector<48x48xf32>
    %cst_24 = arith.constant dense<0.000000e+00> : vector<48xf32>
    %77 = vector.multi_reduction <add>, %76, %cst_24 [1] : vector<48x48xf32> to vector<48xf32>
    %78 = vector.shape_cast %77 : vector<48xf32> to vector<48x1xf32>
    %cst_25 = arith.constant dense<0.000000e+00> : vector<48x8xf32>
    %79 = tpu.matmul %76, %69, %cst_25 {dimension_numbers = #tpu.dot_dimension_numbers<[1], [0], [0], [1], [0, 0, 1, 1], [], []>} : vector<48x48xf32>, vector<48x8xf32>, vector<48x8xf32> -> vector<48x8xf32>
    %80 = vector.broadcast %78 : vector<48x1xf32> to vector<48x8xf32>
    %81 = arith.divf %79, %80 : vector<48x8xf32>
    %82 = tpu.concatenate %36, %51, %66, %81 in 1 : vector<48x8xf32>, vector<48x8xf32>, vector<48x8xf32>, vector<48x8xf32> -> vector<48x32xf32>
    %c0_26 = arith.constant 0 : index
    %c0_27 = arith.constant 0 : index
    %c0_28 = arith.constant 0 : index
    %83 = vector.load %arg3[%c0_26, %c0_27, %c0_28] : memref<2x32x32xf32, #tpu.memory_space<vmem>>, vector<1x32x32xf32>
    %84 = vector.shape_cast %83 : vector<1x32x32xf32> to vector<32x32xf32>
    %cst_29 = arith.constant dense<0.000000e+00> : vector<48x32xf32>
    %85 = tpu.matmul %82, %84, %cst_29 {dimension_numbers = #tpu.dot_dimension_numbers<[1], [0], [0], [1], [0, 0, 1, 1], [], []>} : vector<48x32xf32>, vector<32x32xf32>, vector<48x32xf32> -> vector<48x32xf32>
    %86 = vector.extract_strided_slice %0 {offsets = [2, 0], sizes = [1, 32], strides = [1, 1]} : vector<8x96xf32> to vector<1x32xf32>
    %87 = vector.broadcast %86 : vector<1x32xf32> to vector<48x32xf32>
    %88 = arith.addf %85, %87 : vector<48x32xf32>
    %c1 = arith.constant 1 : index
    %c0_30 = arith.constant 0 : index
    %c0_31 = arith.constant 0 : index
    %89 = vector.load %arg2[%c1, %c0_30, %c0_31] : memref<2x32x96xf32, #tpu.memory_space<vmem>>, vector<1x32x96xf32>
    %90 = vector.shape_cast %89 : vector<1x32x96xf32> to vector<32x96xf32>
    %cst_32 = arith.constant dense<0.000000e+00> : vector<48x96xf32>
    %91 = tpu.matmul %88, %90, %cst_32 {dimension_numbers = #tpu.dot_dimension_numbers<[1], [0], [0], [1], [0, 0, 1, 1], [], []>} : vector<48x32xf32>, vector<32x96xf32>, vector<48x96xf32> -> vector<48x96xf32>
    %92 = vector.extract_strided_slice %0 {offsets = [1, 0], sizes = [1, 96], strides = [1, 1]} : vector<8x96xf32> to vector<1x96xf32>
    %93 = vector.broadcast %92 : vector<1x96xf32> to vector<48x96xf32>
    %94 = arith.addf %91, %93 : vector<48x96xf32>
    %95 = vector.extract_strided_slice %94 {offsets = [0, 0], sizes = [48, 8], strides = [1, 1]} : vector<48x96xf32> to vector<48x8xf32>
    %96 = vector.extract_strided_slice %94 {offsets = [0, 32], sizes = [48, 8], strides = [1, 1]} : vector<48x96xf32> to vector<48x8xf32>
    %97 = vector.extract_strided_slice %94 {offsets = [0, 64], sizes = [48, 8], strides = [1, 1]} : vector<48x96xf32> to vector<48x8xf32>
    %cst_33 = arith.constant dense<0.000000e+00> : vector<48x48xf32>
    %98 = tpu.matmul %95, %96, %cst_33 {dimension_numbers = #tpu.dot_dimension_numbers<[1], [1], [0], [0], [0, 0, 1, 0], [], []>} : vector<48x8xf32>, vector<48x8xf32>, vector<48x48xf32> -> vector<48x48xf32>
    %99 = arith.addf %98, %1 : vector<48x48xf32>
    %cst_34 = arith.constant dense<0xFF800000> : vector<48xf32>
    %100 = vector.multi_reduction <maximumf>, %99, %cst_34 [1] : vector<48x48xf32> to vector<48xf32>
    %101 = vector.shape_cast %100 : vector<48xf32> to vector<48x1xf32>
    %102 = vector.broadcast %101 : vector<48x1xf32> to vector<48x48xf32>
    %103 = arith.subf %99, %102 : vector<48x48xf32>
    %104 = math.exp %103 : vector<48x48xf32>
    %cst_35 = arith.constant dense<0.000000e+00> : vector<48xf32>
    %105 = vector.multi_reduction <add>, %104, %cst_35 [1] : vector<48x48xf32> to vector<48xf32>
    %106 = vector.shape_cast %105 : vector<48xf32> to vector<48x1xf32>
    %cst_36 = arith.constant dense<0.000000e+00> : vector<48x8xf32>
    %107 = tpu.matmul %104, %97, %cst_36 {dimension_numbers = #tpu.dot_dimension_numbers<[1], [0], [0], [1], [0, 0, 1, 1], [], []>} : vector<48x48xf32>, vector<48x8xf32>, vector<48x8xf32> -> vector<48x8xf32>
    %108 = vector.broadcast %106 : vector<48x1xf32> to vector<48x8xf32>
    %109 = arith.divf %107, %108 : vector<48x8xf32>
    %110 = vector.extract_strided_slice %94 {offsets = [0, 8], sizes = [48, 8], strides = [1, 1]} : vector<48x96xf32> to vector<48x8xf32>
    %111 = vector.extract_strided_slice %94 {offsets = [0, 40], sizes = [48, 8], strides = [1, 1]} : vector<48x96xf32> to vector<48x8xf32>
    %112 = vector.extract_strided_slice %94 {offsets = [0, 72], sizes = [48, 8], strides = [1, 1]} : vector<48x96xf32> to vector<48x8xf32>
    %cst_37 = arith.constant dense<0.000000e+00> : vector<48x48xf32>
    %113 = tpu.matmul %110, %111, %cst_37 {dimension_numbers = #tpu.dot_dimension_numbers<[1], [1], [0], [0], [0, 0, 1, 0], [], []>} : vector<48x8xf32>, vector<48x8xf32>, vector<48x48xf32> -> vector<48x48xf32>
    %114 = arith.addf %113, %1 : vector<48x48xf32>
    %cst_38 = arith.constant dense<0xFF800000> : vector<48xf32>
    %115 = vector.multi_reduction <maximumf>, %114, %cst_38 [1] : vector<48x48xf32> to vector<48xf32>
    %116 = vector.shape_cast %115 : vector<48xf32> to vector<48x1xf32>
    %117 = vector.broadcast %116 : vector<48x1xf32> to vector<48x48xf32>
    %118 = arith.subf %114, %117 : vector<48x48xf32>
    %119 = math.exp %118 : vector<48x48xf32>
    %cst_39 = arith.constant dense<0.000000e+00> : vector<48xf32>
    %120 = vector.multi_reduction <add>, %119, %cst_39 [1] : vector<48x48xf32> to vector<48xf32>
    %121 = vector.shape_cast %120 : vector<48xf32> to vector<48x1xf32>
    %cst_40 = arith.constant dense<0.000000e+00> : vector<48x8xf32>
    %122 = tpu.matmul %119, %112, %cst_40 {dimension_numbers = #tpu.dot_dimension_numbers<[1], [0], [0], [1], [0, 0, 1, 1], [], []>} : vector<48x48xf32>, vector<48x8xf32>, vector<48x8xf32> -> vector<48x8xf32>
    %123 = vector.broadcast %121 : vector<48x1xf32> to vector<48x8xf32>
    %124 = arith.divf %122, %123 : vector<48x8xf32>
    %125 = vector.extract_strided_slice %94 {offsets = [0, 16], sizes = [48, 8], strides = [1, 1]} : vector<48x96xf32> to vector<48x8xf32>
    %126 = vector.extract_strided_slice %94 {offsets = [0, 48], sizes = [48, 8], strides = [1, 1]} : vector<48x96xf32> to vector<48x8xf32>
    %127 = vector.extract_strided_slice %94 {offsets = [0, 80], sizes = [48, 8], strides = [1, 1]} : vector<48x96xf32> to vector<48x8xf32>
    %cst_41 = arith.constant dense<0.000000e+00> : vector<48x48xf32>
    %128 = tpu.matmul %125, %126, %cst_41 {dimension_numbers = #tpu.dot_dimension_numbers<[1], [1], [0], [0], [0, 0, 1, 0], [], []>} : vector<48x8xf32>, vector<48x8xf32>, vector<48x48xf32> -> vector<48x48xf32>
    %129 = arith.addf %128, %1 : vector<48x48xf32>
    %cst_42 = arith.constant dense<0xFF800000> : vector<48xf32>
    %130 = vector.multi_reduction <maximumf>, %129, %cst_42 [1] : vector<48x48xf32> to vector<48xf32>
    %131 = vector.shape_cast %130 : vector<48xf32> to vector<48x1xf32>
    %132 = vector.broadcast %131 : vector<48x1xf32> to vector<48x48xf32>
    %133 = arith.subf %129, %132 : vector<48x48xf32>
    %134 = math.exp %133 : vector<48x48xf32>
    %cst_43 = arith.constant dense<0.000000e+00> : vector<48xf32>
    %135 = vector.multi_reduction <add>, %134, %cst_43 [1] : vector<48x48xf32> to vector<48xf32>
    %136 = vector.shape_cast %135 : vector<48xf32> to vector<48x1xf32>
    %cst_44 = arith.constant dense<0.000000e+00> : vector<48x8xf32>
    %137 = tpu.matmul %134, %127, %cst_44 {dimension_numbers = #tpu.dot_dimension_numbers<[1], [0], [0], [1], [0, 0, 1, 1], [], []>} : vector<48x48xf32>, vector<48x8xf32>, vector<48x8xf32> -> vector<48x8xf32>
    %138 = vector.broadcast %136 : vector<48x1xf32> to vector<48x8xf32>
    %139 = arith.divf %137, %138 : vector<48x8xf32>
    %140 = vector.extract_strided_slice %94 {offsets = [0, 24], sizes = [48, 8], strides = [1, 1]} : vector<48x96xf32> to vector<48x8xf32>
    %141 = vector.extract_strided_slice %94 {offsets = [0, 56], sizes = [48, 8], strides = [1, 1]} : vector<48x96xf32> to vector<48x8xf32>
    %142 = vector.extract_strided_slice %94 {offsets = [0, 88], sizes = [48, 8], strides = [1, 1]} : vector<48x96xf32> to vector<48x8xf32>
    %cst_45 = arith.constant dense<0.000000e+00> : vector<48x48xf32>
    %143 = tpu.matmul %140, %141, %cst_45 {dimension_numbers = #tpu.dot_dimension_numbers<[1], [1], [0], [0], [0, 0, 1, 0], [], []>} : vector<48x8xf32>, vector<48x8xf32>, vector<48x48xf32> -> vector<48x48xf32>
    %144 = arith.addf %143, %1 : vector<48x48xf32>
    %cst_46 = arith.constant dense<0xFF800000> : vector<48xf32>
    %145 = vector.multi_reduction <maximumf>, %144, %cst_46 [1] : vector<48x48xf32> to vector<48xf32>
    %146 = vector.shape_cast %145 : vector<48xf32> to vector<48x1xf32>
    %147 = vector.broadcast %146 : vector<48x1xf32> to vector<48x48xf32>
    %148 = arith.subf %144, %147 : vector<48x48xf32>
    %149 = math.exp %148 : vector<48x48xf32>
    %cst_47 = arith.constant dense<0.000000e+00> : vector<48xf32>
    %150 = vector.multi_reduction <add>, %149, %cst_47 [1] : vector<48x48xf32> to vector<48xf32>
    %151 = vector.shape_cast %150 : vector<48xf32> to vector<48x1xf32>
    %cst_48 = arith.constant dense<0.000000e+00> : vector<48x8xf32>
    %152 = tpu.matmul %149, %142, %cst_48 {dimension_numbers = #tpu.dot_dimension_numbers<[1], [0], [0], [1], [0, 0, 1, 1], [], []>} : vector<48x48xf32>, vector<48x8xf32>, vector<48x8xf32> -> vector<48x8xf32>
    %153 = vector.broadcast %151 : vector<48x1xf32> to vector<48x8xf32>
    %154 = arith.divf %152, %153 : vector<48x8xf32>
    %155 = tpu.concatenate %109, %124, %139, %154 in 1 : vector<48x8xf32>, vector<48x8xf32>, vector<48x8xf32>, vector<48x8xf32> -> vector<48x32xf32>
    %c1_49 = arith.constant 1 : index
    %c0_50 = arith.constant 0 : index
    %c0_51 = arith.constant 0 : index
    %156 = vector.load %arg3[%c1_49, %c0_50, %c0_51] : memref<2x32x32xf32, #tpu.memory_space<vmem>>, vector<1x32x32xf32>
    %157 = vector.shape_cast %156 : vector<1x32x32xf32> to vector<32x32xf32>
    %cst_52 = arith.constant dense<0.000000e+00> : vector<48x32xf32>
    %158 = tpu.matmul %155, %157, %cst_52 {dimension_numbers = #tpu.dot_dimension_numbers<[1], [0], [0], [1], [0, 0, 1, 1], [], []>} : vector<48x32xf32>, vector<32x32xf32>, vector<48x32xf32> -> vector<48x32xf32>
    %159 = vector.extract_strided_slice %0 {offsets = [3, 0], sizes = [1, 32], strides = [1, 1]} : vector<8x96xf32> to vector<1x32xf32>
    %160 = vector.broadcast %159 : vector<1x32xf32> to vector<48x32xf32>
    %161 = arith.addf %158, %160 : vector<48x32xf32>
    %162 = vector.extract_strided_slice %0 {offsets = [4, 0], sizes = [1, 32], strides = [1, 1]} : vector<8x96xf32> to vector<1x32xf32>
    %163 = vector.extract_strided_slice %0 {offsets = [5, 0], sizes = [1, 32], strides = [1, 1]} : vector<8x96xf32> to vector<1x32xf32>
    %cst_53 = arith.constant dense<0.000000e+00> : vector<48xf32>
    %164 = vector.multi_reduction <add>, %161, %cst_53 [1] : vector<48x32xf32> to vector<48xf32>
    %165 = vector.shape_cast %164 : vector<48xf32> to vector<48x1xf32>
    %cst_54 = arith.constant 3.200000e+01 : f32
    %166 = vector.broadcast %cst_54 : f32 to vector<48x1xf32>
    %167 = arith.divf %165, %166 : vector<48x1xf32>
    %168 = vector.broadcast %167 : vector<48x1xf32> to vector<48x32xf32>
    %169 = arith.subf %161, %168 : vector<48x32xf32>
    %170 = arith.mulf %169, %169 : vector<48x32xf32>
    %cst_55 = arith.constant dense<0.000000e+00> : vector<48xf32>
    %171 = vector.multi_reduction <add>, %170, %cst_55 [1] : vector<48x32xf32> to vector<48xf32>
    %172 = vector.shape_cast %171 : vector<48xf32> to vector<48x1xf32>
    %cst_56 = arith.constant 3.200000e+01 : f32
    %173 = vector.broadcast %cst_56 : f32 to vector<48x1xf32>
    %174 = arith.divf %172, %173 : vector<48x1xf32>
    %175 = vector.broadcast %167 : vector<48x1xf32> to vector<48x32xf32>
    %176 = arith.subf %161, %175 : vector<48x32xf32>
    %cst_57 = arith.constant 9.99999974E-6 : f32
    %177 = vector.broadcast %cst_57 : f32 to vector<48x1xf32>
    %178 = arith.addf %174, %177 : vector<48x1xf32>
    %179 = math.rsqrt %178 : vector<48x1xf32>
    %180 = vector.broadcast %179 : vector<48x1xf32> to vector<48x32xf32>
    %181 = arith.mulf %176, %180 : vector<48x32xf32>
    %182 = vector.broadcast %162 : vector<1x32xf32> to vector<48x32xf32>
    %183 = arith.mulf %181, %182 : vector<48x32xf32>
    %184 = vector.broadcast %163 : vector<1x32xf32> to vector<48x32xf32>
    %185 = arith.addf %183, %184 : vector<48x32xf32>
    %c0_58 = arith.constant 0 : index
    %c0_59 = arith.constant 0 : index
    %186 = vector.load %arg6[%c0_58, %c0_59] : memref<48x32xf32, #tpu.memory_space<vmem>>, vector<48x32xf32>
    tpu.vector_store %arg6[%c0_58, %c0_59], %185 {strides = array<i32>} : memref<48x32xf32, #tpu.memory_space<vmem>>, vector<48x32xf32>,
    return
  }
  func.func @transform_0(%arg0: i32) -> (i32, i32) {
    %c0_i32 = arith.constant 0 : i32
    %c0_i32_0 = arith.constant 0 : i32
    %c0_i32_1 = arith.constant 0 : i32
    return %c0_i32, %c0_i32_0 : i32, i32
  }
  func.func @transform_1(%arg0: i32) -> (i32, i32, i32) {
    %c0_i32 = arith.constant 0 : i32
    %c0_i32_0 = arith.constant 0 : i32
    %c0_i32_1 = arith.constant 0 : i32
    %c0_i32_2 = arith.constant 0 : i32
    return %c0_i32, %c0_i32_0, %c0_i32_1 : i32, i32, i32
  }
  func.func @transform_2(%arg0: i32) -> (i32, i32, i32) {
    %c0_i32 = arith.constant 0 : i32
    %c0_i32_0 = arith.constant 0 : i32
    %c0_i32_1 = arith.constant 0 : i32
    %c0_i32_2 = arith.constant 0 : i32
    return %c0_i32, %c0_i32_0, %c0_i32_1 : i32, i32, i32
  }
  func.func @transform_3(%arg0: i32) -> (i32, i32) {
    %c0_i32 = arith.constant 0 : i32
    %c0_i32_0 = arith.constant 0 : i32
    %c0_i32_1 = arith.constant 0 : i32
    return %c0_i32, %c0_i32_0 : i32, i32
  }
  func.func @transform_4(%arg0: i32) -> (i32, i32) {
    %c0_i32 = arith.constant 0 : i32
    %c0_i32_0 = arith.constant 0 : i32
    %c0_i32_1 = arith.constant 0 : i32
    return %c0_i32, %c0_i32_0 : i32, i32
  }
  func.func @transform_5(%arg0: i32) -> (i32, i32) {
    %c0_i32 = arith.constant 0 : i32
    %c0_i32_0 = arith.constant 0 : i32
    %c0_i32_1 = arith.constant 0 : i32
    return %c0_i32, %c0_i32_0 : i32, i32
  }
}

</mosaic_0001>

<bundles_post_ra>
// kernel: tpu_custom_call.1
= control target key start
LH: loop header
LB: loop body
LE: loop exit
PB: predicated region body
PF: predicated region fallthrough
CT: control target
= control target key end

     0   :  { %10 = vsyncpa [#allocation3], 0  ;;  %s6302_s0 = inlined_call_operand.vmem [shape: f32[48,32], index: 0, kind: input, shape index: {}]   ;;  %s6303_s1 = inlined_call_operand.vmem [shape: f32[2,32,96], index: 1, kind: input, shape index: {}]   ;;  %s6304_s2 = inlined_call_operand.hbm [shape: f32[2,32,32], index: 2, kind: input, shape index: {}]   ;;  %s6305_s3 = inlined_call_operand.vmem [shape: f32[8,96], index: 3, kind: input, shape index: {}]   ;;  %s6306_s4 = inlined_call_operand.hbm [shape: f32[48,48], index: 4, kind: input, shape index: {}]   ;;  %s6307_s5 = inlined_call_operand.vmem [shape: f32[48,32], index: 5, kind: output, shape index: {}]  }
   0x1   :  { %11 = vsyncpa [#allocation5], 0  ;;  %s5168_s18 = smov [#allocation2]   ;;  %s5120_s22 = scalar_lea.hbm %s6304_s2, 1024 }
   0x2   :  { %s21_s19 = sshll.u32 %s5168_s18, 4  ;;  %p5121_p0 = scmp.ne.s32.totalorder %s6304_s2, %s5120_s22  ;;  %s22_s19 = int_to_ptr.vmem [resolvable:$true] %s21_s19 }
   0x3   :  { %p5124_p1 = scmp.lt.u32.totalorder %s5120_s22, %s6304_s2 }
   0x5   :  { %p5126_p2 = pnand %p5124_p1, %p5121_p0 }
   0x7   :  { %5129 = shalt.err (!%p5126_p2)
}
   0x8   :  { %s5130_s27 = scalar_lea.vmem %s22_s19, 1024  ;;  %p5135_p4 = scmp.lt.s32.totalorder %s22_s19, %s22_s19 }
   0x9   :  { %p5131_p3 = scmp.ne.s32.totalorder %s22_s19, %s5130_s27  ;;  %p5136_p5 = scmp.lt.s32.totalorder %s5130_s27, %s5130_s27 }
   0xb   :  { %p5137_p6 = por %p5136_p5, %p5135_p4 }
   0xd   :  { %p5138_p7 = pnand %p5137_p6, %p5131_p3 }
   0xf   :  { %5141 = shalt.err (!%p5138_p7)
}
  0x10   :  { %s5169_s28 = smov 128   ;;  %s5170_s29 = smov 8  }
  0x11   :  { %27 = dma.hbm_to_vmem [thread:$0]  %s6304_s2, 1024, %s22_s19, [#allocation3], %s5169_s28, %s5169_s28, %s5170_s29  }
  0x12   :  { %s5171_s7 = smov [#allocation4]   ;;  %s5142_s11 = scalar_lea.hbm %s6306_s4, 768 }
  0x13   :  { %s35_s8 = sshll.u32 %s5171_s7, 4  ;;  %p5143_p8 = scmp.ne.s32.totalorder %s6306_s4, %s5142_s11  ;;  %s36_s8 = int_to_ptr.vmem [resolvable:$true] %s35_s8 }
  0x14   :  { %p5146_p9 = scmp.lt.u32.totalorder %s5142_s11, %s6306_s4 }
  0x16   :  { %p5148_p10 = pnand %p5146_p9, %p5143_p8 }
  0x18   :  { %5151 = shalt.err (!%p5148_p10)
}
  0x19   :  { %s5152_s16 = scalar_lea.vmem %s36_s8, 768  ;;  %p5157_p12 = scmp.lt.s32.totalorder %s36_s8, %s36_s8 }
  0x1a   :  { %p5153_p11 = scmp.ne.s32.totalorder %s36_s8, %s5152_s16  ;;  %p5158_p13 = scmp.lt.s32.totalorder %s5152_s16, %s5152_s16 }
  0x1c   :  { %p5159_p0 = por %p5158_p13, %p5157_p12 }
  0x1e   :  { %p5160_p1 = pnand %p5159_p0, %p5153_p11 }
  0x20   :  { %5163 = shalt.err (!%p5160_p1)
}
  0x21   :  { %41 = dma.hbm_to_vmem [thread:$0]  %s6306_s4, 768, %s36_s8, [#allocation5], %s5169_s28, %s5169_s28, %s5170_s29  }
  0x22   :  { %5164 = dma.done.wait [#allocation3], 1024  }
  0x23   :  { %5165 = vsyncadd [#allocation3], 4294966272 }
  0x24   :  { %5166 = dma.done.wait [#allocation5], 768  }
  0x25   :  { %5167 = vsyncadd [#allocation5], 4294966528  ;;  %v64_v0 = vlaneseq  ;;  %v81_v3 = vld [vmem:[%s6303_s1] sm:$0xff]  ;;  %v82_v4 = vld [vmem:[%s6303_s1 + $0x8] sm:$0xff]  ;;  %vm89_vm0 = vcmask 261120   ;;  %vm221_vm1 = vcmask 64512  }
  0x26   :  { %v83_v5 = vld [vmem:[%s6303_s1 + $0x10] sm:$0xff]  ;;  %v4379_v6 = vpack.c.bf16 %v82_v4, %v81_v3  ;;  %v84_v7 = vld [vmem:[%s6303_s1 + $0x18] sm:$0xff]  ;;  %v48_v8 = vld [vmem:[%s6305_s3] sm:$0xff]  ;;  %s5173_s15 = smov 64   ;;  %vm341_vm3 = vcmask 392192   ;;  %s5174_s16 = smov 88  }
  0x27   :  { %v5241_v1 = vshrl.u32 %v64_v0, 7  ;;  %v55_v9 = vld [vmem:[%s6302_s0] sm:$0xff]  ;;  %v4383_v10 = vpack.c.bf16 %v84_v7, %v83_v5  ;;  %v56_v13 = vld [vmem:[%s6302_s0 + $0x8] sm:$0xff]  ;;  %v57_v14 = vld [vmem:[%s6302_s0 + $0x10] sm:$0xff]  ;;  %s5175_s2 = smov 120   ;;  %s5176_s17 = smov 56  }
  0x28   :  { %v61_v11 = vmul.f32 5.656854, %v55_v9  ;;  %4380 = vmatprep.subr.bf16.mxu0 %v4379_v6  ;;  %v62_v15 = vmul.f32 5.656854, %v56_v13  ;;  %v63_v18 = vmul.f32 5.656854, %v57_v14  ;;  %vm5325_vm2 = vmpackc.low %vm221_vm1, %vm221_vm1 }
  0x29   :  { %v66_v2 = vsub.s32 6, %v5241_v1  ;;  %v76_v16 = vsub.s32 7, %v5241_v1  ;;  %4382 = vmatpush3.bf16.msra.mxu0 %v4379_v6  ;;  %v58_v19 = vld [vmem:[%s6302_s0 + $0x18] sm:$0xff]  ;;  %v59_v20 = vld [vmem:[%s6302_s0 + $0x20] sm:$0xff]  ;;  %v60_v26 = vld [vmem:[%s6302_s0 + $0x28] sm:$0xff]  ;;  %v87_v31 = vsub.s32 0, %v5241_v1 }
  0x2a   :  { %4384 = vmatprep.subr.bf16.mxu0 %v4383_v10  ;;  %v71_v22 = vmul.f32 5.656854, %v58_v19  ;;  %v72_v25 = vmul.f32 5.656854, %v59_v20  ;;  %v73_v28 = vmul.f32 5.656854, %v60_v26 }
  0x2b   :  { %v67_v12 = vrot.slane %v48_v8, %v66_v2  ;;  %v77_v23 = vrot.slane %v48_v8, %v76_v16  ;;  %v88_v32 = vrot.slane %v48_v8, %v87_v31  ;;  %s5172_s0 = smov 96   ;;  %v5369_v26 = vld [vmem:[#allocation4 + $0x28] sm:$0xff]  ;;  %s5177_s18 = smov 80   ;;  %vm1637_vm4 = vcmask 130048  }
  0x2c   :  { %s5178_s19 = smov 112   ;;  %s5179_s20 = smov 48   ;;  %vm1644_vm5 = vcmask 195584  }
  0x2d   :  { %v68_v17 = vadd.f32 %v67_v12, %v61_v11  ;;  %v69_v21 = vadd.f32 %v67_v12, %v62_v15  ;;  %4386 = vmatpush3.bf16.msra.mxu0 %v4383_v10  ;;  %v70_v24 = vadd.f32 %v67_v12, %v63_v18  ;;  %v78_v27 = vadd.f32 %v77_v23, %v71_v22  ;;  %v5351_v10 = vld [vmem:[#allocation4 + $0x8] sm:$0xff]  ;;  %v5353_v11 = vld [vmem:[#allocation4] sm:$0xff]  ;;  %v5363_v22 = vld [vmem:[#allocation4 + $0x18] sm:$0xff]  ;;  %s5180_s21 = smov 72   ;;  %s5181_s22 = smov 104  }
  0x2e   :  { %v79_v29 = vadd.f32 %v77_v23, %v72_v25  ;;  %v80_v30 = vadd.f32 %v77_v23, %v73_v28  ;;  %v5365_v23 = vld [vmem:[#allocation4 + $0x10] sm:$0xff]  ;;  %s5182_s23 = smov 40   ;;  %s5183_s4 = smov 16  }
  0x2f   :  { %3983 = vmatprep.mubr.msk.f32.mxu0 %vm89_vm0, %v68_v17  ;;  %s5184_s24 = smov 24  }
  0x30   :  { %3984 = vmatmul.mubr.msk.f32.vlgmr.msra.gmra.mrb[0].mxu0 %vm89_vm0, %v69_v21 }
  0x31   :  { %3986 = vmatprep.mubr.msk.f32.mxu0 %vm89_vm0, %v70_v24 }
  0x34   :  { %3987 = vmatmul.mubr.msk.f32.gmra.mrb[2].mxu0 %vm89_vm0, %v78_v27 }
  0x35   :  { %3989 = vmatprep.mubr.msk.f32.mxu0 %vm89_vm0, %v79_v29 }
  0x38   :  { %3990 = vmatmul.mubr.msk.f32.gmra.mrb[4].mxu0 %vm89_vm0, %v80_v30  ;;  %v5376_v30 = vld [vmem:[#allocation4 + $0x20] sm:$0xff] }
 0x103   :  { %v3985_v33 = vpop.f32.mrb[0].mxu0 }
 0x104   :  { %v5285_v34 = vadd.f32 %v3985_v33, %v88_v32  ;;  %v174_v35 = vpop.f32.mrb[1].mxu0 }
 0x105   :  { %v5287_v36 = vadd.f32 %v174_v35, %v88_v32 }
 0x107   :  { %v3988_v37 = vpop.f32.mrb[2].mxu0  ;;  %4004 = vmatprep.mubr.msk.f32.mxu1 %vm221_vm1, %v5287_v36  ;;  %v5293_v38 = vpack.i.bf16 %v5285_v34, %v5287_v36 }
 0x108   :  { %v5295_v39 = vadd.f32 %v3988_v37, %v88_v32  ;;  %v184_v40 = vpop.f32.mrb[3].mxu0 }
 0x109   :  { %v5297_v41 = vadd.f32 %v184_v40, %v88_v32  ;;  %4669 = vrot.lane.b32.xlu0 %v5293_v38, %s5172_s0 }
 0x10b   :  { %v3991_v42 = vpop.f32.mrb[4].mxu0  ;;  %v5303_v43 = vpack.i.bf16 %v5295_v39, %v5297_v41 }
 0x10c   :  { %v5305_v44 = vadd.f32 %v3991_v42, %v88_v32  ;;  %v194_v45 = vpop.f32.mrb[5].mxu0 }
 0x10d   :  { %v5307_v46 = vadd.f32 %v194_v45, %v88_v32  ;;  %4674 = vrot.lane.b32.xlu0 %v5303_v43, %s5172_s0 }
 0x10f   :  { %v5313_v47 = vpack.i.bf16 %v5305_v44, %v5307_v46 }
 0x111   :  { %4679 = vrot.lane.b32.xlu1 %v5313_v47, %s5172_s0  ;;  %4684 = vrot.lane.b32.xlu0 %v5293_v38, %s5173_s15 }
 0x115   :  { %4689 = vrot.lane.b32.xlu1 %v5303_v43, %s5173_s15  ;;  %4694 = vrot.lane.b32.xlu0 %v5313_v47, %s5173_s15 }
 0x17b   :  { %v4670_v48 = vpop.permute.xlu0 %4669 }
 0x17c   :  { %v4672_v49 = vunpack.i.h.bf16 %v4670_v48  ;;  %v4671_v50 = vunpack.i.l.bf16 %v4670_v48 }
 0x17e   :  { %v4387_v52 = vpack.c.bf16 %v4672_v49, %v4671_v50 }
 0x17f   :  { %v4675_v53 = vpop.permute.xlu0 %4674 }
 0x180   :  { %v4677_v54 = vunpack.i.h.bf16 %v4675_v53  ;;  %v4676_v55 = vunpack.i.l.bf16 %v4675_v53  ;;  %4389 = vmatprep.subr.msk.bf16.mxu1 %vm5325_vm2, %v4387_v52 }
 0x181   :  { %4392 = vmatpush3.bf16.xpose.msk.msra.mxu1 %vm5325_vm2, %v4387_v52 }
 0x182   :  { %v4393_v56 = vpack.c.bf16 %v4677_v54, %v4676_v55 }
 0x183   :  { %v4680_v57 = vpop.permute.xlu1 %4679  ;;  %v4685_v58 = vpop.permute.xlu0 %4684 }
 0x184   :  { %v4682_v59 = vunpack.i.h.bf16 %v4680_v57  ;;  %v4681_v60 = vunpack.i.l.bf16 %v4680_v57  ;;  %v4687_v61 = vunpack.i.h.bf16 %v4685_v58  ;;  %v4686_v62 = vunpack.i.l.bf16 %v4685_v58  ;;  %4395 = vmatprep.subr.msk.bf16.mxu1 %vm5325_vm2, %v4393_v56 }
 0x186   :  { %v4399_v63 = vpack.c.bf16 %v4682_v59, %v4681_v60  ;;  %v4405_v0 = vpack.c.bf16 %v4687_v61, %v4686_v62 }
 0x187   :  { %v4690_v2 = vpop.permute.xlu1 %4689  ;;  %v4695_v3 = vpop.permute.xlu0 %4694 }
 0x188   :  { %v4692_v4 = vunpack.i.h.bf16 %v4690_v2  ;;  %v4691_v5 = vunpack.i.l.bf16 %v4690_v2  ;;  %4406 = vmatprep.subr.bf16.mxu0 %v4405_v0  ;;  %v4697_v6 = vunpack.i.h.bf16 %v4695_v3  ;;  %v4696_v7 = vunpack.i.l.bf16 %v4695_v3 }
 0x189   :  { %4398 = vmatpush3.bf16.xpose.msk.msra.mxu1 %vm5325_vm2, %v4393_v56  ;;  %4408 = vmatpush3.bf16.msra.mxu0 %v4405_v0 }
 0x18a   :  { %v4409_v8 = vpack.c.bf16 %v4692_v4, %v4691_v5  ;;  %4401 = vmatprep.subr.msk.bf16.mxu1 %vm5325_vm2, %v4399_v63  ;;  %v4413_v9 = vpack.c.bf16 %v4697_v6, %v4696_v7 }
 0x18c   :  { %4410 = vmatprep.subr.bf16.mxu0 %v4409_v8 }
 0x18d   :  { %4412 = vmatpush3.bf16.msra.mxu0 %v4409_v8 }
 0x18e   :  { %4414 = vmatprep.subr.bf16.mxu0 %v4413_v9 }
 0x191   :  { %4404 = vmatpush3.bf16.xpose.msk.msra.mxu1 %vm5325_vm2, %v4399_v63  ;;  %4416 = vmatpush3.bf16.msra.mxu0 %v4413_v9 }
 0x198   :  { %4005 = vmatmul.mubr.msk.f32.vlgmr.msra.gmra.mrb[0].mxu1 %vm221_vm1, %v5285_v34 }
 0x199   :  { %4007 = vmatprep.mubr.msk.f32.mxu1 %vm221_vm1, %v5297_v41 }
 0x19c   :  { %4008 = vmatmul.mubr.msk.f32.gmra.mrb[2].mxu1 %vm221_vm1, %v5295_v39 }
 0x19d   :  { %4010 = vmatprep.mubr.msk.f32.mxu1 %vm221_vm1, %v5307_v46 }
 0x1a0   :  { %4011 = vmatmul.mubr.msk.f32.gmra.mrb[4].mxu1 %vm221_vm1, %v5305_v44 }
 0x26b   :  { %v4006_v12 = vpop.f32.mrb[0].mxu1 }
 0x26c   :  { %v318_v13 = vadd.f32 %v4006_v12, %v5351_v10  ;;  %v312_v14 = vpop.f32.mrb[1].mxu1 }
 0x26d   :  { %v313_v15 = vadd.f32 %v312_v14, %v5353_v11 }
 0x26e   :  { %v345_v16 = vsel %vm341_vm3, %v318_v13, -inf }
 0x26f   :  { %346 = vmax.xlane.f32.xlu0 %v345_v16  ;;  %v4009_v17 = vpop.f32.mrb[2].mxu1  ;;  %v342_v18 = vsel %vm341_vm3, %v313_v15, -inf }
 0x270   :  { %v322_v19 = vpop.f32.mrb[3].mxu1  ;;  %343 = vmax.xlane.f32.xlu1 %v342_v18  ;;  %v328_v24 = vadd.f32 %v4009_v17, %v5363_v22 }
 0x271   :  { %v323_v25 = vadd.f32 %v322_v19, %v5365_v23 }
 0x272   :  { %v351_v27 = vsel %vm341_vm3, %v328_v24, -inf }
 0x273   :  { %v4012_v20 = vpop.f32.mrb[4].mxu1  ;;  %v348_v29 = vsel %vm341_vm3, %v323_v25, -inf }
 0x274   :  { %v332_v21 = vpop.f32.mrb[5].mxu1  ;;  %v5373_v28 = vadd.f32 %v4012_v20, %v5369_v26 }
 0x275   :  { %v333_v31 = vadd.f32 %v332_v21, %v5376_v30 }
 0x276   :  { %v357_v32 = vsel %vm341_vm3, %v5373_v28, -inf }
 0x277   :  { %v354_v33 = vsel %vm341_vm3, %v333_v31, -inf }
 0x281   :  { %4699 = vrot.lane.b32.xlu1 %v5293_v38, %s5174_s16 }
 0x285   :  { %4704 = vrot.lane.b32.xlu0 %v5303_v43, %s5174_s16 }
 0x2a4   :  { %352 = vmax.xlane.f32.xlu0 %v351_v27 }
 0x2a5   :  { %349 = vmax.xlane.f32.xlu1 %v348_v29 }
 0x2a9   :  { %358 = vmax.xlane.f32.xlu1 %v357_v32 }
 0x2ad   :  { %355 = vmax.xlane.f32.xlu1 %v354_v33 }
 0x2ba   :  { %4709 = vrot.lane.b32.xlu0 %v5313_v47, %s5174_s16 }
 0x2be   :  { %541 = vrot.lane.b32.xlu0 %v5285_v34, %s5175_s2  ;;  %539 = vrot.lane.b32.xlu1 %v5287_v36, %s5175_s2 }
 0x2c2   :  { %545 = vrot.lane.b32.xlu0 %v5295_v39, %s5175_s2  ;;  %543 = vrot.lane.b32.xlu1 %v5297_v41, %s5175_s2 }
 0x2c6   :  { %549 = vrot.lane.b32.xlu0 %v5305_v44, %s5175_s2  ;;  %547 = vrot.lane.b32.xlu1 %v5307_v46, %s5175_s2 }
 0x2ca   :  { %4714 = vrot.lane.b32.xlu0 %v5293_v38, %s5176_s17  ;;  %4719 = vrot.lane.b32.xlu1 %v5303_v43, %s5176_s17 }
 0x2ce   :  { %4724 = vrot.lane.b32.xlu0 %v5313_v47, %s5176_s17 }
 0x2fc   :  { %v347_v35 = vpop.xlane.xlu0 %346 }
 0x2fd   :  { %v361_v37 = vsub.f32 %v318_v13, %v347_v35  ;;  %v344_v40 = vpop.xlane.xlu1 %343 }
 0x2fe   :  { %v360_v42 = vsub.f32 %v313_v15, %v344_v40 }
 0x2ff   :  { %v368_v45 = vmul.f32 1.442695, %v361_v37 }
 0x300   :  { %v366_v48 = vmul.f32 1.442695, %v360_v42  ;;  %v4705_v54 = vpop.permute.xlu0 %4704 }
 0x301   :  { %v4700_v49 = vpop.permute.xlu1 %4699  ;;  %v4707_v55 = vunpack.i.h.bf16 %v4705_v54  ;;  %v4706_v56 = vunpack.i.l.bf16 %v4705_v54 }
 0x302   :  { %4908 = vpow2.f32 %v366_v48  ;;  %v4702_v50 = vunpack.i.h.bf16 %v4700_v49  ;;  %v4701_v52 = vunpack.i.l.bf16 %v4700_v49 }
 0x303   :  { %4910 = vpow2.f32 %v368_v45  ;;  %v4423_v59 = vpack.c.bf16 %v4707_v55, %v4706_v56 }
 0x304   :  { %v4417_v53 = vpack.c.bf16 %v4702_v50, %v4701_v52 }
 0x306   :  { %4419 = vmatprep.subr.msk.bf16.mxu0 %vm5325_vm2, %v4417_v53 }
 0x30c   :  { %v5404_v57 = vpop.eup %4908 }
 0x30d   :  { %v5406_v58 = vpop.eup %4910  ;;  %4025 = vmatprep.mubr.msk.f32.mxu0 %vm341_vm3, %v5404_v57 }
 0x30e   :  { %4026 = vmatmul.mubr.msk.f32.vlgmr.msra.gmra.mrb[6].mxu0 %vm341_vm3, %v5406_v58 }
 0x30f   :  { %4422 = vmatpush3.bf16.xpose.msk.msra.mxu0 %vm5325_vm2, %v4417_v53 }
 0x310   :  { %4425 = vmatprep.subr.msk.bf16.mxu0 %vm5325_vm2, %v4423_v59 }
 0x317   :  { %4428 = vmatpush3.bf16.xpose.msk.msra.mxu0 %vm5325_vm2, %v4423_v59 }
 0x331   :  { %v353_v60 = vpop.xlane.xlu0 %352 }
 0x332   :  { %v363_v61 = vsub.f32 %v328_v24, %v353_v60  ;;  %v350_v62 = vpop.xlane.xlu1 %349 }
 0x333   :  { %v362_v63 = vsub.f32 %v323_v25, %v350_v62 }
 0x334   :  { %v372_v0 = vmul.f32 1.442695, %v363_v61 }
 0x335   :  { %v370_v2 = vmul.f32 1.442695, %v362_v63  ;;  %v4710_v3 = vpop.permute.xlu0 %4709 }
 0x336   :  { %v4712_v4 = vunpack.i.h.bf16 %v4710_v3  ;;  %v4711_v5 = vunpack.i.l.bf16 %v4710_v3  ;;  %v359_v6 = vpop.xlane.xlu1 %358 }
 0x337   :  { %4912 = vpow2.f32 %v370_v2  ;;  %v365_v8 = vsub.f32 %v5373_v28, %v359_v6 }
 0x338   :  { %4914 = vpow2.f32 %v372_v0  ;;  %v4429_v7 = vpack.c.bf16 %v4712_v4, %v4711_v5 }
 0x339   :  { %v542_v9 = vpop.permute.xlu0 %541  ;;  %v376_v14 = vmul.f32 1.442695, %v365_v8 }
 0x33a   :  { %v356_v12 = vpop.xlane.xlu1 %355  ;;  %4431 = vmatprep.subr.msk.bf16.mxu0 %vm5325_vm2, %v4429_v7 }
 0x33b   :  { %v364_v13 = vsub.f32 %v333_v31, %v356_v12  ;;  %4434 = vmatpush3.bf16.xpose.msk.msra.mxu0 %vm5325_vm2, %v4429_v7 }
 0x33d   :  { %v374_v15 = vmul.f32 1.442695, %v364_v13  ;;  %v546_v16 = vpop.permute.xlu0 %545 }
 0x33e   :  { %v540_v17 = vpop.permute.xlu1 %539 }
 0x33f   :  { %4916 = vpow2.f32 %v374_v15 }
 0x340   :  { %4918 = vpow2.f32 %v376_v14 }
 0x341   :  { %v5423_v18 = vpop.eup %4912  ;;  %v550_v19 = vpop.permute.xlu0 %549 }
 0x342   :  { %v5425_v20 = vpop.eup %4914  ;;  %4028 = vmatprep.mubr.msk.f32.mxu0 %vm341_vm3, %v5423_v18  ;;  %v544_v21 = vpop.permute.xlu1 %543 }
 0x343   :  { %4029 = vmatmul.mubr.msk.f32.gmra.mrb[8].mxu0 %vm341_vm3, %v5425_v20 }
 0x345   :  { %v4715_v24 = vpop.permute.xlu0 %4714 }
 0x346   :  { %v4717_v25 = vunpack.i.h.bf16 %v4715_v24  ;;  %v4716_v27 = vunpack.i.l.bf16 %v4715_v24  ;;  %v548_v28 = vpop.permute.xlu1 %547 }
 0x348   :  { %v4435_v29 = vpack.c.bf16 %v4717_v25, %v4716_v27 }
 0x349   :  { %v5431_v31 = vpop.eup %4916  ;;  %v4725_v32 = vpop.permute.xlu0 %4724 }
 0x34a   :  { %v5433_v33 = vpop.eup %4918  ;;  %4031 = vmatprep.mubr.msk.f32.mxu0 %vm341_vm3, %v5431_v31  ;;  %4436 = vmatprep.subr.bf16.mxu1 %v4435_v29  ;;  %v4720_v35 = vpop.permute.xlu1 %4719  ;;  %v4727_v37 = vunpack.i.h.bf16 %v4725_v32  ;;  %v4726_v40 = vunpack.i.l.bf16 %v4725_v32 }
 0x34b   :  { %v4722_v42 = vunpack.i.h.bf16 %v4720_v35  ;;  %v4721_v45 = vunpack.i.l.bf16 %v4720_v35  ;;  %4032 = vmatmul.mubr.msk.f32.gmra.mrb[10].mxu0 %vm341_vm3, %v5433_v33  ;;  %4438 = vmatpush3.bf16.msra.mxu1 %v4435_v29 }
 0x34c   :  { %4046 = vmatprep.mubr.msk.f32.mxu0 %vm221_vm1, %v540_v17  ;;  %v4443_v49 = vpack.c.bf16 %v4727_v37, %v4726_v40 }
 0x34d   :  { %v4439_v48 = vpack.c.bf16 %v4722_v42, %v4721_v45 }
 0x34f   :  { %4047 = vmatmul.mubr.msk.f32.vlgmr.msra.gmra.mrb[12].mxu0 %vm221_vm1, %v542_v9  ;;  %4440 = vmatprep.subr.bf16.mxu1 %v4439_v48 }
 0x350   :  { %4049 = vmatprep.mubr.msk.f32.mxu0 %vm221_vm1, %v544_v21  ;;  %4442 = vmatpush3.bf16.msra.mxu1 %v4439_v48 }
 0x351   :  { %4444 = vmatprep.subr.bf16.mxu1 %v4443_v49 }
 0x353   :  { %4050 = vmatmul.mubr.msk.f32.gmra.mrb[14].mxu0 %vm221_vm1, %v546_v16 }
 0x354   :  { %4052 = vmatprep.mubr.msk.f32.mxu0 %vm221_vm1, %v548_v28  ;;  %4446 = vmatpush3.bf16.msra.mxu1 %v4443_v49 }
 0x357   :  { %4053 = vmatmul.mubr.msk.f32.gmra.mrb[16].mxu0 %vm221_vm1, %v550_v19 }
 0x3e1   :  { %v5445_v50 = vpop.f32.mrb[6].mxu0 }
 0x3e2   :  { %v5447_v52 = vpop.f32.mrb[7].mxu0 }
 0x416   :  { %v5449_v53 = vpop.f32.mrb[8].mxu0 }
 0x417   :  { %v5451_v54 = vpop.f32.mrb[9].mxu0 }
 0x41e   :  { %v5453_v55 = vpop.f32.mrb[10].mxu0 }
 0x41f   :  { %v5455_v56 = vpop.f32.mrb[11].mxu0 }
 0x422   :  { %v4048_v59 = vpop.f32.mrb[12].mxu0 }
 0x423   :  { %v659_v60 = vadd.f32 %v4048_v59, %v5351_v10  ;;  %v653_v61 = vpop.f32.mrb[13].mxu0 }
 0x424   :  { %v654_v62 = vadd.f32 %v653_v61, %v5353_v11 }
 0x425   :  { %v685_v63 = vsel %vm341_vm3, %v659_v60, -inf }
 0x426   :  { %686 = vmax.xlane.f32.xlu0 %v685_v63  ;;  %v4051_v0 = vpop.f32.mrb[14].mxu0  ;;  %v682_v2 = vsel %vm341_vm3, %v654_v62, -inf }
 0x427   :  { %v663_v3 = vpop.f32.mrb[15].mxu0  ;;  %683 = vmax.xlane.f32.xlu1 %v682_v2  ;;  %v669_v6 = vadd.f32 %v4051_v0, %v5363_v22 }
 0x428   :  { %v664_v7 = vadd.f32 %v663_v3, %v5365_v23 }
 0x429   :  { %v691_v8 = vsel %vm341_vm3, %v669_v6, -inf }
 0x42a   :  { %v4054_v4 = vpop.f32.mrb[16].mxu0  ;;  %v688_v12 = vsel %vm341_vm3, %v664_v7, -inf }
 0x42b   :  { %v673_v5 = vpop.f32.mrb[17].mxu0  ;;  %v5469_v9 = vadd.f32 %v4054_v4, %v5369_v26 }
 0x42c   :  { %v674_v13 = vadd.f32 %v673_v5, %v5376_v30 }
 0x42d   :  { %v697_v14 = vsel %vm341_vm3, %v5469_v9, -inf }
 0x42e   :  { %v694_v15 = vsel %vm341_vm3, %v674_v13, -inf }
 0x438   :  { %4729 = vrot.lane.b32.xlu1 %v5293_v38, %s5177_s18 }
 0x43c   :  { %4734 = vrot.lane.b32.xlu0 %v5303_v43, %s5177_s18 }
 0x45b   :  { %692 = vmax.xlane.f32.xlu0 %v691_v8 }
 0x45c   :  { %689 = vmax.xlane.f32.xlu1 %v688_v12 }
 0x460   :  { %698 = vmax.xlane.f32.xlu1 %v697_v14 }
 0x464   :  { %695 = vmax.xlane.f32.xlu1 %v694_v15 }
 0x471   :  { %4739 = vrot.lane.b32.xlu0 %v5313_v47, %s5177_s18 }
 0x475   :  { %881 = vrot.lane.b32.xlu0 %v5285_v34, %s5178_s19  ;;  %879 = vrot.lane.b32.xlu1 %v5287_v36, %s5178_s19 }
 0x479   :  { %885 = vrot.lane.b32.xlu0 %v5295_v39, %s5178_s19  ;;  %883 = vrot.lane.b32.xlu1 %v5297_v41, %s5178_s19 }
 0x47d   :  { %889 = vrot.lane.b32.xlu0 %v5305_v44, %s5178_s19  ;;  %887 = vrot.lane.b32.xlu1 %v5307_v46, %s5178_s19 }
 0x481   :  { %4744 = vrot.lane.b32.xlu0 %v5293_v38, %s5179_s20  ;;  %4749 = vrot.lane.b32.xlu1 %v5303_v43, %s5179_s20 }
 0x485   :  { %4754 = vrot.lane.b32.xlu0 %v5313_v47, %s5179_s20 }
 0x4b3   :  { %v687_v16 = vpop.xlane.xlu0 %686 }
 0x4b4   :  { %v701_v17 = vsub.f32 %v659_v60, %v687_v16  ;;  %v684_v19 = vpop.xlane.xlu1 %683 }
 0x4b5   :  { %v700_v21 = vsub.f32 %v654_v62, %v684_v19 }
 0x4b6   :  { %v708_v24 = vmul.f32 1.442695, %v701_v17 }
 0x4b7   :  { %v706_v25 = vmul.f32 1.442695, %v700_v21  ;;  %v4735_v35 = vpop.permute.xlu0 %4734 }
 0x4b8   :  { %v4730_v27 = vpop.permute.xlu1 %4729  ;;  %v4737_v37 = vunpack.i.h.bf16 %v4735_v35  ;;  %v4736_v40 = vunpack.i.l.bf16 %v4735_v35 }
 0x4b9   :  { %4920 = vpow2.f32 %v706_v25  ;;  %v4732_v28 = vunpack.i.h.bf16 %v4730_v27  ;;  %v4731_v29 = vunpack.i.l.bf16 %v4730_v27 }
 0x4ba   :  { %4922 = vpow2.f32 %v708_v24  ;;  %v4453_v48 = vpack.c.bf16 %v4737_v37, %v4736_v40 }
 0x4bb   :  { %v4447_v32 = vpack.c.bf16 %v4732_v28, %v4731_v29 }
 0x4bd   :  { %4449 = vmatprep.subr.msk.bf16.mxu1 %vm5325_vm2, %v4447_v32 }
 0x4c3   :  { %v5498_v42 = vpop.eup %4920 }
 0x4c4   :  { %v5500_v45 = vpop.eup %4922  ;;  %4067 = vmatprep.mubr.msk.f32.mxu1 %vm341_vm3, %v5498_v42 }
 0x4c5   :  { %4068 = vmatmul.mubr.msk.f32.vlgmr.msra.gmra.mrb[6].mxu1 %vm341_vm3, %v5500_v45 }
 0x4c6   :  { %4452 = vmatpush3.bf16.xpose.msk.msra.mxu1 %vm5325_vm2, %v4447_v32 }
 0x4c7   :  { %4455 = vmatprep.subr.msk.bf16.mxu1 %vm5325_vm2, %v4453_v48 }
 0x4ce   :  { %4458 = vmatpush3.bf16.xpose.msk.msra.mxu1 %vm5325_vm2, %v4453_v48 }
 0x4e8   :  { %v693_v49 = vpop.xlane.xlu0 %692 }
 0x4e9   :  { %v703_v59 = vsub.f32 %v669_v6, %v693_v49  ;;  %v690_v60 = vpop.xlane.xlu1 %689 }
 0x4ea   :  { %v702_v61 = vsub.f32 %v664_v7, %v690_v60 }
 0x4eb   :  { %v712_v62 = vmul.f32 1.442695, %v703_v59 }
 0x4ec   :  { %v710_v63 = vmul.f32 1.442695, %v702_v61  ;;  %v4740_v0 = vpop.permute.xlu0 %4739 }
 0x4ed   :  { %v4742_v2 = vunpack.i.h.bf16 %v4740_v0  ;;  %v4741_v3 = vunpack.i.l.bf16 %v4740_v0  ;;  %v699_v4 = vpop.xlane.xlu1 %698 }
 0x4ee   :  { %4924 = vpow2.f32 %v710_v63  ;;  %v705_v8 = vsub.f32 %v5469_v9, %v699_v4 }
 0x4ef   :  { %4926 = vpow2.f32 %v712_v62  ;;  %v4459_v5 = vpack.c.bf16 %v4742_v2, %v4741_v3 }
 0x4f0   :  { %v882_v12 = vpop.permute.xlu0 %881  ;;  %v716_v6 = vmul.f32 1.442695, %v705_v8 }
 0x4f1   :  { %v696_v14 = vpop.xlane.xlu1 %695  ;;  %4461 = vmatprep.subr.msk.bf16.mxu1 %vm5325_vm2, %v4459_v5 }
 0x4f2   :  { %v704_v15 = vsub.f32 %v674_v13, %v696_v14  ;;  %4464 = vmatpush3.bf16.xpose.msk.msra.mxu1 %vm5325_vm2, %v4459_v5 }
 0x4f4   :  { %v714_v7 = vmul.f32 1.442695, %v704_v15  ;;  %v886_v16 = vpop.permute.xlu0 %885 }
 0x4f5   :  { %v880_v17 = vpop.permute.xlu1 %879 }
 0x4f6   :  { %4928 = vpow2.f32 %v714_v7 }
 0x4f7   :  { %4930 = vpow2.f32 %v716_v6 }
 0x4f8   :  { %v5517_v19 = vpop.eup %4924  ;;  %v890_v21 = vpop.permute.xlu0 %889 }
 0x4f9   :  { %v5519_v24 = vpop.eup %4926  ;;  %4070 = vmatprep.mubr.msk.f32.mxu1 %vm341_vm3, %v5517_v19  ;;  %v884_v9 = vpop.permute.xlu1 %883 }
 0x4fa   :  { %4071 = vmatmul.mubr.msk.f32.gmra.mrb[8].mxu1 %vm341_vm3, %v5519_v24 }
 0x4fc   :  { %v4745_v13 = vpop.permute.xlu0 %4744 }
 0x4fd   :  { %v4747_v25 = vunpack.i.h.bf16 %v4745_v13  ;;  %v4746_v27 = vunpack.i.l.bf16 %v4745_v13  ;;  %v888_v28 = vpop.permute.xlu1 %887 }
 0x4ff   :  { %v4465_v29 = vpack.c.bf16 %v4747_v25, %v4746_v27 }
 0x500   :  { %v5525_v32 = vpop.eup %4928  ;;  %v4755_v35 = vpop.permute.xlu0 %4754 }
 0x501   :  { %v5527_v37 = vpop.eup %4930  ;;  %4073 = vmatprep.mubr.msk.f32.mxu1 %vm341_vm3, %v5525_v32  ;;  %4466 = vmatprep.subr.bf16.mxu0 %v4465_v29  ;;  %v4750_v40 = vpop.permute.xlu1 %4749  ;;  %v4757_v48 = vunpack.i.h.bf16 %v4755_v35  ;;  %v4756_v49 = vunpack.i.l.bf16 %v4755_v35 }
 0x502   :  { %v4752_v59 = vunpack.i.h.bf16 %v4750_v40  ;;  %v4751_v60 = vunpack.i.l.bf16 %v4750_v40  ;;  %4074 = vmatmul.mubr.msk.f32.gmra.mrb[10].mxu1 %vm341_vm3, %v5527_v37  ;;  %4468 = vmatpush3.bf16.msra.mxu0 %v4465_v29 }
 0x503   :  { %4088 = vmatprep.mubr.msk.f32.mxu1 %vm221_vm1, %v880_v17  ;;  %v4473_v62 = vpack.c.bf16 %v4757_v48, %v4756_v49 }
 0x504   :  { %v4469_v61 = vpack.c.bf16 %v4752_v59, %v4751_v60 }
 0x506   :  { %4089 = vmatmul.mubr.msk.f32.vlgmr.msra.gmra.mrb[12].mxu1 %vm221_vm1, %v882_v12  ;;  %4470 = vmatprep.subr.bf16.mxu0 %v4469_v61 }
 0x507   :  { %4091 = vmatprep.mubr.msk.f32.mxu1 %vm221_vm1, %v884_v9  ;;  %4472 = vmatpush3.bf16.msra.mxu0 %v4469_v61 }
 0x508   :  { %4474 = vmatprep.subr.bf16.mxu0 %v4473_v62 }
 0x50a   :  { %4092 = vmatmul.mubr.msk.f32.gmra.mrb[14].mxu1 %vm221_vm1, %v886_v16 }
 0x50b   :  { %4094 = vmatprep.mubr.msk.f32.mxu1 %vm221_vm1, %v888_v28  ;;  %4476 = vmatpush3.bf16.msra.mxu0 %v4473_v62 }
 0x50e   :  { %4095 = vmatmul.mubr.msk.f32.gmra.mrb[16].mxu1 %vm221_vm1, %v890_v21 }
 0x598   :  { %v5539_v63 = vpop.f32.mrb[6].mxu1 }
 0x599   :  { %v5541_v0 = vpop.f32.mrb[7].mxu1 }
 0x5cd   :  { %v5543_v2 = vpop.f32.mrb[8].mxu1 }
 0x5ce   :  { %v5545_v3 = vpop.f32.mrb[9].mxu1 }
 0x5d5   :  { %v5547_v4 = vpop.f32.mrb[10].mxu1 }
 0x5d6   :  { %v5549_v5 = vpop.f32.mrb[11].mxu1 }
 0x5d9   :  { %v4090_v8 = vpop.f32.mrb[12].mxu1 }
 0x5da   :  { %v999_v12 = vadd.f32 %v4090_v8, %v5351_v10  ;;  %v993_v14 = vpop.f32.mrb[13].mxu1 }
 0x5db   :  { %v994_v15 = vadd.f32 %v993_v14, %v5353_v11 }
 0x5dc   :  { %v1025_v6 = vsel %vm341_vm3, %v999_v12, -inf }
 0x5dd   :  { %1026 = vmax.xlane.f32.xlu0 %v1025_v6  ;;  %v4093_v7 = vpop.f32.mrb[14].mxu1  ;;  %v1022_v16 = vsel %vm341_vm3, %v994_v15, -inf }
 0x5de   :  { %v1003_v17 = vpop.f32.mrb[15].mxu1  ;;  %1023 = vmax.xlane.f32.xlu1 %v1022_v16  ;;  %v1009_v13 = vadd.f32 %v4093_v7, %v5363_v22 }
 0x5df   :  { %v1004_v25 = vadd.f32 %v1003_v17, %v5365_v23 }
 0x5e0   :  { %v1031_v27 = vsel %vm341_vm3, %v1009_v13, -inf }
 0x5e1   :  { %v4096_v21 = vpop.f32.mrb[16].mxu1  ;;  %v1028_v29 = vsel %vm341_vm3, %v1004_v25, -inf }
 0x5e2   :  { %v1013_v9 = vpop.f32.mrb[17].mxu1  ;;  %v1019_v28 = vadd.f32 %v4096_v21, %v5369_v26 }
 0x5e3   :  { %v1014_v35 = vadd.f32 %v1013_v9, %v5376_v30 }
 0x5e4   :  { %v1037_v40 = vsel %vm341_vm3, %v1019_v28, -inf }
 0x5e5   :  { %v1034_v48 = vsel %vm341_vm3, %v1014_v35, -inf }
 0x5ef   :  { %4759 = vrot.lane.b32.xlu1 %v5293_v38, %s5180_s21 }
 0x5f3   :  { %4764 = vrot.lane.b32.xlu0 %v5303_v43, %s5180_s21 }
 0x612   :  { %1032 = vmax.xlane.f32.xlu0 %v1031_v27 }
 0x613   :  { %1029 = vmax.xlane.f32.xlu1 %v1028_v29 }
 0x617   :  { %1038 = vmax.xlane.f32.xlu1 %v1037_v40 }
 0x61b   :  { %1035 = vmax.xlane.f32.xlu1 %v1034_v48 }
 0x628   :  { %4769 = vrot.lane.b32.xlu0 %v5313_v47, %s5180_s21 }
 0x62c   :  { %1221 = vrot.lane.b32.xlu0 %v5285_v34, %s5181_s22  ;;  %1219 = vrot.lane.b32.xlu1 %v5287_v36, %s5181_s22 }
 0x630   :  { %1225 = vrot.lane.b32.xlu0 %v5295_v39, %s5181_s22  ;;  %1223 = vrot.lane.b32.xlu1 %v5297_v41, %s5181_s22 }
 0x634   :  { %1229 = vrot.lane.b32.xlu0 %v5305_v44, %s5181_s22  ;;  %1227 = vrot.lane.b32.xlu1 %v5307_v46, %s5181_s22 }
 0x638   :  { %4774 = vrot.lane.b32.xlu1 %v5293_v38, %s5182_s23 }
 0x66a   :  { %v1027_v34 = vpop.xlane.xlu0 %1026 }
 0x66b   :  { %v1041_v49 = vsub.f32 %v999_v12, %v1027_v34  ;;  %v1024_v59 = vpop.xlane.xlu1 %1023 }
 0x66c   :  { %v1040_v36 = vsub.f32 %v994_v15, %v1024_v59 }
 0x66d   :  { %v1048_v60 = vmul.f32 1.442695, %v1041_v49 }
 0x66e   :  { %v1046_v61 = vmul.f32 1.442695, %v1040_v36  ;;  %v4765_v44 = vpop.permute.xlu0 %4764 }
 0x66f   :  { %v4760_v39 = vpop.permute.xlu1 %4759  ;;  %v4767_v46 = vunpack.i.h.bf16 %v4765_v44  ;;  %v4766_v14 = vunpack.i.l.bf16 %v4765_v44 }
 0x670   :  { %4932 = vpow2.f32 %v1046_v61  ;;  %v4762_v62 = vunpack.i.h.bf16 %v4760_v39  ;;  %v4761_v41 = vunpack.i.l.bf16 %v4760_v39 }
 0x671   :  { %4934 = vpow2.f32 %v1048_v60  ;;  %v4483_v12 = vpack.c.bf16 %v4767_v46, %v4766_v14 }
 0x672   :  { %v4477_v8 = vpack.c.bf16 %v4762_v62, %v4761_v41 }
 0x674   :  { %4479 = vmatprep.subr.msk.bf16.mxu0 %vm5325_vm2, %v4477_v8 }
 0x67a   :  { %v5585_v6 = vpop.eup %4932 }
 0x67b   :  { %v5587_v38 = vpop.eup %4934  ;;  %4109 = vmatprep.mubr.msk.f32.mxu0 %vm341_vm3, %v5585_v6 }
 0x67c   :  { %4110 = vmatmul.mubr.msk.f32.vlgmr.msra.gmra.mrb[18].mxu0 %vm341_vm3, %v5587_v38 }
 0x67d   :  { %4482 = vmatpush3.bf16.xpose.msk.msra.mxu0 %vm5325_vm2, %v4477_v8 }
 0x67e   :  { %4485 = vmatprep.subr.msk.bf16.mxu0 %vm5325_vm2, %v4483_v12 }
 0x685   :  { %4488 = vmatpush3.bf16.xpose.msk.msra.mxu0 %vm5325_vm2, %v4483_v12 }
 0x69f   :  { %v1033_v15 = vpop.xlane.xlu0 %1032 }
 0x6a0   :  { %v1043_v7 = vsub.f32 %v1009_v13, %v1033_v15  ;;  %v1030_v16 = vpop.xlane.xlu1 %1029 }
 0x6a1   :  { %v1042_v17 = vsub.f32 %v1004_v25, %v1030_v16 }
 0x6a2   :  { %v1052_v21 = vmul.f32 1.442695, %v1043_v7 }
 0x6a3   :  { %v1050_v9 = vmul.f32 1.442695, %v1042_v17  ;;  %v4770_v27 = vpop.permute.xlu0 %4769 }
 0x6a4   :  { %v4772_v29 = vunpack.i.h.bf16 %v4770_v27  ;;  %v4771_v40 = vunpack.i.l.bf16 %v4770_v27  ;;  %v1039_v48 = vpop.xlane.xlu1 %1038 }
 0x6a5   :  { %4936 = vpow2.f32 %v1050_v9  ;;  %v1045_v49 = vsub.f32 %v1019_v28, %v1039_v48 }
 0x6a6   :  { %4938 = vpow2.f32 %v1052_v21  ;;  %v4489_v34 = vpack.c.bf16 %v4772_v29, %v4771_v40 }
 0x6a7   :  { %v1056_v13 = vmul.f32 1.442695, %v1045_v49  ;;  %v1222_v8 = vpop.permute.xlu0 %1221 }
 0x6a8   :  { %v1036_v59 = vpop.xlane.xlu1 %1035  ;;  %4491 = vmatprep.subr.msk.bf16.mxu0 %vm5325_vm2, %v4489_v34 }
 0x6a9   :  { %v1044_v36 = vsub.f32 %v1014_v35, %v1036_v59  ;;  %4494 = vmatpush3.bf16.xpose.msk.msra.mxu0 %vm5325_vm2, %v4489_v34 }
 0x6ab   :  { %v1054_v25 = vmul.f32 1.442695, %v1044_v36  ;;  %v1226_v15 = vpop.permute.xlu0 %1225 }
 0x6ac   :  { %v1220_v60 = vpop.permute.xlu1 %1219 }
 0x6ad   :  { %4940 = vpow2.f32 %v1054_v25 }
 0x6ae   :  { %4942 = vpow2.f32 %v1056_v13 }
 0x6af   :  { %v5603_v61 = vpop.eup %4936  ;;  %v1230_v7 = vpop.permute.xlu0 %1229 }
 0x6b0   :  { %v5605_v39 = vpop.eup %4938  ;;  %4112 = vmatprep.mubr.msk.f32.mxu0 %vm341_vm3, %v5603_v61  ;;  %v1224_v28 = vpop.permute.xlu1 %1223 }
 0x6b1   :  { %4113 = vmatmul.mubr.msk.f32.gmra.mrb[20].mxu0 %vm341_vm3, %v5605_v39 }
 0x6b4   :  { %v1228_v35 = vpop.permute.xlu1 %1227 }
 0x6b7   :  { %v5611_v62 = vpop.eup %4940 }
 0x6b8   :  { %v5613_v41 = vpop.eup %4942  ;;  %4115 = vmatprep.mubr.msk.f32.mxu0 %vm341_vm3, %v5611_v62  ;;  %v4775_v44 = vpop.permute.xlu1 %4774 }
 0x6b9   :  { %v4777_v46 = vunpack.i.h.bf16 %v4775_v44  ;;  %v4776_v14 = vunpack.i.l.bf16 %v4775_v44  ;;  %4116 = vmatmul.mubr.msk.f32.gmra.mrb[22].mxu0 %vm341_vm3, %v5613_v41 }
 0x6ba   :  { %4130 = vmatprep.mubr.msk.f32.mxu0 %vm221_vm1, %v1220_v60 }
 0x6bb   :  { %v4495_v12 = vpack.c.bf16 %v4777_v46, %v4776_v14 }
 0x6bd   :  { %4131 = vmatmul.mubr.msk.f32.vlgmr.msra.gmra.mrb[24].mxu0 %vm221_vm1, %v1222_v8  ;;  %4496 = vmatprep.subr.bf16.mxu1 %v4495_v12 }
 0x6be   :  { %4133 = vmatprep.mubr.msk.f32.mxu0 %vm221_vm1, %v1224_v28  ;;  %4498 = vmatpush3.bf16.msra.mxu1 %v4495_v12  ;;  %v724_v12 = vsel %vm341_vm3, %v5517_v19, 0.0 }
 0x6c1   :  { %4134 = vmatmul.mubr.msk.f32.gmra.mrb[26].mxu0 %vm221_vm1, %v1226_v15 }
 0x6c2   :  { %4136 = vmatprep.mubr.msk.f32.mxu0 %vm221_vm1, %v1228_v35 }
 0x6c5   :  { %4137 = vmatmul.mubr.msk.f32.gmra.mrb[28].mxu0 %vm221_vm1, %v1230_v7 }
 0x74f   :  { %v5625_v16 = vpop.f32.mrb[18].mxu0 }
 0x750   :  { %v5627_v17 = vpop.f32.mrb[19].mxu0 }
 0x784   :  { %v5629_v21 = vpop.f32.mrb[20].mxu0 }
 0x785   :  { %v5631_v9 = vpop.f32.mrb[21].mxu0 }
 0x78c   :  { %v5633_v27 = vpop.f32.mrb[22].mxu0 }
 0x78d   :  { %v5635_v29 = vpop.f32.mrb[23].mxu0 }
 0x790   :  { %v4132_v40 = vpop.f32.mrb[24].mxu0 }
 0x791   :  { %v1339_v48 = vadd.f32 %v4132_v40, %v5351_v10  ;;  %v1333_v34 = vpop.f32.mrb[25].mxu0 }
 0x792   :  { %v1334_v49 = vadd.f32 %v1333_v34, %v5353_v11 }
 0x793   :  { %v1365_v59 = vsel %vm341_vm3, %v1339_v48, -inf }
 0x794   :  { %1366 = vmax.xlane.f32.xlu0 %v1365_v59  ;;  %v4135_v36 = vpop.f32.mrb[26].mxu0  ;;  %v1362_v13 = vsel %vm341_vm3, %v1334_v49, -inf }
 0x795   :  { %v1349_v25 = vadd.f32 %v4135_v36, %v5363_v22  ;;  %v1343_v60 = vpop.f32.mrb[27].mxu0  ;;  %1363 = vmax.xlane.f32.xlu1 %v1362_v13 }
 0x796   :  { %v1344_v28 = vadd.f32 %v1343_v60, %v5365_v23  ;;  %v718_v23 = vsel %vm341_vm3, %v5498_v42, 0.0  ;;  %v727_v42 = vsel %vm341_vm3, %v5519_v24, 0.0 }
 0x797   :  { %v1371_v35 = vsel %vm341_vm3, %v1349_v25, -inf }
 0x798   :  { %v4138_v8 = vpop.f32.mrb[28].mxu0  ;;  %v1368_v10 = vsel %vm341_vm3, %v1344_v28, -inf }
 0x799   :  { %v1359_v44 = vadd.f32 %v4138_v8, %v5369_v26  ;;  %v1353_v11 = vpop.f32.mrb[29].mxu0  ;;  %1369 = vmax.xlane.f32.xlu0 %v1368_v10  ;;  %1372 = vmax.xlane.f32.xlu1 %v1371_v35  ;;  %v1058_v26 = vsel %vm341_vm3, %v5585_v6, 0.0 }
 0x79a   :  { %v1354_v14 = vadd.f32 %v1353_v11, %v5376_v30  ;;  %v721_v30 = vsel %vm341_vm3, %v5500_v45, 0.0  ;;  %v1067_v45 = vsel %vm341_vm3, %v5605_v39, 0.0 }
 0x79b   :  { %v1377_v46 = vsel %vm341_vm3, %v1359_v44, -inf }
 0x79c   :  { %v1374_v22 = vsel %vm341_vm3, %v1354_v14, -inf }
 0x79d   :  { %1378 = vmax.xlane.f32.xlu0 %v1377_v46 }
 0x7a1   :  { %1375 = vmax.xlane.f32.xlu0 %v1374_v22 }
 0x7aa   :  { %4784 = vrot.lane.b32.xlu1 %v5313_v47, %s5182_s23  ;;  %v1061_v47 = vsel %vm341_vm3, %v5587_v38, 0.0 }
 0x7b7   :  { %4779 = vrot.lane.b32.xlu0 %v5303_v43, %s5182_s23  ;;  %v1064_v43 = vsel %vm341_vm3, %v5603_v61, 0.0 }
 0x7ce   :  { %719 = vadd.xlane.f32.xlu1 %v718_v23 }
 0x7d2   :  { %1059 = vadd.xlane.f32.xlu1 %v1058_v26 }
 0x7d6   :  { %722 = vadd.xlane.f32.xlu0 %v721_v30  ;;  %725 = vadd.xlane.f32.xlu1 %v724_v12 }
 0x7da   :  { %1062 = vadd.xlane.f32.xlu0 %v1061_v47  ;;  %1065 = vadd.xlane.f32.xlu1 %v1064_v43  ;;  %v730_v43 = vsel %vm341_vm3, %v5525_v32, 0.0  ;;  %v1070_v32 = vsel %vm341_vm3, %v5611_v62, 0.0  ;;  %v378_v62 = vsel %vm341_vm3, %v5404_v57, 0.0 }
 0x7de   :  { %728 = vadd.xlane.f32.xlu0 %v727_v42 }
 0x7e2   :  { %1068 = vadd.xlane.f32.xlu0 %v1067_v45 }
 0x821   :  { %v1367_v6 = vpop.xlane.xlu0 %1366 }
 0x822   :  { %v1381_v19 = vsub.f32 %v1339_v48, %v1367_v6  ;;  %v1364_v15 = vpop.xlane.xlu1 %1363 }
 0x823   :  { %v1380_v7 = vsub.f32 %v1334_v49, %v1364_v15 }
 0x824   :  { %v1388_v40 = vmul.f32 1.442695, %v1381_v19 }
 0x825   :  { %v1386_v34 = vmul.f32 1.442695, %v1380_v7 }
 0x826   :  { %4944 = vpow2.f32 %v1388_v40  ;;  %v1370_v38 = vpop.xlane.xlu0 %1369  ;;  %v1373_v59 = vpop.xlane.xlu1 %1372 }
 0x827   :  { %4946 = vpow2.f32 %v1386_v34  ;;  %v1382_v61 = vsub.f32 %v1344_v28, %v1370_v38  ;;  %v1383_v36 = vsub.f32 %v1349_v25, %v1373_v59  ;;  %v387_v38 = vsel %vm341_vm3, %v5425_v20, 0.0 }
 0x828   :  { %v384_v59 = vsel %vm341_vm3, %v5423_v18, 0.0 }
 0x829   :  { %v1390_v13 = vmul.f32 1.442695, %v1382_v61  ;;  %v1392_v60 = vmul.f32 1.442695, %v1383_v36  ;;  %v393_v61 = vsel %vm341_vm3, %v5433_v33, 0.0 }
 0x82a   :  { %v1379_v24 = vpop.xlane.xlu0 %1378  ;;  %v4785_v11 = vpop.permute.xlu1 %4784 }
 0x82b   :  { %4948 = vpow2.f32 %v1392_v60  ;;  %v1385_v35 = vsub.f32 %v1359_v44, %v1379_v24  ;;  %v4787_v28 = vunpack.i.h.bf16 %v4785_v11  ;;  %v4786_v26 = vunpack.i.l.bf16 %v4785_v11 }
 0x82c   :  { %4950 = vpow2.f32 %v1390_v13 }
 0x82d   :  { %v1396_v48 = vmul.f32 1.442695, %v1385_v35  ;;  %v4503_v45 = vpack.c.bf16 %v4787_v28, %v4786_v26  ;;  %v1653_v26 = vld [vmem:[#allocation2 + $0x10] sm:$0xff] }
 0x82e   :  { %v1376_v39 = vpop.xlane.xlu0 %1375 }
 0x82f   :  { %v1384_v8 = vsub.f32 %v1354_v14, %v1376_v39  ;;  %4952 = vpow2.f32 %v1396_v48  ;;  %v733_v14 = vsel %vm341_vm3, %v5527_v37, 0.0  ;;  %v1073_v37 = vsel %vm341_vm3, %v5613_v41, 0.0 }
 0x830   :  { %v4945_v10 = vpop.eup %4944  ;;  %v381_v41 = vsel %vm341_vm3, %v5406_v58, 0.0  ;;  %v390_v58 = vsel %vm341_vm3, %v5431_v31, 0.0 }
 0x831   :  { %v4947_v49 = vpop.eup %4946  ;;  %v1394_v46 = vmul.f32 1.442695, %v1384_v8  ;;  %v1401_v22 = vsel %vm341_vm3, %v4945_v10, 0.0 }
 0x832   :  { %1402 = vadd.xlane.f32.xlu0 %v1401_v22  ;;  %v4780_v23 = vpop.permute.xlu0 %4779  ;;  %4151 = vmatprep.mubr.msk.f32.mxu1 %vm341_vm3, %v4947_v49  ;;  %v1398_v25 = vsel %vm341_vm3, %v4947_v49, 0.0 }
 0x833   :  { %v4782_v30 = vunpack.i.h.bf16 %v4780_v23  ;;  %v4781_v44 = vunpack.i.l.bf16 %v4780_v23  ;;  %1399 = vadd.xlane.f32.xlu1 %v1398_v25  ;;  %4954 = vpow2.f32 %v1394_v46 }
 0x835   :  { %v4499_v12 = vpack.c.bf16 %v4782_v30, %v4781_v44  ;;  %v4949_v47 = vpop.eup %4948  ;;  %v1654_v44 = vld [vmem:[#allocation2 + $0x18] sm:$0xff] }
 0x836   :  { %734 = vadd.xlane.f32.xlu0 %v733_v14  ;;  %v4951_v42 = vpop.eup %4950  ;;  %v1407_v6 = vsel %vm341_vm3, %v4949_v47, 0.0  ;;  %v4511_v14 = vpack.c.bf16 %v1654_v44, %v1653_v26 }
 0x837   :  { %4500 = vmatprep.subr.bf16.mxu1 %v4499_v12  ;;  %731 = vadd.xlane.f32.xlu1 %v730_v43  ;;  %v1404_v19 = vsel %vm341_vm3, %v4951_v42, 0.0 }
 0x838   :  { %4502 = vmatpush3.bf16.msra.mxu1 %v4499_v12 }
 0x839   :  { %4504 = vmatprep.subr.bf16.mxu1 %v4503_v45  ;;  %v4953_v15 = vpop.eup %4952 }
 0x83a   :  { %1408 = vadd.xlane.f32.xlu0 %v1407_v6  ;;  %v1413_v40 = vsel %vm341_vm3, %v4953_v15, 0.0 }
 0x83b   :  { %1405 = vadd.xlane.f32.xlu1 %v1404_v19 }
 0x83c   :  { %4506 = vmatpush3.bf16.msra.mxu1 %v4503_v45 }
 0x83d   :  { %v4955_v7 = vpop.eup %4954 }
 0x83e   :  { %1074 = vadd.xlane.f32.xlu0 %v1073_v37  ;;  %v1410_v34 = vsel %vm341_vm3, %v4955_v7, 0.0 }
 0x83f   :  { %1071 = vadd.xlane.f32.xlu1 %v1070_v32  ;;  %4152 = vmatmul.mubr.msk.f32.vlgmr.msra.gmra.mrb[18].mxu1 %vm341_vm3, %v4945_v10 }
 0x840   :  { %4154 = vmatprep.mubr.msk.f32.mxu1 %vm341_vm3, %v4951_v42 }
 0x842   :  { %1414 = vadd.xlane.f32.xlu0 %v1413_v40 }
 0x843   :  { %1411 = vadd.xlane.f32.xlu1 %v1410_v34  ;;  %4155 = vmatmul.mubr.msk.f32.gmra.mrb[20].mxu1 %vm341_vm3, %v4949_v47 }
 0x844   :  { %4157 = vmatprep.mubr.msk.f32.mxu1 %vm341_vm3, %v4955_v7 }
 0x846   :  { %382 = vadd.xlane.f32.xlu0 %v381_v41 }
 0x847   :  { %379 = vadd.xlane.f32.xlu1 %v378_v62  ;;  %4158 = vmatmul.mubr.msk.f32.gmra.mrb[22].mxu1 %vm341_vm3, %v4953_v15 }
 0x84a   :  { %388 = vadd.xlane.f32.xlu0 %v387_v38 }
 0x84b   :  { %385 = vadd.xlane.f32.xlu1 %v384_v59 }
 0x84e   :  { %394 = vadd.xlane.f32.xlu0 %v393_v61 }
 0x84f   :  { %391 = vadd.xlane.f32.xlu1 %v390_v58 }
 0x85b   :  { %v720_v57 = vpop.xlane.xlu1 %719 }
 0x85c   :  { %4956 = vrcp.f32 %v720_v57 }
 0x85f   :  { %v1060_v36 = vpop.xlane.xlu1 %1059 }
 0x860   :  { %4958 = vrcp.f32 %v1060_v36 }
 0x863   :  { %v723_v13 = vpop.xlane.xlu0 %722  ;;  %v726_v60 = vpop.xlane.xlu1 %725 }
 0x864   :  { %4960 = vrcp.f32 %v723_v13 }
 0x865   :  { %4962 = vrcp.f32 %v726_v60 }
 0x866   :  { %v4957_v20 = vpop.eup %4956 }
 0x867   :  { %v1063_v24 = vpop.xlane.xlu0 %1062  ;;  %v1066_v18 = vpop.xlane.xlu1 %1065  ;;  %v868_v35 = vmul.f32 %v4957_v20, %v5541_v0 }
 0x868   :  { %4964 = vrcp.f32 %v1063_v24  ;;  %v3655_v24 = vld [vmem:[%s6303_s1 + $0x20] sm:$0xff] }
 0x869   :  { %1565 = vrot.lane.b32.xlu1 %v868_v35, %s5170_s29  ;;  %4966 = vrcp.f32 %v1066_v18 }
 0x86a   :  { %v4959_v33 = vpop.eup %4958 }
 0x86b   :  { %v729_v31 = vpop.xlane.xlu0 %728  ;;  %v1208_v39 = vmul.f32 %v4959_v33, %v5627_v17 }
 0x86c   :  { %4968 = vrcp.f32 %v729_v31  ;;  %v3658_v31 = vld [vmem:[%s6303_s1 + $0x38] sm:$0xff] }
 0x86d   :  { %1589 = vrot.lane.b32.xlu1 %v1208_v39, %s5183_s4 }
 0x86e   :  { %v4961_v8 = vpop.eup %4960 }
 0x86f   :  { %v1069_v10 = vpop.xlane.xlu0 %1068  ;;  %v870_v48 = vmul.f32 %v4961_v8, %v5539_v63  ;;  %v4963_v11 = vpop.eup %4962 }
 0x870   :  { %4970 = vrcp.f32 %v1069_v10  ;;  %v872_v46 = vmul.f32 %v4963_v11, %v5545_v3  ;;  %v1651_v3 = vld [vmem:[#allocation2] sm:$0xff] }
 0x871   :  { %1567 = vrot.lane.b32.xlu0 %v870_v48, %s5170_s29 }
 0x872   :  { %v4965_v0 = vpop.eup %4964 }
 0x873   :  { %v1210_v49 = vmul.f32 %v4965_v0, %v5625_v16  ;;  %v4967_v22 = vpop.eup %4966  ;;  %v1652_v16 = vld [vmem:[#allocation2 + $0x8] sm:$0xff] }
 0x874   :  { %v1212_v25 = vmul.f32 %v4967_v22, %v5631_v9  ;;  %v4507_v30 = vpack.c.bf16 %v1652_v16, %v1651_v3 }
 0x875   :  { %1591 = vrot.lane.b32.xlu1 %v1210_v49, %s5183_s4  ;;  %1569 = vrot.lane.b32.xlu0 %v872_v46, %s5170_s29 }
 0x876   :  { %v4969_v17 = vpop.eup %4968  ;;  %4508 = vmatprep.subr.bf16.mxu1 %v4507_v30 }
 0x877   :  { %v874_v23 = vmul.f32 %v4969_v17, %v5543_v2  ;;  %4510 = vmatpush3.bf16.msra.mxu1 %v4507_v30 }
 0x878   :  { %4512 = vmatprep.subr.bf16.mxu1 %v4511_v14 }
 0x879   :  { %1571 = vrot.lane.b32.xlu1 %v874_v23, %s5170_s29  ;;  %1593 = vrot.lane.b32.xlu0 %v1212_v25, %s5183_s4 }
 0x87a   :  { %v4971_v63 = vpop.eup %4970 }
 0x87b   :  { %v1214_v28 = vmul.f32 %v4971_v63, %v5629_v21  ;;  %4514 = vmatpush3.bf16.msra.mxu1 %v4511_v14 }
 0x87d   :  { %1595 = vrot.lane.b32.xlu1 %v1214_v28, %s5183_s4 }
 0x8bf   :  { %v1403_v2 = vpop.xlane.xlu0 %1402 }
 0x8c0   :  { %v1400_v9 = vpop.xlane.xlu1 %1399  ;;  %4972 = vrcp.f32 %v1403_v2 }
 0x8c1   :  { %4974 = vrcp.f32 %v1400_v9 }
 0x8c3   :  { %v735_v12 = vpop.xlane.xlu0 %734 }
 0x8c4   :  { %v732_v47 = vpop.xlane.xlu1 %731  ;;  %4976 = vrcp.f32 %v735_v12 }
 0x8c5   :  { %4978 = vrcp.f32 %v732_v47 }
 0x8c7   :  { %v1409_v43 = vpop.xlane.xlu0 %1408 }
 0x8c8   :  { %v1406_v21 = vpop.xlane.xlu1 %1405  ;;  %4980 = vrcp.f32 %v1409_v43 }
 0x8c9   :  { %4982 = vrcp.f32 %v1406_v21 }
 0x8ca   :  { %v4973_v6 = vpop.eup %4972 }
 0x8cb   :  { %v1075_v42 = vpop.xlane.xlu0 %1074  ;;  %v4975_v37 = vpop.eup %4974 }
 0x8cc   :  { %v1072_v45 = vpop.xlane.xlu1 %1071  ;;  %4984 = vrcp.f32 %v1075_v42 }
 0x8cd   :  { %4986 = vrcp.f32 %v1072_v45 }
 0x8ce   :  { %v4977_v7 = vpop.eup %4976 }
 0x8cf   :  { %v4979_v34 = vpop.eup %4978  ;;  %v1415_v41 = vpop.xlane.xlu0 %1414  ;;  %v878_v61 = vmul.f32 %v4977_v7, %v5547_v4  ;;  %v3656_v4 = vld [vmem:[%s6303_s1 + $0x28] sm:$0xff] }
 0x8d0   :  { %v1412_v62 = vpop.xlane.xlu1 %1411  ;;  %4988 = vrcp.f32 %v1415_v41  ;;  %v876_v58 = vmul.f32 %v4979_v34, %v5549_v5  ;;  %v3657_v5 = vld [vmem:[%s6303_s1 + $0x30] sm:$0xff]  ;;  %v4515_v33 = vpack.c.bf16 %v3656_v4, %v3655_v24 }
 0x8d1   :  { %4990 = vrcp.f32 %v1412_v62  ;;  %v4519_v8 = vpack.c.bf16 %v3658_v31, %v3657_v5 }
 0x8d2   :  { %v4981_v57 = vpop.eup %4980  ;;  %4516 = vmatprep.subr.bf16.mxu0 %v4515_v33 }
 0x8d3   :  { %v4983_v13 = vpop.eup %4982  ;;  %4518 = vmatpush3.bf16.msra.mxu0 %v4515_v33  ;;  %v383_v23 = vpop.xlane.xlu0 %382 }
 0x8d4   :  { %4520 = vmatprep.subr.bf16.mxu0 %v4519_v8  ;;  %v380_v22 = vpop.xlane.xlu1 %379 }
 0x8d5   :  { %4992 = vrcp.f32 %v380_v22 }
 0x8d6   :  { %v4985_v18 = vpop.eup %4984  ;;  %4994 = vrcp.f32 %v383_v23 }
 0x8d7   :  { %v4987_v39 = vpop.eup %4986  ;;  %v1218_v10 = vmul.f32 %v4985_v18, %v5633_v27  ;;  %4522 = vmatpush3.bf16.msra.mxu0 %v4519_v8 }
 0x8d8   :  { %v1216_v48 = vmul.f32 %v4987_v39, %v5635_v29  ;;  %v386_v17 = vpop.xlane.xlu1 %385  ;;  %v389_v29 = vpop.xlane.xlu0 %388 }
 0x8d9   :  { %4996 = vrcp.f32 %v386_v17 }
 0x8da   :  { %v4989_v11 = vpop.eup %4988  ;;  %4998 = vrcp.f32 %v389_v29 }
 0x8db   :  { %v4991_v0 = vpop.eup %4990 }
 0x8dc   :  { %v392_v27 = vpop.xlane.xlu1 %391  ;;  %v395_v28 = vpop.xlane.xlu0 %394 }
 0x8dd   :  { %5000 = vrcp.f32 %v392_v27 }
 0x8de   :  { %5002 = vrcp.f32 %v395_v28  ;;  %v1779_v28 = vsub.s32 1, %v5241_v1 }
 0x8df   :  { %v4993_v44 = vpop.eup %4992 }
 0x8e0   :  { %v1566_v25 = vpop.permute.xlu1 %1565  ;;  %v4995_v14 = vpop.eup %4994  ;;  %v528_v2 = vmul.f32 %v4993_v44, %v5447_v52 }
 0x8e1   :  { %v530_v47 = vmul.f32 %v4995_v14, %v5445_v50 }
 0x8e2   :  { %v1631_v43 = vsel %vm221_vm1, %v528_v2, %v1566_v25 }
 0x8e3   :  { %v1568_v16 = vpop.permute.xlu0 %1567 }
 0x8e4   :  { %v1590_v63 = vpop.permute.xlu1 %1589  ;;  %v1632_v42 = vsel %vm221_vm1, %v530_v47, %v1568_v16 }
 0x8e5   :  { %v1638_v45 = vsel %vm1637_vm4, %v1631_v43, %v1590_v63 }
 0x8e7   :  { %v1570_v30 = vpop.permute.xlu0 %1569 }
 0x8e8   :  { %v1592_v3 = vpop.permute.xlu1 %1591 }
 0x8eb   :  { %v1594_v12 = vpop.permute.xlu0 %1593 }
 0x8ec   :  { %v1572_v26 = vpop.permute.xlu1 %1571 }
 0x8f0   :  { %v1596_v9 = vpop.permute.xlu1 %1595 }
 0x912   :  { %v4153_v19 = vpop.f32.mrb[18].mxu1 }
 0x913   :  { %v1550_v15 = vmul.f32 %v4973_v6, %v4153_v19  ;;  %v1518_v32 = vpop.f32.mrb[19].mxu1  ;;  %v1639_v19 = vsel %vm1637_vm4, %v1632_v42, %v1592_v3 }
 0x914   :  { %v1548_v40 = vmul.f32 %v4975_v37, %v1518_v32  ;;  %v4997_v37 = vpop.eup %4996 }
 0x915   :  { %1615 = vrot.lane.b32.xlu1 %v1550_v15, %s5184_s24  ;;  %v4999_v50 = vpop.eup %4998 }
 0x916   :  { %1613 = vrot.lane.b32.xlu0 %v1548_v40, %s5184_s24  ;;  %v4156_v38 = vpop.f32.mrb[20].mxu1  ;;  %v532_v40 = vmul.f32 %v4997_v37, %v5451_v54  ;;  %v534_v34 = vmul.f32 %v4999_v50, %v5449_v53 }
 0x917   :  { %v1528_v59 = vpop.f32.mrb[21].mxu1  ;;  %v1554_v60 = vmul.f32 %v4981_v57, %v4156_v38 }
 0x918   :  { %v1552_v35 = vmul.f32 %v4983_v13, %v1528_v59  ;;  %v1633_v41 = vsel %vm221_vm1, %v532_v40, %v1570_v30  ;;  %v1634_v59 = vsel %vm221_vm1, %v534_v34, %v1572_v26 }
 0x919   :  { %1575 = vrot.lane.b32.xlu1 %v878_v61, %s5170_s29  ;;  %v1640_v38 = vsel %vm1637_vm4, %v1633_v41, %v1594_v12 }
 0x91a   :  { %1573 = vrot.lane.b32.xlu0 %v876_v58, %s5170_s29  ;;  %v4159_v36 = vpop.f32.mrb[22].mxu1  ;;  %v1641_v58 = vsel %vm1637_vm4, %v1634_v59, %v1596_v9 }
 0x91b   :  { %v1538_v20 = vpop.f32.mrb[23].mxu1  ;;  %v1558_v49 = vmul.f32 %v4989_v11, %v4159_v36  ;;  %v5001_v36 = vpop.eup %5000 }
 0x91c   :  { %v1556_v46 = vmul.f32 %v4991_v0, %v1538_v20  ;;  %v5003_v54 = vpop.eup %5002  ;;  %v536_v20 = vmul.f32 %v5001_v36, %v5455_v56  ;;  %v5112_v56 = vld [vmem:[%s6305_s3] sm:$0xff] }
 0x91d   :  { %1619 = vrot.lane.b32.xlu1 %v1554_v60, %s5184_s24  ;;  %v538_v24 = vmul.f32 %v5003_v54, %v5453_v55  ;;  %v1657_v55 = vsub.s32 2, %v5241_v1  ;;  %v1780_v3 = vrot.slane %v5112_v56, %v1779_v28 }
 0x91e   :  { %1617 = vrot.lane.b32.xlu0 %v1552_v35, %s5184_s24 }
 0x921   :  { %1599 = vrot.lane.b32.xlu1 %v1218_v10, %s5183_s4  ;;  %v1658_v10 = vrot.slane %v5112_v56, %v1657_v55 }
 0x922   :  { %1597 = vrot.lane.b32.xlu0 %v1216_v48, %s5183_s4 }
 0x925   :  { %1623 = vrot.lane.b32.xlu1 %v1558_v49, %s5184_s24 }
 0x926   :  { %1621 = vrot.lane.b32.xlu0 %v1556_v46, %s5184_s24 }
 0x987   :  { %v1616_v21 = vpop.permute.xlu1 %1615 }
 0x988   :  { %v1614_v6 = vpop.permute.xlu0 %1613  ;;  %v1646_v15 = vsel %vm1644_vm5, %v1639_v19, %v1616_v21 }
 0x989   :  { %v1645_v52 = vsel %vm1644_vm5, %v1638_v45, %v1614_v6 }
 0x98a   :  { %4168 = vmatprep.mubr.msk.f32.mxu1 %vm89_vm0, %v1645_v52 }
 0x98b   :  { %v1576_v32 = vpop.permute.xlu1 %1575  ;;  %4169 = vmatmul.mubr.msk.f32.vlgmr.msra.gmra.mrb[24].mxu1 %vm89_vm0, %v1646_v15 }
 0x98c   :  { %v1574_v7 = vpop.permute.xlu0 %1573  ;;  %v1636_v18 = vsel %vm221_vm1, %v538_v24, %v1576_v32 }
 0x98d   :  { %v1635_v4 = vsel %vm221_vm1, %v536_v20, %v1574_v7 }
 0x98f   :  { %v1620_v62 = vpop.permute.xlu1 %1619 }
 0x990   :  { %v1618_v61 = vpop.permute.xlu0 %1617  ;;  %v1648_v13 = vsel %vm1644_vm5, %v1641_v58, %v1620_v62 }
 0x991   :  { %v1647_v57 = vsel %vm1644_vm5, %v1640_v38, %v1618_v61 }
 0x992   :  { %4171 = vmatprep.mubr.msk.f32.mxu1 %vm89_vm0, %v1647_v57 }
 0x993   :  { %v1600_v60 = vpop.permute.xlu1 %1599  ;;  %4172 = vmatmul.mubr.msk.f32.gmra.mrb[26].mxu1 %vm89_vm0, %v1648_v13 }
 0x994   :  { %v1598_v53 = vpop.permute.xlu0 %1597  ;;  %v1643_v31 = vsel %vm1637_vm4, %v1636_v18, %v1600_v60 }
 0x995   :  { %v1642_v35 = vsel %vm1637_vm4, %v1635_v4, %v1598_v53 }
 0x997   :  { %v1624_v5 = vpop.permute.xlu1 %1623 }
 0x998   :  { %v1622_v33 = vpop.permute.xlu0 %1621  ;;  %v1650_v8 = vsel %vm1644_vm5, %v1643_v31, %v1624_v5 }
 0x999   :  { %v1649_v39 = vsel %vm1644_vm5, %v1642_v35, %v1622_v33  ;;  %v5844_v35 = vld [vmem:[#allocation4 + $0x8] sm:$0xff] }
 0x99a   :  { %4174 = vmatprep.mubr.msk.f32.mxu1 %vm89_vm0, %v1649_v39  ;;  %v5847_v39 = vld [vmem:[#allocation4] sm:$0xff] }
 0x99b   :  { %4175 = vmatmul.mubr.msk.f32.gmra.mrb[28].mxu1 %vm89_vm0, %v1650_v8 }
 0xa5e   :  { %v4170_v48 = vpop.f32.mrb[24].mxu1 }
 0xa5f   :  { %v1743_v11 = vpop.f32.mrb[25].mxu1  ;;  %v1749_v49 = vadd.f32 %v4170_v48, %v1658_v10 }
 0xa60   :  { %v1744_v0 = vadd.f32 %v1743_v11, %v1658_v10 }
 0xa62   :  { %4185 = vmatprep.mubr.msk.f32.mxu0 %vm89_vm0, %v1744_v0 }
 0xa63   :  { %4186 = vmatmul.mubr.msk.f32.vlgmr.msra.gmra.mrb[30].mxu0 %vm89_vm0, %v1749_v49  ;;  %v5856_v49 = vld [vmem:[#allocation4 + $0x18] sm:$0xff] }
 0xa66   :  { %v4173_v46 = vpop.f32.mrb[26].mxu1 }
 0xa67   :  { %v1753_v22 = vpop.f32.mrb[27].mxu1  ;;  %v1759_v27 = vadd.f32 %v4173_v46, %v1658_v10 }
 0xa68   :  { %v1754_v17 = vadd.f32 %v1753_v22, %v1658_v10  ;;  %v5859_v22 = vld [vmem:[#allocation4 + $0x10] sm:$0xff] }
 0xa6a   :  { %4188 = vmatprep.mubr.msk.f32.mxu0 %vm89_vm0, %v1754_v17 }
 0xa6b   :  { %4189 = vmatmul.mubr.msk.f32.gmra.mrb[32].mxu0 %vm89_vm0, %v1759_v27 }
 0xa6e   :  { %v4176_v23 = vpop.f32.mrb[28].mxu1 }
 0xa6f   :  { %v1763_v25 = vpop.f32.mrb[29].mxu1  ;;  %v1769_v63 = vadd.f32 %v4176_v23, %v1658_v10  ;;  %v5863_v23 = vld [vmem:[#allocation4 + $0x28] sm:$0xff] }
 0xa70   :  { %v1764_v29 = vadd.f32 %v1763_v25, %v1658_v10 }
 0xa72   :  { %4191 = vmatprep.mubr.msk.f32.mxu0 %vm89_vm0, %v1764_v29 }
 0xa73   :  { %4192 = vmatmul.mubr.msk.f32.gmra.mrb[34].mxu0 %vm89_vm0, %v1769_v63  ;;  %v5869_v63 = vld [vmem:[#allocation4 + $0x20] sm:$0xff] }
 0xb36   :  { %v4187_v16 = vpop.f32.mrb[30].mxu0 }
 0xb37   :  { %v5784_v26 = vadd.f32 %v4187_v16, %v1780_v3  ;;  %v1865_v30 = vpop.f32.mrb[31].mxu0 }
 0xb38   :  { %v5786_v44 = vadd.f32 %v1865_v30, %v1780_v3 }
 0xb3a   :  { %4206 = vmatprep.mubr.msk.f32.mxu1 %vm221_vm1, %v5786_v44  ;;  %v5792_v14 = vpack.i.bf16 %v5784_v26, %v5786_v44 }
 0xb3c   :  { %4789 = vrot.lane.b32.xlu0 %v5792_v14, %s5172_s0 }
 0xb3e   :  { %v4190_v2 = vpop.f32.mrb[32].mxu0 }
 0xb3f   :  { %v5796_v9 = vadd.f32 %v4190_v2, %v1780_v3  ;;  %v1875_v12 = vpop.f32.mrb[33].mxu0 }
 0xb40   :  { %v5798_v47 = vadd.f32 %v1875_v12, %v1780_v3 }
 0xb42   :  { %v5802_v43 = vpack.i.bf16 %v5796_v9, %v5798_v47 }
 0xb44   :  { %4794 = vrot.lane.b32.xlu1 %v5802_v43, %s5172_s0 }
 0xb46   :  { %v4193_v21 = vpop.f32.mrb[34].mxu0 }
 0xb47   :  { %v5806_v42 = vadd.f32 %v4193_v21, %v1780_v3  ;;  %v1885_v45 = vpop.f32.mrb[35].mxu0 }
 0xb48   :  { %v5808_v6 = vadd.f32 %v1885_v45, %v1780_v3  ;;  %4809 = vrot.lane.b32.xlu1 %v5802_v43, %s5173_s15 }
 0xb4a   :  { %v5814_v19 = vpack.i.bf16 %v5806_v42, %v5808_v6 }
 0xb4c   :  { %4799 = vrot.lane.b32.xlu0 %v5814_v19, %s5172_s0 }
 0xb50   :  { %4804 = vrot.lane.b32.xlu0 %v5792_v14, %s5173_s15 }
 0xb54   :  { %4814 = vrot.lane.b32.xlu0 %v5814_v19, %s5173_s15 }
 0xbae   :  { %v4790_v52 = vpop.permute.xlu0 %4789 }
 0xbaf   :  { %v4792_v37 = vunpack.i.h.bf16 %v4790_v52  ;;  %v4791_v15 = vunpack.i.l.bf16 %v4790_v52 }
 0xbb1   :  { %v4523_v50 = vpack.c.bf16 %v4792_v37, %v4791_v15 }
 0xbb3   :  { %4525 = vmatprep.subr.msk.bf16.mxu1 %vm5325_vm2, %v4523_v50 }
 0xbb4   :  { %4528 = vmatpush3.bf16.xpose.msk.msra.mxu1 %vm5325_vm2, %v4523_v50 }
 0xbb6   :  { %v4795_v32 = vpop.permute.xlu1 %4794 }
 0xbb7   :  { %v4797_v7 = vunpack.i.h.bf16 %v4795_v32  ;;  %v4796_v40 = vunpack.i.l.bf16 %v4795_v32 }
 0xbb9   :  { %v4529_v34 = vpack.c.bf16 %v4797_v7, %v4796_v40 }
 0xbba   :  { %v4810_v59 = vpop.permute.xlu1 %4809 }
 0xbbb   :  { %4531 = vmatprep.subr.msk.bf16.mxu1 %vm5325_vm2, %v4529_v34  ;;  %v4812_v57 = vunpack.i.h.bf16 %v4810_v59  ;;  %v4811_v36 = vunpack.i.l.bf16 %v4810_v59 }
 0xbbc   :  { %4534 = vmatpush3.bf16.xpose.msk.msra.mxu1 %vm5325_vm2, %v4529_v34 }
 0xbbd   :  { %v4545_v4 = vpack.c.bf16 %v4812_v57, %v4811_v36 }
 0xbbe   :  { %v4800_v41 = vpop.permute.xlu0 %4799 }
 0xbbf   :  { %v4802_v62 = vunpack.i.h.bf16 %v4800_v41  ;;  %v4801_v38 = vunpack.i.l.bf16 %v4800_v41 }
 0xbc1   :  { %v4535_v61 = vpack.c.bf16 %v4802_v62, %v4801_v38 }
 0xbc2   :  { %v4805_v58 = vpop.permute.xlu0 %4804 }
 0xbc3   :  { %v4807_v13 = vunpack.i.h.bf16 %v4805_v58  ;;  %v4806_v54 = vunpack.i.l.bf16 %v4805_v58  ;;  %4537 = vmatprep.subr.msk.bf16.mxu1 %vm5325_vm2, %v4535_v61 }
 0xbc4   :  { %4540 = vmatpush3.bf16.xpose.msk.msra.mxu1 %vm5325_vm2, %v4535_v61 }
 0xbc5   :  { %v4541_v60 = vpack.c.bf16 %v4807_v13, %v4806_v54 }
 0xbc6   :  { %v4815_v53 = vpop.permute.xlu0 %4814 }
 0xbc7   :  { %v4817_v20 = vunpack.i.h.bf16 %v4815_v53  ;;  %v4816_v24 = vunpack.i.l.bf16 %v4815_v53  ;;  %4542 = vmatprep.subr.bf16.mxu0 %v4541_v60 }
 0xbc8   :  { %4544 = vmatpush3.bf16.msra.mxu0 %v4541_v60 }
 0xbc9   :  { %4546 = vmatprep.subr.bf16.mxu0 %v4545_v4  ;;  %v4549_v5 = vpack.c.bf16 %v4817_v20, %v4816_v24 }
 0xbcb   :  { %4207 = vmatmul.mubr.msk.f32.vlgmr.msra.gmra.mrb[30].mxu1 %vm221_vm1, %v5784_v26 }
 0xbcc   :  { %4209 = vmatprep.mubr.msk.f32.mxu1 %vm221_vm1, %v5798_v47  ;;  %4548 = vmatpush3.bf16.msra.mxu0 %v4545_v4 }
 0xbcd   :  { %4550 = vmatprep.subr.bf16.mxu0 %v4549_v5 }
 0xbcf   :  { %4210 = vmatmul.mubr.msk.f32.gmra.mrb[32].mxu1 %vm221_vm1, %v5796_v9 }
 0xbd0   :  { %4212 = vmatprep.mubr.msk.f32.mxu1 %vm221_vm1, %v5808_v6  ;;  %4552 = vmatpush3.bf16.msra.mxu0 %v4549_v5 }
 0xbd3   :  { %4213 = vmatmul.mubr.msk.f32.gmra.mrb[34].mxu1 %vm221_vm1, %v5806_v42 }
 0xc9e   :  { %v4208_v18 = vpop.f32.mrb[30].mxu1 }
 0xc9f   :  { %v2008_v33 = vadd.f32 %v5844_v35, %v4208_v18  ;;  %v2002_v31 = vpop.f32.mrb[31].mxu1 }
 0xca0   :  { %v2003_v8 = vadd.f32 %v5847_v39, %v2002_v31 }
 0xca1   :  { %v2034_v55 = vsel %vm341_vm3, %v2008_v33, -inf }
 0xca2   :  { %2035 = vmax.xlane.f32.xlu0 %v2034_v55  ;;  %v4211_v56 = vpop.f32.mrb[32].mxu1  ;;  %v2031_v10 = vsel %vm341_vm3, %v2003_v8, -inf }
 0xca3   :  { %v2012_v48 = vpop.f32.mrb[33].mxu1  ;;  %2032 = vmax.xlane.f32.xlu1 %v2031_v10  ;;  %v2018_v46 = vadd.f32 %v5856_v49, %v4211_v56 }
 0xca4   :  { %v2013_v17 = vadd.f32 %v5859_v22, %v2012_v48 }
 0xca5   :  { %v2040_v27 = vsel %vm341_vm3, %v2018_v46, -inf }
 0xca6   :  { %v4214_v11 = vpop.f32.mrb[34].mxu1  ;;  %v2037_v29 = vsel %vm341_vm3, %v2013_v17, -inf }
 0xca7   :  { %v2022_v0 = vpop.f32.mrb[35].mxu1  ;;  %v5866_v25 = vadd.f32 %v5863_v23, %v4214_v11 }
 0xca8   :  { %v2023_v28 = vadd.f32 %v5869_v63, %v2022_v0 }
 0xca9   :  { %v2046_v3 = vsel %vm341_vm3, %v5866_v25, -inf }
 0xcaa   :  { %v2043_v16 = vsel %vm341_vm3, %v2023_v28, -inf }
 0xcb4   :  { %4819 = vrot.lane.b32.xlu1 %v5792_v14, %s5174_s16 }
 0xcb8   :  { %4824 = vrot.lane.b32.xlu0 %v5802_v43, %s5174_s16 }
 0xcd7   :  { %2041 = vmax.xlane.f32.xlu0 %v2040_v27 }
 0xcd8   :  { %2038 = vmax.xlane.f32.xlu1 %v2037_v29 }
 0xcdc   :  { %2047 = vmax.xlane.f32.xlu1 %v2046_v3 }
 0xce0   :  { %2044 = vmax.xlane.f32.xlu1 %v2043_v16 }
 0xced   :  { %4829 = vrot.lane.b32.xlu0 %v5814_v19, %s5174_s16 }
 0xcf1   :  { %2230 = vrot.lane.b32.xlu0 %v5784_v26, %s5175_s2  ;;  %2228 = vrot.lane.b32.xlu1 %v5786_v44, %s5175_s2 }
 0xcf5   :  { %2234 = vrot.lane.b32.xlu0 %v5796_v9, %s5175_s2  ;;  %2232 = vrot.lane.b32.xlu1 %v5798_v47, %s5175_s2 }
 0xcf9   :  { %2238 = vrot.lane.b32.xlu0 %v5806_v42, %s5175_s2  ;;  %2236 = vrot.lane.b32.xlu1 %v5808_v6, %s5175_s2 }
 0xcfd   :  { %4834 = vrot.lane.b32.xlu0 %v5792_v14, %s5176_s17  ;;  %4839 = vrot.lane.b32.xlu1 %v5802_v43, %s5176_s17 }
 0xd01   :  { %4844 = vrot.lane.b32.xlu0 %v5814_v19, %s5176_s17 }
 0xd2f   :  { %v2036_v30 = vpop.xlane.xlu0 %2035 }
 0xd30   :  { %v2050_v2 = vsub.f32 %v2008_v33, %v2036_v30  ;;  %v2033_v12 = vpop.xlane.xlu1 %2032 }
 0xd31   :  { %v2049_v21 = vsub.f32 %v2003_v8, %v2033_v12 }
 0xd32   :  { %v2057_v45 = vmul.f32 1.442695, %v2050_v2 }
 0xd33   :  { %v2055_v52 = vmul.f32 1.442695, %v2049_v21  ;;  %v4825_v7 = vpop.permute.xlu0 %4824 }
 0xd34   :  { %v4820_v37 = vpop.permute.xlu1 %4819  ;;  %v4827_v40 = vunpack.i.h.bf16 %v4825_v7  ;;  %v4826_v34 = vunpack.i.l.bf16 %v4825_v7 }
 0xd35   :  { %5004 = vpow2.f32 %v2055_v52  ;;  %v4822_v15 = vunpack.i.h.bf16 %v4820_v37  ;;  %v4821_v50 = vunpack.i.l.bf16 %v4820_v37 }
 0xd36   :  { %5006 = vpow2.f32 %v2057_v45  ;;  %v4559_v38 = vpack.c.bf16 %v4827_v40, %v4826_v34 }
 0xd37   :  { %v4553_v32 = vpack.c.bf16 %v4822_v15, %v4821_v50 }
 0xd39   :  { %4555 = vmatprep.subr.msk.bf16.mxu0 %vm5325_vm2, %v4553_v32 }
 0xd3f   :  { %v5897_v41 = vpop.eup %5004 }
 0xd40   :  { %v5899_v62 = vpop.eup %5006  ;;  %4227 = vmatprep.mubr.msk.f32.mxu0 %vm341_vm3, %v5897_v41 }
 0xd41   :  { %4228 = vmatmul.mubr.msk.f32.vlgmr.msra.gmra.mrb[36].mxu0 %vm341_vm3, %v5899_v62 }
 0xd42   :  { %4558 = vmatpush3.bf16.xpose.msk.msra.mxu0 %vm5325_vm2, %v4553_v32 }
 0xd43   :  { %4561 = vmatprep.subr.msk.bf16.mxu0 %vm5325_vm2, %v4559_v38 }
 0xd4a   :  { %4564 = vmatpush3.bf16.xpose.msk.msra.mxu0 %vm5325_vm2, %v4559_v38 }
 0xd64   :  { %v2042_v59 = vpop.xlane.xlu0 %2041 }
 0xd65   :  { %v2052_v61 = vsub.f32 %v2018_v46, %v2042_v59  ;;  %v2039_v58 = vpop.xlane.xlu1 %2038 }
 0xd66   :  { %v2051_v57 = vsub.f32 %v2013_v17, %v2039_v58 }
 0xd67   :  { %v2061_v36 = vmul.f32 1.442695, %v2052_v61 }
 0xd68   :  { %v2059_v13 = vmul.f32 1.442695, %v2051_v57  ;;  %v4830_v54 = vpop.permute.xlu0 %4829 }
 0xd69   :  { %v4832_v60 = vunpack.i.h.bf16 %v4830_v54  ;;  %v4831_v53 = vunpack.i.l.bf16 %v4830_v54  ;;  %v2048_v20 = vpop.xlane.xlu1 %2047 }
 0xd6a   :  { %5008 = vpow2.f32 %v2059_v13  ;;  %v2054_v4 = vsub.f32 %v5866_v25, %v2048_v20 }
 0xd6b   :  { %5010 = vpow2.f32 %v2061_v36  ;;  %v4565_v24 = vpack.c.bf16 %v4832_v60, %v4831_v53 }
 0xd6c   :  { %v2231_v5 = vpop.permute.xlu0 %2230  ;;  %v2065_v31 = vmul.f32 1.442695, %v2054_v4 }
 0xd6d   :  { %v2045_v18 = vpop.xlane.xlu1 %2044  ;;  %4567 = vmatprep.subr.msk.bf16.mxu0 %vm5325_vm2, %v4565_v24 }
 0xd6e   :  { %v2053_v33 = vsub.f32 %v2023_v28, %v2045_v18  ;;  %4570 = vmatpush3.bf16.xpose.msk.msra.mxu0 %vm5325_vm2, %v4565_v24 }
 0xd70   :  { %v2063_v8 = vmul.f32 1.442695, %v2053_v33  ;;  %v2235_v55 = vpop.permute.xlu0 %2234 }
 0xd71   :  { %v2229_v56 = vpop.permute.xlu1 %2228 }
 0xd72   :  { %5012 = vpow2.f32 %v2063_v8 }
 0xd73   :  { %5014 = vpow2.f32 %v2065_v31 }
 0xd74   :  { %v5916_v10 = vpop.eup %5008  ;;  %v2239_v48 = vpop.permute.xlu0 %2238 }
 0xd75   :  { %v5918_v11 = vpop.eup %5010  ;;  %4230 = vmatprep.mubr.msk.f32.mxu0 %vm341_vm3, %v5916_v10  ;;  %v2233_v0 = vpop.permute.xlu1 %2232 }
 0xd76   :  { %4231 = vmatmul.mubr.msk.f32.gmra.mrb[38].mxu0 %vm341_vm3, %v5918_v11 }
 0xd78   :  { %v4835_v46 = vpop.permute.xlu0 %4834 }
 0xd79   :  { %v4837_v17 = vunpack.i.h.bf16 %v4835_v46  ;;  %v4836_v27 = vunpack.i.l.bf16 %v4835_v46  ;;  %v2237_v25 = vpop.permute.xlu1 %2236 }
 0xd7b   :  { %v4571_v29 = vpack.c.bf16 %v4837_v17, %v4836_v27 }
 0xd7c   :  { %v5924_v28 = vpop.eup %5012  ;;  %v4845_v3 = vpop.permute.xlu0 %4844 }
 0xd7d   :  { %v5926_v16 = vpop.eup %5014  ;;  %4233 = vmatprep.mubr.msk.f32.mxu0 %vm341_vm3, %v5924_v28  ;;  %4572 = vmatprep.subr.bf16.mxu1 %v4571_v29  ;;  %v4840_v30 = vpop.permute.xlu1 %4839  ;;  %v4847_v2 = vunpack.i.h.bf16 %v4845_v3  ;;  %v4846_v12 = vunpack.i.l.bf16 %v4845_v3 }
 0xd7e   :  { %v4842_v21 = vunpack.i.h.bf16 %v4840_v30  ;;  %v4841_v45 = vunpack.i.l.bf16 %v4840_v30  ;;  %4234 = vmatmul.mubr.msk.f32.gmra.mrb[40].mxu0 %vm341_vm3, %v5926_v16  ;;  %4574 = vmatpush3.bf16.msra.mxu1 %v4571_v29 }
 0xd7f   :  { %4248 = vmatprep.mubr.msk.f32.mxu0 %vm221_vm1, %v2229_v56  ;;  %v4579_v37 = vpack.c.bf16 %v4847_v2, %v4846_v12 }
 0xd80   :  { %v4575_v52 = vpack.c.bf16 %v4842_v21, %v4841_v45 }
 0xd82   :  { %4249 = vmatmul.mubr.msk.f32.vlgmr.msra.gmra.mrb[42].mxu0 %vm221_vm1, %v2231_v5  ;;  %4576 = vmatprep.subr.bf16.mxu1 %v4575_v52 }
 0xd83   :  { %4251 = vmatprep.mubr.msk.f32.mxu0 %vm221_vm1, %v2233_v0  ;;  %4578 = vmatpush3.bf16.msra.mxu1 %v4575_v52 }
 0xd84   :  { %4580 = vmatprep.subr.bf16.mxu1 %v4579_v37 }
 0xd86   :  { %4252 = vmatmul.mubr.msk.f32.gmra.mrb[44].mxu0 %vm221_vm1, %v2235_v55 }
 0xd87   :  { %4254 = vmatprep.mubr.msk.f32.mxu0 %vm221_vm1, %v2237_v25  ;;  %4582 = vmatpush3.bf16.msra.mxu1 %v4579_v37 }
 0xd8a   :  { %4255 = vmatmul.mubr.msk.f32.gmra.mrb[46].mxu0 %vm221_vm1, %v2239_v48 }
 0xe14   :  { %v5938_v15 = vpop.f32.mrb[36].mxu0 }
 0xe15   :  { %v5940_v50 = vpop.f32.mrb[37].mxu0 }
 0xe49   :  { %v5942_v32 = vpop.f32.mrb[38].mxu0 }
 0xe4a   :  { %v5944_v7 = vpop.f32.mrb[39].mxu0 }
 0xe51   :  { %v5946_v40 = vpop.f32.mrb[40].mxu0 }
 0xe52   :  { %v5948_v34 = vpop.f32.mrb[41].mxu0 }
 0xe55   :  { %v4250_v38 = vpop.f32.mrb[42].mxu0 }
 0xe56   :  { %v2348_v59 = vadd.f32 %v5844_v35, %v4250_v38  ;;  %v2342_v61 = vpop.f32.mrb[43].mxu0 }
 0xe57   :  { %v2343_v58 = vadd.f32 %v5847_v39, %v2342_v61 }
 0xe58   :  { %v2374_v57 = vsel %vm341_vm3, %v2348_v59, -inf }
 0xe59   :  { %2375 = vmax.xlane.f32.xlu0 %v2374_v57  ;;  %v4253_v36 = vpop.f32.mrb[44].mxu0  ;;  %v2371_v13 = vsel %vm341_vm3, %v2343_v58, -inf }
 0xe5a   :  { %v2352_v54 = vpop.f32.mrb[45].mxu0  ;;  %2372 = vmax.xlane.f32.xlu1 %v2371_v13  ;;  %v2358_v20 = vadd.f32 %v5856_v49, %v4253_v36 }
 0xe5b   :  { %v2353_v24 = vadd.f32 %v5859_v22, %v2352_v54 }
 0xe5c   :  { %v2380_v4 = vsel %vm341_vm3, %v2358_v20, -inf }
 0xe5d   :  { %v4256_v60 = vpop.f32.mrb[46].mxu0  ;;  %v2377_v18 = vsel %vm341_vm3, %v2353_v24, -inf }
 0xe5e   :  { %v2362_v53 = vpop.f32.mrb[47].mxu0  ;;  %v2368_v5 = vadd.f32 %v5863_v23, %v4256_v60 }
 0xe5f   :  { %v2363_v33 = vadd.f32 %v5869_v63, %v2362_v53 }
 0xe60   :  { %v2386_v31 = vsel %vm341_vm3, %v2368_v5, -inf }
 0xe61   :  { %v2383_v8 = vsel %vm341_vm3, %v2363_v33, -inf }
 0xe6b   :  { %4849 = vrot.lane.b32.xlu1 %v5792_v14, %s5177_s18 }
 0xe6f   :  { %4854 = vrot.lane.b32.xlu0 %v5802_v43, %s5177_s18 }
 0xe8e   :  { %2381 = vmax.xlane.f32.xlu0 %v2380_v4 }
 0xe8f   :  { %2378 = vmax.xlane.f32.xlu1 %v2377_v18 }
 0xe93   :  { %2387 = vmax.xlane.f32.xlu1 %v2386_v31 }
 0xe97   :  { %2384 = vmax.xlane.f32.xlu1 %v2383_v8 }
 0xea4   :  { %4859 = vrot.lane.b32.xlu0 %v5814_v19, %s5177_s18 }
 0xea8   :  { %2570 = vrot.lane.b32.xlu0 %v5784_v26, %s5178_s19  ;;  %2568 = vrot.lane.b32.xlu1 %v5786_v44, %s5178_s19 }
 0xeac   :  { %2574 = vrot.lane.b32.xlu0 %v5796_v9, %s5178_s19  ;;  %2572 = vrot.lane.b32.xlu1 %v5798_v47, %s5178_s19 }
 0xeb0   :  { %2578 = vrot.lane.b32.xlu0 %v5806_v42, %s5178_s19  ;;  %2576 = vrot.lane.b32.xlu1 %v5808_v6, %s5178_s19 }
 0xeb4   :  { %4864 = vrot.lane.b32.xlu0 %v5792_v14, %s5179_s20  ;;  %4869 = vrot.lane.b32.xlu1 %v5802_v43, %s5179_s20 }
 0xeb8   :  { %4874 = vrot.lane.b32.xlu0 %v5814_v19, %s5179_s20 }
 0xee6   :  { %v2376_v55 = vpop.xlane.xlu0 %2375 }
 0xee7   :  { %v2390_v56 = vsub.f32 %v2348_v59, %v2376_v55  ;;  %v2373_v48 = vpop.xlane.xlu1 %2372 }
 0xee8   :  { %v2389_v0 = vsub.f32 %v2343_v58, %v2373_v48 }
 0xee9   :  { %v2397_v46 = vmul.f32 1.442695, %v2390_v56 }
 0xeea   :  { %v2395_v17 = vmul.f32 1.442695, %v2389_v0  ;;  %v4855_v30 = vpop.permute.xlu0 %4854 }
 0xeeb   :  { %v4850_v27 = vpop.permute.xlu1 %4849  ;;  %v4857_v2 = vunpack.i.h.bf16 %v4855_v30  ;;  %v4856_v12 = vunpack.i.l.bf16 %v4855_v30 }
 0xeec   :  { %5016 = vpow2.f32 %v2395_v17  ;;  %v4852_v25 = vunpack.i.h.bf16 %v4850_v27  ;;  %v4851_v29 = vunpack.i.l.bf16 %v4850_v27 }
 0xeed   :  { %5018 = vpow2.f32 %v2397_v46  ;;  %v4589_v52 = vpack.c.bf16 %v4857_v2, %v4856_v12 }
 0xeee   :  { %v4583_v3 = vpack.c.bf16 %v4852_v25, %v4851_v29 }
 0xef0   :  { %4585 = vmatprep.subr.msk.bf16.mxu1 %vm5325_vm2, %v4583_v3 }
 0xef6   :  { %v5988_v21 = vpop.eup %5016 }
 0xef7   :  { %v5990_v45 = vpop.eup %5018  ;;  %4269 = vmatprep.mubr.msk.f32.mxu1 %vm341_vm3, %v5988_v21 }
 0xef8   :  { %4270 = vmatmul.mubr.msk.f32.vlgmr.msra.gmra.mrb[36].mxu1 %vm341_vm3, %v5990_v45 }
 0xef9   :  { %4588 = vmatpush3.bf16.xpose.msk.msra.mxu1 %vm5325_vm2, %v4583_v3 }
 0xefa   :  { %4591 = vmatprep.subr.msk.bf16.mxu1 %vm5325_vm2, %v4589_v52 }
 0xf01   :  { %4594 = vmatpush3.bf16.xpose.msk.msra.mxu1 %vm5325_vm2, %v4589_v52 }
 0xf1b   :  { %v2382_v37 = vpop.xlane.xlu0 %2381 }
 0xf1c   :  { %v2392_v38 = vsub.f32 %v2358_v20, %v2382_v37  ;;  %v2379_v59 = vpop.xlane.xlu1 %2378 }
 0xf1d   :  { %v2391_v61 = vsub.f32 %v2353_v24, %v2379_v59 }
 0xf1e   :  { %v2401_v58 = vmul.f32 1.442695, %v2392_v38 }
 0xf1f   :  { %v2399_v57 = vmul.f32 1.442695, %v2391_v61  ;;  %v4860_v36 = vpop.permute.xlu0 %4859 }
 0xf20   :  { %v4862_v13 = vunpack.i.h.bf16 %v4860_v36  ;;  %v4861_v54 = vunpack.i.l.bf16 %v4860_v36  ;;  %v2388_v60 = vpop.xlane.xlu1 %2387 }
 0xf21   :  { %5020 = vpow2.f32 %v2399_v57  ;;  %v2394_v4 = vsub.f32 %v2368_v5, %v2388_v60 }
 0xf22   :  { %5022 = vpow2.f32 %v2401_v58  ;;  %v4595_v53 = vpack.c.bf16 %v4862_v13, %v4861_v54 }
 0xf23   :  { %v2571_v18 = vpop.permute.xlu0 %2570  ;;  %v2405_v20 = vmul.f32 1.442695, %v2394_v4 }
 0xf24   :  { %v2385_v31 = vpop.xlane.xlu1 %2384  ;;  %4597 = vmatprep.subr.msk.bf16.mxu1 %vm5325_vm2, %v4595_v53 }
 0xf25   :  { %v2393_v8 = vsub.f32 %v2363_v33, %v2385_v31  ;;  %4600 = vmatpush3.bf16.xpose.msk.msra.mxu1 %vm5325_vm2, %v4595_v53 }
 0xf27   :  { %v2403_v24 = vmul.f32 1.442695, %v2393_v8  ;;  %v2575_v55 = vpop.permute.xlu0 %2574 }
 0xf28   :  { %v2569_v56 = vpop.permute.xlu1 %2568 }
 0xf29   :  { %5024 = vpow2.f32 %v2403_v24 }
 0xf2a   :  { %5026 = vpow2.f32 %v2405_v20 }
 0xf2b   :  { %v6006_v48 = vpop.eup %5020  ;;  %v2579_v0 = vpop.permute.xlu0 %2578 }
 0xf2c   :  { %v6008_v46 = vpop.eup %5022  ;;  %4272 = vmatprep.mubr.msk.f32.mxu1 %vm341_vm3, %v6006_v48  ;;  %v2573_v5 = vpop.permute.xlu1 %2572 }
 0xf2d   :  { %4273 = vmatmul.mubr.msk.f32.gmra.mrb[38].mxu1 %vm341_vm3, %v6008_v46 }
 0xf2f   :  { %v4865_v33 = vpop.permute.xlu0 %4864 }
 0xf30   :  { %v4867_v17 = vunpack.i.h.bf16 %v4865_v33  ;;  %v4866_v27 = vunpack.i.l.bf16 %v4865_v33  ;;  %v2577_v25 = vpop.permute.xlu1 %2576 }
 0xf32   :  { %v4601_v29 = vpack.c.bf16 %v4867_v17, %v4866_v27 }
 0xf33   :  { %v6014_v3 = vpop.eup %5024  ;;  %v4875_v30 = vpop.permute.xlu0 %4874 }
 0xf34   :  { %v6016_v2 = vpop.eup %5026  ;;  %4275 = vmatprep.mubr.msk.f32.mxu1 %vm341_vm3, %v6014_v3  ;;  %4602 = vmatprep.subr.bf16.mxu0 %v4601_v29  ;;  %v4870_v12 = vpop.permute.xlu1 %4869  ;;  %v4877_v52 = vunpack.i.h.bf16 %v4875_v30  ;;  %v4876_v37 = vunpack.i.l.bf16 %v4875_v30 }
 0xf35   :  { %v4872_v38 = vunpack.i.h.bf16 %v4870_v12  ;;  %v4871_v59 = vunpack.i.l.bf16 %v4870_v12  ;;  %4276 = vmatmul.mubr.msk.f32.gmra.mrb[40].mxu1 %vm341_vm3, %v6016_v2  ;;  %4604 = vmatpush3.bf16.msra.mxu0 %v4601_v29 }
 0xf36   :  { %4290 = vmatprep.mubr.msk.f32.mxu1 %vm221_vm1, %v2569_v56  ;;  %v4609_v58 = vpack.c.bf16 %v4877_v52, %v4876_v37 }
 0xf37   :  { %v4605_v61 = vpack.c.bf16 %v4872_v38, %v4871_v59 }
 0xf39   :  { %4291 = vmatmul.mubr.msk.f32.vlgmr.msra.gmra.mrb[42].mxu1 %vm221_vm1, %v2571_v18  ;;  %4606 = vmatprep.subr.bf16.mxu0 %v4605_v61 }
 0xf3a   :  { %4293 = vmatprep.mubr.msk.f32.mxu1 %vm221_vm1, %v2573_v5  ;;  %4608 = vmatpush3.bf16.msra.mxu0 %v4605_v61 }
 0xf3b   :  { %4610 = vmatprep.subr.bf16.mxu0 %v4609_v58 }
 0xf3d   :  { %4294 = vmatmul.mubr.msk.f32.gmra.mrb[44].mxu1 %vm221_vm1, %v2575_v55 }
 0xf3e   :  { %4296 = vmatprep.mubr.msk.f32.mxu1 %vm221_vm1, %v2577_v25  ;;  %4612 = vmatpush3.bf16.msra.mxu0 %v4609_v58 }
 0xf41   :  { %4297 = vmatmul.mubr.msk.f32.gmra.mrb[46].mxu1 %vm221_vm1, %v2579_v0 }
 0xfcb   :  { %v6028_v57 = vpop.f32.mrb[36].mxu1 }
 0xfcc   :  { %v6030_v36 = vpop.f32.mrb[37].mxu1 }
0x1000   :  { %v6032_v13 = vpop.f32.mrb[38].mxu1 }
0x1001   :  { %v6034_v54 = vpop.f32.mrb[39].mxu1 }
0x1008   :  { %v6036_v60 = vpop.f32.mrb[40].mxu1 }
0x1009   :  { %v6038_v53 = vpop.f32.mrb[41].mxu1 }
0x100c   :  { %v4292_v4 = vpop.f32.mrb[42].mxu1 }
0x100d   :  { %v2688_v18 = vadd.f32 %v5844_v35, %v4292_v4  ;;  %v2682_v31 = vpop.f32.mrb[43].mxu1 }
0x100e   :  { %v2683_v8 = vadd.f32 %v5847_v39, %v2682_v31 }
0x100f   :  { %v2714_v20 = vsel %vm341_vm3, %v2688_v18, -inf }
0x1010   :  { %2715 = vmax.xlane.f32.xlu0 %v2714_v20  ;;  %v4295_v24 = vpop.f32.mrb[44].mxu1  ;;  %v2711_v55 = vsel %vm341_vm3, %v2683_v8, -inf }
0x1011   :  { %v2692_v56 = vpop.f32.mrb[45].mxu1  ;;  %2712 = vmax.xlane.f32.xlu1 %v2711_v55  ;;  %v2698_v33 = vadd.f32 %v5856_v49, %v4295_v24 }
0x1012   :  { %v2693_v17 = vadd.f32 %v5859_v22, %v2692_v56 }
0x1013   :  { %v2720_v27 = vsel %vm341_vm3, %v2698_v33, -inf }
0x1014   :  { %v4298_v0 = vpop.f32.mrb[46].mxu1  ;;  %v2717_v29 = vsel %vm341_vm3, %v2693_v17, -inf }
0x1015   :  { %v2702_v5 = vpop.f32.mrb[47].mxu1  ;;  %v2708_v25 = vadd.f32 %v5863_v23, %v4298_v0 }
0x1016   :  { %v2703_v30 = vadd.f32 %v5869_v63, %v2702_v5 }
0x1017   :  { %v2726_v12 = vsel %vm341_vm3, %v2708_v25, -inf }
0x1018   :  { %v2723_v52 = vsel %vm341_vm3, %v2703_v30, -inf }
0x1022   :  { %4879 = vrot.lane.b32.xlu1 %v5792_v14, %s5180_s21 }
0x1026   :  { %4884 = vrot.lane.b32.xlu0 %v5802_v43, %s5180_s21 }
0x1045   :  { %2721 = vmax.xlane.f32.xlu0 %v2720_v27 }
0x1046   :  { %2718 = vmax.xlane.f32.xlu1 %v2717_v29 }
0x104a   :  { %2727 = vmax.xlane.f32.xlu1 %v2726_v12 }
0x104e   :  { %2724 = vmax.xlane.f32.xlu1 %v2723_v52 }
0x105b   :  { %4889 = vrot.lane.b32.xlu0 %v5814_v19, %s5180_s21 }
0x105f   :  { %2910 = vrot.lane.b32.xlu0 %v5784_v26, %s5181_s22  ;;  %2908 = vrot.lane.b32.xlu1 %v5786_v44, %s5181_s22 }
0x1063   :  { %2914 = vrot.lane.b32.xlu0 %v5796_v9, %s5181_s22  ;;  %2912 = vrot.lane.b32.xlu1 %v5798_v47, %s5181_s22 }
0x1067   :  { %2918 = vrot.lane.b32.xlu0 %v5806_v42, %s5181_s22  ;;  %2916 = vrot.lane.b32.xlu1 %v5808_v6, %s5181_s22 }
0x109d   :  { %v2716_v37 = vpop.xlane.xlu0 %2715 }
0x109e   :  { %v2730_v38 = vsub.f32 %v2688_v18, %v2716_v37  ;;  %v2713_v59 = vpop.xlane.xlu1 %2712 }
0x109f   :  { %v2729_v61 = vsub.f32 %v2683_v8, %v2713_v59 }
0x10a0   :  { %v2737_v26 = vmul.f32 1.442695, %v2730_v38 }
0x10a1   :  { %v2735_v58 = vmul.f32 1.442695, %v2729_v61  ;;  %v4885_v47 = vpop.permute.xlu0 %4884 }
0x10a2   :  { %v4880_v4 = vpop.permute.xlu1 %4879  ;;  %v4887_v42 = vunpack.i.h.bf16 %v4885_v47  ;;  %v4886_v20 = vunpack.i.l.bf16 %v4885_v47 }
0x10a3   :  { %5028 = vpow2.f32 %v2735_v58  ;;  %v4882_v44 = vunpack.i.h.bf16 %v4880_v4  ;;  %v4881_v31 = vunpack.i.l.bf16 %v4880_v4 }
0x10a4   :  { %5030 = vpow2.f32 %v2737_v26  ;;  %v4619_v18 = vpack.c.bf16 %v4887_v42, %v4886_v20 }
0x10a5   :  { %v4613_v9 = vpack.c.bf16 %v4882_v44, %v4881_v31 }
0x10a7   :  { %4615 = vmatprep.subr.msk.bf16.mxu0 %vm5325_vm2, %v4613_v9 }
0x10ad   :  { %v6072_v24 = vpop.eup %5028 }
0x10ae   :  { %v6074_v6 = vpop.eup %5030  ;;  %4311 = vmatprep.mubr.msk.f32.mxu0 %vm341_vm3, %v6072_v24 }
0x10af   :  { %4312 = vmatmul.mubr.msk.f32.vlgmr.msra.gmra.mrb[48].mxu0 %vm341_vm3, %v6074_v6 }
0x10b0   :  { %4618 = vmatpush3.bf16.xpose.msk.msra.mxu0 %vm5325_vm2, %v4613_v9 }
0x10b1   :  { %4621 = vmatprep.subr.msk.bf16.mxu0 %vm5325_vm2, %v4619_v18 }
0x10b8   :  { %4624 = vmatpush3.bf16.xpose.msk.msra.mxu0 %vm5325_vm2, %v4619_v18 }
0x10d2   :  { %v2722_v8 = vpop.xlane.xlu0 %2721 }
0x10d3   :  { %v2732_v55 = vsub.f32 %v2698_v33, %v2722_v8  ;;  %v2719_v56 = vpop.xlane.xlu1 %2718 }
0x10d4   :  { %v2731_v0 = vsub.f32 %v2693_v17, %v2719_v56 }
0x10d5   :  { %v2741_v5 = vmul.f32 1.442695, %v2732_v55 }
0x10d6   :  { %v2739_v27 = vmul.f32 1.442695, %v2731_v0  ;;  %v4890_v29 = vpop.permute.xlu0 %4889 }
0x10d7   :  { %v4892_v12 = vunpack.i.h.bf16 %v4890_v29  ;;  %v4891_v52 = vunpack.i.l.bf16 %v4890_v29  ;;  %v2728_v37 = vpop.xlane.xlu1 %2727 }
0x10d8   :  { %5032 = vpow2.f32 %v2739_v27  ;;  %v2734_v59 = vsub.f32 %v2708_v25, %v2728_v37 }
0x10d9   :  { %5034 = vpow2.f32 %v2741_v5  ;;  %v4625_v38 = vpack.c.bf16 %v4892_v12, %v4891_v52 }
0x10da   :  { %v2745_v33 = vmul.f32 1.442695, %v2734_v59  ;;  %v2911_v51 = vpop.permute.xlu0 %2910 }
0x10db   :  { %v2725_v61 = vpop.xlane.xlu1 %2724  ;;  %4627 = vmatprep.subr.msk.bf16.mxu0 %vm5325_vm2, %v4625_v38 }
0x10dc   :  { %v2733_v26 = vsub.f32 %v2703_v30, %v2725_v61  ;;  %4630 = vmatpush3.bf16.xpose.msk.msra.mxu0 %vm5325_vm2, %v4625_v38 }
0x10de   :  { %v2743_v17 = vmul.f32 1.442695, %v2733_v26  ;;  %v2915_v9 = vpop.permute.xlu0 %2914 }
0x10df   :  { %v2909_v25 = vpop.permute.xlu1 %2908 }
0x10e0   :  { %5036 = vpow2.f32 %v2743_v17 }
0x10e1   :  { %5038 = vpow2.f32 %v2745_v33 }
0x10e2   :  { %v6090_v58 = vpop.eup %5032  ;;  %v2919_v42 = vpop.permute.xlu0 %2918 }
0x10e3   :  { %v6092_v4 = vpop.eup %5034  ;;  %4314 = vmatprep.mubr.msk.f32.mxu0 %vm341_vm3, %v6090_v58  ;;  %v2913_v31 = vpop.permute.xlu1 %2912 }
0x10e4   :  { %4315 = vmatmul.mubr.msk.f32.gmra.mrb[50].mxu0 %vm341_vm3, %v6092_v4 }
0x10e7   :  { %v2917_v47 = vpop.permute.xlu1 %2916 }
0x10ea   :  { %v6098_v44 = vpop.eup %5036 }
0x10eb   :  { %v6100_v30 = vpop.eup %5038  ;;  %4317 = vmatprep.mubr.msk.f32.mxu0 %vm341_vm3, %v6098_v44 }
0x10ec   :  { %4318 = vmatmul.mubr.msk.f32.gmra.mrb[52].mxu0 %vm341_vm3, %v6100_v30 }
0x10ed   :  { %4332 = vmatprep.mubr.msk.f32.mxu0 %vm221_vm1, %v2909_v25 }
0x10f0   :  { %4333 = vmatmul.mubr.msk.f32.vlgmr.msra.gmra.mrb[54].mxu0 %vm221_vm1, %v2911_v51 }
0x10f1   :  { %4335 = vmatprep.mubr.msk.f32.mxu0 %vm221_vm1, %v2913_v31 }
0x10f4   :  { %4336 = vmatmul.mubr.msk.f32.gmra.mrb[56].mxu0 %vm221_vm1, %v2915_v9 }
0x10f5   :  { %4338 = vmatprep.mubr.msk.f32.mxu0 %vm221_vm1, %v2917_v47 }
0x10f8   :  { %4339 = vmatmul.mubr.msk.f32.gmra.mrb[58].mxu0 %vm221_vm1, %v2919_v42 }
0x1182   :  { %v6112_v20 = vpop.f32.mrb[48].mxu0 }
0x1183   :  { %v6114_v18 = vpop.f32.mrb[49].mxu0 }
0x11b7   :  { %v6116_v8 = vpop.f32.mrb[50].mxu0 }
0x11b8   :  { %v6118_v55 = vpop.f32.mrb[51].mxu0 }
0x11bf   :  { %v6120_v56 = vpop.f32.mrb[52].mxu0 }
0x11c0   :  { %v6122_v0 = vpop.f32.mrb[53].mxu0 }
0x11c3   :  { %v4334_v5 = vpop.f32.mrb[54].mxu0 }
0x11c4   :  { %v3028_v27 = vadd.f32 %v5844_v35, %v4334_v5  ;;  %v3022_v29 = vpop.f32.mrb[55].mxu0 }
0x11c5   :  { %v3023_v12 = vadd.f32 %v5847_v39, %v3022_v29 }
0x11c6   :  { %v3054_v52 = vsel %vm341_vm3, %v3028_v27, -inf }
0x11c7   :  { %3055 = vmax.xlane.f32.xlu0 %v3054_v52  ;;  %v4337_v37 = vpop.f32.mrb[56].mxu0  ;;  %v3051_v38 = vsel %vm341_vm3, %v3023_v12, -inf }
0x11c8   :  { %v3038_v59 = vadd.f32 %v5856_v49, %v4337_v37  ;;  %v3032_v61 = vpop.f32.mrb[57].mxu0  ;;  %3052 = vmax.xlane.f32.xlu1 %v3051_v38 }
0x11c9   :  { %v3033_v26 = vadd.f32 %v5859_v22, %v3032_v61  ;;  %v2407_v22 = vsel %vm341_vm3, %v5988_v21, 0.0  ;;  %v2753_v21 = vsel %vm341_vm3, %v6090_v58, 0.0 }
0x11ca   :  { %v3060_v33 = vsel %vm341_vm3, %v3038_v59, -inf }
0x11cb   :  { %v4340_v17 = vpop.f32.mrb[58].mxu0  ;;  %v3057_v35 = vsel %vm341_vm3, %v3033_v26, -inf }
0x11cc   :  { %v3048_v25 = vadd.f32 %v5863_v23, %v4340_v17  ;;  %v3042_v39 = vpop.f32.mrb[59].mxu0  ;;  %3058 = vmax.xlane.f32.xlu0 %v3057_v35  ;;  %3061 = vmax.xlane.f32.xlu1 %v3060_v33  ;;  %v2747_v23 = vsel %vm341_vm3, %v6072_v24, 0.0  ;;  %v2419_v24 = vsel %vm341_vm3, %v6014_v3, 0.0 }
0x11cd   :  { %v3043_v51 = vadd.f32 %v5869_v63, %v3042_v39  ;;  %v2410_v63 = vsel %vm341_vm3, %v5990_v45, 0.0  ;;  %v2756_v45 = vsel %vm341_vm3, %v6092_v4, 0.0 }
0x11ce   :  { %v3066_v31 = vsel %vm341_vm3, %v3048_v25, -inf }
0x11cf   :  { %v3063_v49 = vsel %vm341_vm3, %v3043_v51, -inf }
0x11d0   :  { %3064 = vmax.xlane.f32.xlu0 %v3063_v49  ;;  %3067 = vmax.xlane.f32.xlu1 %v3066_v31 }
0x11e1   :  { %4899 = vrot.lane.b32.xlu1 %v5802_v43, %s5182_s23  ;;  %v2750_v43 = vsel %vm341_vm3, %v6074_v6, 0.0  ;;  %v2759_v6 = vsel %vm341_vm3, %v6098_v44, 0.0 }
0x11e5   :  { %4904 = vrot.lane.b32.xlu1 %v5814_v19, %s5182_s23  ;;  %v2413_v19 = vsel %vm341_vm3, %v6006_v48, 0.0  ;;  %v2422_v48 = vsel %vm341_vm3, %v6016_v2, 0.0 }
0x11e6   :  { %4894 = vrot.lane.b32.xlu0 %v5792_v14, %s5182_s23  ;;  %v2416_v14 = vsel %vm341_vm3, %v6008_v46, 0.0  ;;  %v2762_v46 = vsel %vm341_vm3, %v6100_v30, 0.0 }
0x1205   :  { %2408 = vadd.xlane.f32.xlu0 %v2407_v22 }
0x1209   :  { %2748 = vadd.xlane.f32.xlu0 %v2747_v23  ;;  %2411 = vadd.xlane.f32.xlu1 %v2410_v63 }
0x120d   :  { %2751 = vadd.xlane.f32.xlu0 %v2750_v43  ;;  %2414 = vadd.xlane.f32.xlu1 %v2413_v19 }
0x1211   :  { %2417 = vadd.xlane.f32.xlu0 %v2416_v14  ;;  %2754 = vadd.xlane.f32.xlu1 %v2753_v21 }
0x1215   :  { %2757 = vadd.xlane.f32.xlu0 %v2756_v45  ;;  %2420 = vadd.xlane.f32.xlu1 %v2419_v24 }
0x1219   :  { %2423 = vadd.xlane.f32.xlu0 %v2422_v48  ;;  %2760 = vadd.xlane.f32.xlu1 %v2759_v6 }
0x121d   :  { %2763 = vadd.xlane.f32.xlu0 %v2762_v46 }
0x1254   :  { %v3056_v58 = vpop.xlane.xlu0 %3055 }
0x1255   :  { %v3070_v9 = vsub.f32 %v3028_v27, %v3056_v58  ;;  %v3053_v4 = vpop.xlane.xlu1 %3052 }
0x1256   :  { %v3069_v47 = vsub.f32 %v3023_v12, %v3053_v4 }
0x1257   :  { %v3077_v42 = vmul.f32 1.442695, %v3070_v9 }
0x1258   :  { %v3075_v3 = vmul.f32 1.442695, %v3069_v47  ;;  %v2067_v47 = vsel %vm341_vm3, %v5897_v41, 0.0  ;;  %v2079_v41 = vsel %vm341_vm3, %v5924_v28, 0.0 }
0x1259   :  { %5040 = vpow2.f32 %v3077_v42  ;;  %v3059_v5 = vpop.xlane.xlu0 %3058  ;;  %v3062_v29 = vpop.xlane.xlu1 %3061  ;;  %v2070_v42 = vsel %vm341_vm3, %v5899_v62, 0.0  ;;  %v2082_v62 = vsel %vm341_vm3, %v5926_v16, 0.0 }
0x125a   :  { %5042 = vpow2.f32 %v3075_v3  ;;  %v3071_v2 = vsub.f32 %v3033_v26, %v3059_v5  ;;  %v3072_v52 = vsub.f32 %v3038_v59, %v3062_v29  ;;  %v2073_v3 = vsel %vm341_vm3, %v5916_v10, 0.0 }
0x125b   :  { %v2076_v5 = vsel %vm341_vm3, %v5918_v11, 0.0 }
0x125c   :  { %v3079_v37 = vmul.f32 1.442695, %v3071_v2  ;;  %v3081_v44 = vmul.f32 1.442695, %v3072_v52 }
0x125d   :  { %v3065_v38 = vpop.xlane.xlu0 %3064  ;;  %v3068_v61 = vpop.xlane.xlu1 %3067 }
0x125e   :  { %5044 = vpow2.f32 %v3079_v37  ;;  %v3073_v33 = vsub.f32 %v3043_v51, %v3065_v38  ;;  %v3074_v30 = vsub.f32 %v3048_v25, %v3068_v61 }
0x125f   :  { %5046 = vpow2.f32 %v3081_v44 }
0x1260   :  { %v3083_v17 = vmul.f32 1.442695, %v3073_v33  ;;  %v3085_v27 = vmul.f32 1.442695, %v3074_v30 }
0x1261   :  { %v4895_v35 = vpop.permute.xlu0 %4894  ;;  %v4900_v12 = vpop.permute.xlu1 %4899 }
0x1262   :  { %5048 = vpow2.f32 %v3083_v17  ;;  %v4897_v39 = vunpack.i.h.bf16 %v4895_v35  ;;  %v4896_v31 = vunpack.i.l.bf16 %v4895_v35  ;;  %v4902_v49 = vunpack.i.h.bf16 %v4900_v12 }
0x1263   :  { %v5041_v22 = vpop.eup %5040  ;;  %5050 = vpow2.f32 %v3085_v27  ;;  %v4901_v26 = vunpack.i.l.bf16 %v4900_v12 }
0x1264   :  { %v5043_v59 = vpop.eup %5042  ;;  %v4631_v23 = vpack.c.bf16 %v4897_v39, %v4896_v31  ;;  %v3090_v63 = vsel %vm341_vm3, %v5041_v22, 0.0 }
0x1265   :  { %3091 = vadd.xlane.f32.xlu0 %v3090_v63  ;;  %4353 = vmatprep.mubr.msk.f32.mxu1 %vm341_vm3, %v5043_v59  ;;  %v4905_v25 = vpop.permute.xlu1 %4904  ;;  %v3087_v51 = vsel %vm341_vm3, %v5043_v59, 0.0  ;;  %v4635_v43 = vpack.c.bf16 %v4902_v49, %v4901_v26 }
0x1266   :  { %v4907_v19 = vunpack.i.h.bf16 %v4905_v25  ;;  %v4906_v14 = vunpack.i.l.bf16 %v4905_v25  ;;  %4632 = vmatprep.subr.bf16.mxu1 %v4631_v23  ;;  %3088 = vadd.xlane.f32.xlu1 %v3087_v51 }
0x1267   :  { %4634 = vmatpush3.bf16.msra.mxu1 %v4631_v23 }
0x1268   :  { %v5045_v21 = vpop.eup %5044  ;;  %4636 = vmatprep.subr.bf16.mxu1 %v4635_v43  ;;  %v4639_v48 = vpack.c.bf16 %v4907_v19, %v4906_v14  ;;  %v3341_v14 = vld [vmem:[#allocation2 + $0x30] sm:$0xff] }
0x1269   :  { %v5047_v45 = vpop.eup %5046  ;;  %v3093_v24 = vsel %vm341_vm3, %v5045_v21, 0.0 }
0x126a   :  { %3094 = vadd.xlane.f32.xlu1 %v3093_v24  ;;  %v3096_v6 = vsel %vm341_vm3, %v5047_v45, 0.0 }
0x126b   :  { %3097 = vadd.xlane.f32.xlu0 %v3096_v6  ;;  %4638 = vmatpush3.bf16.msra.mxu1 %v4635_v43 }
0x126c   :  { %v5049_v46 = vpop.eup %5048  ;;  %4640 = vmatprep.subr.bf16.mxu1 %v4639_v48 }
0x126d   :  { %v5051_v58 = vpop.eup %5050  ;;  %v3099_v9 = vsel %vm341_vm3, %v5049_v46, 0.0 }
0x126e   :  { %3100 = vadd.xlane.f32.xlu1 %v3099_v9  ;;  %v3102_v4 = vsel %vm341_vm3, %v5051_v58, 0.0 }
0x126f   :  { %3103 = vadd.xlane.f32.xlu0 %v3102_v4  ;;  %4642 = vmatpush3.bf16.msra.mxu1 %v4639_v48 }
0x1272   :  { %2068 = vadd.xlane.f32.xlu1 %v2067_v47  ;;  %4354 = vmatmul.mubr.msk.f32.vlgmr.msra.gmra.mrb[48].mxu1 %vm341_vm3, %v5041_v22 }
0x1273   :  { %2071 = vadd.xlane.f32.xlu0 %v2070_v42  ;;  %4356 = vmatprep.mubr.msk.f32.mxu1 %vm341_vm3, %v5045_v21 }
0x1276   :  { %2074 = vadd.xlane.f32.xlu1 %v2073_v3  ;;  %4357 = vmatmul.mubr.msk.f32.gmra.mrb[50].mxu1 %vm341_vm3, %v5047_v45  ;;  %v3342_v45 = vld [vmem:[#allocation2 + $0x38] sm:$0xff] }
0x1277   :  { %2077 = vadd.xlane.f32.xlu0 %v2076_v5  ;;  %4359 = vmatprep.mubr.msk.f32.mxu1 %vm341_vm3, %v5049_v46  ;;  %v4647_v24 = vpack.c.bf16 %v3342_v45, %v3341_v14 }
0x127a   :  { %2080 = vadd.xlane.f32.xlu1 %v2079_v41  ;;  %4360 = vmatmul.mubr.msk.f32.gmra.mrb[52].mxu1 %vm341_vm3, %v5051_v58 }
0x127b   :  { %2083 = vadd.xlane.f32.xlu0 %v2082_v62 }
0x1292   :  { %v2409_v10 = vpop.xlane.xlu0 %2408 }
0x1293   :  { %5052 = vrcp.f32 %v2409_v10 }
0x1296   :  { %v2749_v29 = vpop.xlane.xlu0 %2748  ;;  %v2412_v2 = vpop.xlane.xlu1 %2411 }
0x1297   :  { %5054 = vrcp.f32 %v2749_v29 }
0x1298   :  { %5056 = vrcp.f32 %v2412_v2 }
0x129a   :  { %v2752_v11 = vpop.xlane.xlu0 %2751  ;;  %v2415_v52 = vpop.xlane.xlu1 %2414 }
0x129b   :  { %5058 = vrcp.f32 %v2752_v11 }
0x129c   :  { %5060 = vrcp.f32 %v2415_v52 }
0x129d   :  { %v5053_v37 = vpop.eup %5052 }
0x129e   :  { %v2418_v44 = vpop.xlane.xlu0 %2417  ;;  %v2755_v28 = vpop.xlane.xlu1 %2754  ;;  %v2557_v38 = vmul.f32 %v5053_v37, %v6030_v36 }
0x129f   :  { %5062 = vrcp.f32 %v2418_v44 }
0x12a0   :  { %5064 = vrcp.f32 %v2755_v28  ;;  %3254 = vrot.lane.b32.xlu1 %v2557_v38, %s5170_s29 }
0x12a1   :  { %v5055_v16 = vpop.eup %5054 }
0x12a2   :  { %v5057_v61 = vpop.eup %5056  ;;  %v2758_v33 = vpop.xlane.xlu0 %2757  ;;  %v2897_v17 = vmul.f32 %v5055_v16, %v6114_v18 }
0x12a3   :  { %v2421_v30 = vpop.xlane.xlu1 %2420  ;;  %5066 = vrcp.f32 %v2758_v33  ;;  %v2559_v27 = vmul.f32 %v5057_v61, %v6028_v57 }
0x12a4   :  { %5068 = vrcp.f32 %v2421_v30  ;;  %3278 = vrot.lane.b32.xlu1 %v2897_v17, %s5183_s4 }
0x12a5   :  { %v5059_v35 = vpop.eup %5058  ;;  %3256 = vrot.lane.b32.xlu0 %v2559_v27, %s5170_s29 }
0x12a6   :  { %v5061_v36 = vpop.eup %5060  ;;  %v2424_v12 = vpop.xlane.xlu0 %2423  ;;  %v2899_v31 = vmul.f32 %v5059_v35, %v6112_v20 }
0x12a7   :  { %v2761_v39 = vpop.xlane.xlu1 %2760  ;;  %5070 = vrcp.f32 %v2424_v12  ;;  %v2561_v49 = vmul.f32 %v5061_v36, %v6034_v54 }
0x12a8   :  { %5072 = vrcp.f32 %v2761_v39  ;;  %3280 = vrot.lane.b32.xlu1 %v2899_v31, %s5183_s4 }
0x12a9   :  { %v5063_v18 = vpop.eup %5062  ;;  %3258 = vrot.lane.b32.xlu0 %v2561_v49, %s5170_s29 }
0x12aa   :  { %v5065_v57 = vpop.eup %5064  ;;  %v2764_v22 = vpop.xlane.xlu0 %2763  ;;  %v2563_v26 = vmul.f32 %v5063_v18, %v6032_v13 }
0x12ab   :  { %5074 = vrcp.f32 %v2764_v22  ;;  %v2901_v59 = vmul.f32 %v5065_v57, %v6118_v55 }
0x12ac   :  { %3260 = vrot.lane.b32.xlu1 %v2563_v26, %s5170_s29 }
0x12ad   :  { %v5067_v23 = vpop.eup %5066  ;;  %3282 = vrot.lane.b32.xlu0 %v2901_v59, %s5183_s4 }
0x12ae   :  { %v5069_v20 = vpop.eup %5068  ;;  %v2903_v54 = vmul.f32 %v5067_v23, %v6116_v8  ;;  %v3340_v8 = vld [vmem:[#allocation2 + $0x28] sm:$0xff] }
0x12af   :  { %v2565_v63 = vmul.f32 %v5069_v20, %v6038_v53  ;;  %v3339_v53 = vld [vmem:[#allocation2 + $0x20] sm:$0xff] }
0x12b0   :  { %3284 = vrot.lane.b32.xlu1 %v2903_v54, %s5183_s4  ;;  %v4643_v21 = vpack.c.bf16 %v3340_v8, %v3339_v53 }
0x12b1   :  { %v5071_v25 = vpop.eup %5070  ;;  %3262 = vrot.lane.b32.xlu0 %v2565_v63, %s5170_s29 }
0x12b2   :  { %v5073_v51 = vpop.eup %5072  ;;  %v2567_v13 = vmul.f32 %v5071_v25, %v6036_v60  ;;  %4644 = vmatprep.subr.bf16.mxu1 %v4643_v21 }
0x12b3   :  { %v2905_v55 = vmul.f32 %v5073_v51, %v6122_v0  ;;  %4646 = vmatpush3.bf16.msra.mxu1 %v4643_v21 }
0x12b4   :  { %3264 = vrot.lane.b32.xlu1 %v2567_v13, %s5170_s29  ;;  %4648 = vmatprep.subr.bf16.mxu1 %v4647_v24 }
0x12b5   :  { %v5075_v43 = vpop.eup %5074  ;;  %3286 = vrot.lane.b32.xlu0 %v2905_v55, %s5183_s4 }
0x12b6   :  { %v2907_v19 = vmul.f32 %v5075_v43, %v6120_v56 }
0x12b7   :  { %4650 = vmatpush3.bf16.msra.mxu1 %v4647_v24 }
0x12b8   :  { %3288 = vrot.lane.b32.xlu1 %v2907_v19, %s5183_s4 }
0x12f2   :  { %v3092_v60 = vpop.xlane.xlu0 %3091 }
0x12f3   :  { %v3089_v0 = vpop.xlane.xlu1 %3088  ;;  %5076 = vrcp.f32 %v3092_v60 }
0x12f4   :  { %5078 = vrcp.f32 %v3089_v0 }
0x12f7   :  { %v3095_v6 = vpop.xlane.xlu1 %3094 }
0x12f8   :  { %v3098_v48 = vpop.xlane.xlu0 %3097 }
0x12f9   :  { %5080 = vrcp.f32 %v3098_v48 }
0x12fa   :  { %5082 = vrcp.f32 %v3095_v6 }
0x12fb   :  { %v3101_v46 = vpop.xlane.xlu1 %3100 }
0x12fc   :  { %v3104_v56 = vpop.xlane.xlu0 %3103 }
0x12fd   :  { %5084 = vrcp.f32 %v3104_v56  ;;  %v5077_v58 = vpop.eup %5076 }
0x12fe   :  { %5086 = vrcp.f32 %v3101_v46  ;;  %v5079_v4 = vpop.eup %5078 }
0x12ff   :  { %v2069_v16 = vpop.xlane.xlu1 %2068 }
0x1300   :  { %v2072_v30 = vpop.xlane.xlu0 %2071  ;;  %5088 = vrcp.f32 %v2069_v16 }
0x1301   :  { %5090 = vrcp.f32 %v2072_v30 }
0x1303   :  { %v5081_v5 = vpop.eup %5080  ;;  %v2075_v61 = vpop.xlane.xlu1 %2074 }
0x1304   :  { %v5083_v62 = vpop.eup %5082  ;;  %v2078_v27 = vpop.xlane.xlu0 %2077  ;;  %5092 = vrcp.f32 %v2075_v61 }
0x1305   :  { %5094 = vrcp.f32 %v2078_v27 }
0x1307   :  { %v5085_v11 = vpop.eup %5084  ;;  %v2081_v33 = vpop.xlane.xlu1 %2080 }
0x1308   :  { %v5087_v37 = vpop.eup %5086  ;;  %v2084_v36 = vpop.xlane.xlu0 %2083  ;;  %5096 = vrcp.f32 %v2081_v33 }
0x1309   :  { %5098 = vrcp.f32 %v2084_v36 }
0x130a   :  { %v5089_v59 = vpop.eup %5088 }
0x130b   :  { %v5091_v23 = vpop.eup %5090  ;;  %v2217_v63 = vmul.f32 %v5089_v59, %v5940_v50 }
0x130c   :  { %v2219_v51 = vmul.f32 %v5091_v23, %v5938_v15 }
0x130e   :  { %v5093_v25 = vpop.eup %5092 }
0x130f   :  { %v5095_v13 = vpop.eup %5094  ;;  %v2221_v14 = vmul.f32 %v5093_v25, %v5944_v7 }
0x1310   :  { %v2223_v50 = vmul.f32 %v5095_v13, %v5942_v32 }
0x1312   :  { %v3255_v17 = vpop.permute.xlu1 %3254  ;;  %v5097_v24 = vpop.eup %5096 }
0x1313   :  { %v3320_v55 = vsel %vm221_vm1, %v2217_v63, %v3255_v17  ;;  %v5099_v60 = vpop.eup %5098  ;;  %v2225_v46 = vmul.f32 %v5097_v24, %v5948_v34 }
0x1316   :  { %v3279_v35 = vpop.permute.xlu1 %3278 }
0x1317   :  { %v3257_v39 = vpop.permute.xlu0 %3256  ;;  %v3326_v53 = vsel %vm1637_vm4, %v3320_v55, %v3279_v35 }
0x1318   :  { %v3321_v19 = vsel %vm221_vm1, %v2219_v51, %v3257_v39 }
0x131a   :  { %v3281_v12 = vpop.permute.xlu1 %3280 }
0x131b   :  { %v3259_v49 = vpop.permute.xlu0 %3258  ;;  %v3327_v21 = vsel %vm1637_vm4, %v3321_v19, %v3281_v12 }
0x131c   :  { %v3322_v0 = vsel %vm221_vm1, %v2221_v14, %v3259_v49 }
0x131e   :  { %v3261_v31 = vpop.permute.xlu1 %3260 }
0x131f   :  { %v3283_v57 = vpop.permute.xlu0 %3282  ;;  %v3323_v7 = vsel %vm221_vm1, %v2223_v50, %v3261_v31 }
0x1320   :  { %v3328_v6 = vsel %vm1637_vm4, %v3322_v0, %v3283_v57 }
0x1322   :  { %v3285_v18 = vpop.permute.xlu1 %3284 }
0x1323   :  { %v3263_v26 = vpop.permute.xlu0 %3262 }
0x1326   :  { %v3265_v22 = vpop.permute.xlu1 %3264 }
0x1327   :  { %v3287_v54 = vpop.permute.xlu0 %3286 }
0x132a   :  { %v3289_v20 = vpop.permute.xlu1 %3288 }
0x1345   :  { %v4355_v9 = vpop.f32.mrb[48].mxu1 }
0x1346   :  { %v3239_v47 = vmul.f32 %v5077_v58, %v4355_v9  ;;  %v3207_v42 = vpop.f32.mrb[49].mxu1  ;;  %v3329_v58 = vsel %vm1637_vm4, %v3323_v7, %v3285_v18  ;;  %v2227_v9 = vmul.f32 %v5099_v60, %v5946_v40 }
0x1347   :  { %v3237_v3 = vmul.f32 %v5079_v4, %v3207_v42 }
0x1348   :  { %3304 = vrot.lane.b32.xlu1 %v3239_v47, %s5184_s24  ;;  %v3324_v47 = vsel %vm221_vm1, %v2225_v46, %v3263_v26 }
0x1349   :  { %3302 = vrot.lane.b32.xlu0 %v3237_v3, %s5184_s24  ;;  %v4358_v41 = vpop.f32.mrb[50].mxu1  ;;  %v3330_v3 = vsel %vm1637_vm4, %v3324_v47, %v3287_v54 }
0x134a   :  { %v3243_v10 = vmul.f32 %v5081_v5, %v4358_v41  ;;  %v3217_v29 = vpop.f32.mrb[51].mxu1  ;;  %v3325_v5 = vsel %vm221_vm1, %v2227_v9, %v3265_v22 }
0x134b   :  { %v3241_v2 = vmul.f32 %v5083_v62, %v3217_v29  ;;  %v3331_v41 = vsel %vm1637_vm4, %v3325_v5, %v3289_v20  ;;  %v6254_v29 = vld [vmem:[%s6305_s3] sm:$0xff] }
0x134c   :  { %3308 = vrot.lane.b32.xlu1 %v3243_v10, %s5184_s24  ;;  %v3345_v10 = vsub.s32 3, %v5241_v1 }
0x134d   :  { %3306 = vrot.lane.b32.xlu0 %v3241_v2, %s5184_s24  ;;  %v4361_v52 = vpop.f32.mrb[52].mxu1 }
0x134e   :  { %v3247_v44 = vmul.f32 %v5085_v11, %v4361_v52  ;;  %v3227_v28 = vpop.f32.mrb[53].mxu1  ;;  %v3346_v2 = vrot.slane %v6254_v29, %v3345_v10  ;;  %v3551_v10 = vsub.s32 5, %v5241_v1 }
0x134f   :  { %v3245_v38 = vmul.f32 %v5087_v37, %v3227_v28 }
0x1350   :  { %3312 = vrot.lane.b32.xlu1 %v3247_v44, %s5184_s24 }
0x1351   :  { %3310 = vrot.lane.b32.xlu0 %v3245_v38, %s5184_s24 }
0x13ba   :  { %v3305_v43 = vpop.permute.xlu1 %3304 }
0x13bb   :  { %v3303_v8 = vpop.permute.xlu0 %3302  ;;  %v3333_v15 = vsel %vm1644_vm5, %v3327_v21, %v3305_v43 }
0x13bc   :  { %v3332_v45 = vsel %vm1644_vm5, %v3326_v53, %v3303_v8 }
0x13bd   :  { %4370 = vmatprep.mubr.msk.f32.mxu1 %vm89_vm0, %v3332_v45 }
0x13be   :  { %4371 = vmatmul.mubr.msk.f32.vlgmr.msra.gmra.mrb[54].mxu1 %vm89_vm0, %v3333_v15  ;;  %v3309_v48 = vpop.permute.xlu1 %3308 }
0x13bf   :  { %v3307_v56 = vpop.permute.xlu0 %3306  ;;  %v3335_v4 = vsel %vm1644_vm5, %v3329_v58, %v3309_v48 }
0x13c0   :  { %v3334_v32 = vsel %vm1644_vm5, %v3328_v6, %v3307_v56 }
0x13c1   :  { %4373 = vmatprep.mubr.msk.f32.mxu1 %vm89_vm0, %v3334_v32 }
0x13c2   :  { %4374 = vmatmul.mubr.msk.f32.gmra.mrb[56].mxu1 %vm89_vm0, %v3335_v4  ;;  %v3313_v42 = vpop.permute.xlu1 %3312 }
0x13c3   :  { %v3311_v34 = vpop.permute.xlu0 %3310  ;;  %v3337_v40 = vsel %vm1644_vm5, %v3331_v41, %v3313_v42 }
0x13c4   :  { %v3336_v62 = vsel %vm1644_vm5, %v3330_v3, %v3311_v34 }
0x13c5   :  { %4376 = vmatprep.mubr.msk.f32.mxu1 %vm89_vm0, %v3336_v62  ;;  %v3541_v62 = vsub.s32 4, %v5241_v1 }
0x13c6   :  { %4377 = vmatmul.mubr.msk.f32.gmra.mrb[58].mxu1 %vm89_vm0, %v3337_v40 }
0x1491   :  { %v4372_v11 = vpop.f32.mrb[54].mxu1 }
0x1492   :  { %v3437_v52 = vadd.f32 %v4372_v11, %v3346_v2  ;;  %v3431_v37 = vpop.f32.mrb[55].mxu1 }
0x1493   :  { %v3432_v44 = vadd.f32 %v3431_v37, %v3346_v2  ;;  %v3542_v37 = vrot.slane %v6254_v29, %v3541_v62 }
0x1494   :  { %v3463_v28 = vsel %vm89_vm0, %v3437_v52, 0.0 }
0x1495   :  { %3464 = vadd.xlane.f32.xlu1 %v3463_v28  ;;  %v4375_v38 = vpop.f32.mrb[56].mxu1  ;;  %v3460_v16 = vsel %vm89_vm0, %v3432_v44, 0.0 }
0x1496   :  { %v3447_v61 = vadd.f32 %v4375_v38, %v3346_v2  ;;  %v3441_v33 = vpop.f32.mrb[57].mxu1  ;;  %3461 = vadd.xlane.f32.xlu0 %v3460_v16 }
0x1497   :  { %v3442_v17 = vadd.f32 %v3441_v33, %v3346_v2 }
0x1498   :  { %v3469_v30 = vsel %vm89_vm0, %v3447_v61, 0.0 }
0x1499   :  { %v4378_v27 = vpop.f32.mrb[58].mxu1  ;;  %v3466_v39 = vsel %vm89_vm0, %v3442_v17, 0.0 }
0x149a   :  { %3470 = vadd.xlane.f32.xlu0 %v3469_v30  ;;  %v3451_v35 = vpop.f32.mrb[59].mxu1  ;;  %v3457_v12 = vadd.f32 %v4378_v27, %v3346_v2 }
0x149b   :  { %v3452_v36 = vadd.f32 %v3451_v35, %v3346_v2 }
0x149c   :  { %v3475_v49 = vsel %vm89_vm0, %v3457_v12, 0.0 }
0x149d   :  { %v3472_v31 = vsel %vm89_vm0, %v3452_v36, 0.0 }
0x149e   :  { %3467 = vadd.xlane.f32.xlu0 %v3466_v39  ;;  %3473 = vadd.xlane.f32.xlu1 %v3472_v31 }
0x14a2   :  { %3476 = vadd.xlane.f32.xlu0 %v3475_v49 }
0x1522   :  { %v3465_v18 = vpop.xlane.xlu1 %3464 }
0x1523   :  { %v3480_v57 = vmul.f32 0.03125, %v3465_v18  ;;  %v3462_v22 = vpop.xlane.xlu0 %3461 }
0x1524   :  { %v3479_v26 = vmul.f32 0.03125, %v3462_v22 }
0x1525   :  { %v3486_v59 = vsub.f32 %v3437_v52, %v3480_v57 }
0x1526   :  { %v3485_v23 = vsub.f32 %v3432_v44, %v3479_v26 }
0x1527   :  { %v3471_v20 = vpop.xlane.xlu0 %3470  ;;  %v3492_v54 = vmul.f32 %v3486_v59, %v3486_v59 }
0x1528   :  { %v3482_v63 = vmul.f32 0.03125, %v3471_v20  ;;  %v3491_v25 = vmul.f32 %v3485_v23, %v3485_v23 }
0x1529   :  { %v3500_v51 = vsel %vm89_vm0, %v3492_v54, 0.0 }
0x152a   :  { %v3488_v13 = vsub.f32 %v3447_v61, %v3482_v63  ;;  %3501 = vadd.xlane.f32.xlu0 %v3500_v51  ;;  %v3497_v55 = vsel %vm89_vm0, %v3491_v25, 0.0  ;;  %v3552_v61 = vrot.slane %v6254_v29, %v3551_v10 }
0x152b   :  { %v3474_v43 = vpop.xlane.xlu1 %3473  ;;  %3498 = vadd.xlane.f32.xlu1 %v3497_v55  ;;  %v3468_v19 = vpop.xlane.xlu0 %3467 }
0x152c   :  { %v3483_v53 = vmul.f32 0.03125, %v3474_v43  ;;  %v3481_v8 = vmul.f32 0.03125, %v3468_v19  ;;  %v3494_v14 = vmul.f32 %v3488_v13, %v3488_v13 }
0x152e   :  { %v6265_v21 = vsub.f32 %v3452_v36, %v3483_v53  ;;  %v3487_v45 = vsub.f32 %v3442_v17, %v3481_v8  ;;  %v3506_v24 = vsel %vm89_vm0, %v3494_v14, 0.0 }
0x152f   :  { %3507 = vadd.xlane.f32.xlu0 %v3506_v24  ;;  %v3477_v50 = vpop.xlane.xlu0 %3476 }
0x1530   :  { %v3484_v15 = vmul.f32 0.03125, %v3477_v50  ;;  %v3493_v60 = vmul.f32 %v3487_v45, %v3487_v45  ;;  %v3495_v6 = vmul.f32 %v6265_v21, %v6265_v21 }
0x1532   :  { %v3490_v0 = vsub.f32 %v3457_v12, %v3484_v15  ;;  %v3503_v48 = vsel %vm89_vm0, %v3493_v60, 0.0  ;;  %v3509_v56 = vsel %vm89_vm0, %v3495_v6, 0.0 }
0x1533   :  { %3504 = vadd.xlane.f32.xlu1 %v3503_v48 }
0x1534   :  { %v3496_v7 = vmul.f32 %v3490_v0, %v3490_v0 }
0x1536   :  { %v3512_v46 = vsel %vm89_vm0, %v3496_v7, 0.0 }
0x1537   :  { %3510 = vadd.xlane.f32.xlu1 %v3509_v56  ;;  %3513 = vadd.xlane.f32.xlu0 %v3512_v46 }
0x15b7   :  { %v3502_v58 = vpop.xlane.xlu0 %3501 }
0x15b8   :  { %v3516_v32 = vmul.f32 0.03125, %v3502_v58  ;;  %v3499_v9 = vpop.xlane.xlu1 %3498 }
0x15b9   :  { %v3515_v4 = vmul.f32 0.03125, %v3499_v9 }
0x15ba   :  { %v3522_v47 = vadd.f32 1e-05, %v3516_v32 }
0x15bb   :  { %v3521_v42 = vadd.f32 1e-05, %v3515_v4 }
0x15bc   :  { %5100 = vrsqrt.f32 %v3522_v47  ;;  %v3508_v3 = vpop.xlane.xlu0 %3507 }
0x15bd   :  { %5102 = vrsqrt.f32 %v3521_v42  ;;  %v3518_v5 = vmul.f32 0.03125, %v3508_v3 }
0x15bf   :  { %v3524_v34 = vadd.f32 1e-05, %v3518_v5 }
0x15c0   :  { %v3505_v41 = vpop.xlane.xlu1 %3504 }
0x15c1   :  { %5104 = vrsqrt.f32 %v3524_v34  ;;  %v3517_v40 = vmul.f32 0.03125, %v3505_v41 }
0x15c3   :  { %v3523_v2 = vadd.f32 1e-05, %v3517_v40 }
0x15c4   :  { %v3511_v11 = vpop.xlane.xlu1 %3510  ;;  %v3514_v52 = vpop.xlane.xlu0 %3513 }
0x15c5   :  { %5106 = vrsqrt.f32 %v3523_v2  ;;  %v3519_v44 = vmul.f32 0.03125, %v3511_v11  ;;  %v3520_v28 = vmul.f32 0.03125, %v3514_v52 }
0x15c6   :  { %v5101_v38 = vpop.eup %5100 }
0x15c7   :  { %v5103_v16 = vpop.eup %5102  ;;  %v3534_v33 = vmul.f32 %v5101_v38, %v3486_v59  ;;  %v3525_v30 = vadd.f32 1e-05, %v3519_v44  ;;  %v3526_v17 = vadd.f32 1e-05, %v3520_v28 }
0x15c8   :  { %v3533_v27 = vmul.f32 %v5103_v16, %v3485_v23 }
0x15c9   :  { %v3544_v35 = vmul.f32 %v3542_v37, %v3534_v33  ;;  %5108 = vrsqrt.f32 %v3525_v30 }
0x15ca   :  { %v3543_v36 = vmul.f32 %v3542_v37, %v3533_v27  ;;  %5110 = vrsqrt.f32 %v3526_v17 }
0x15cb   :  { %v5105_v1 = vpop.eup %5104  ;;  %v3554_v12 = vadd.f32 %v3552_v61, %v3544_v35 }
0x15cc   :  { %v3553_v39 = vadd.f32 %v3552_v61, %v3543_v36  ;;  %v3536_v31 = vmul.f32 %v5105_v1, %v3488_v13 }
0x15cd   :  { %3560 = vst.msk [vmem:[%s6307_s5 + $0x8] sm:$0xff] %vm89_vm0, %v3554_v12 }
0x15ce   :  { %3559 = vst.msk [vmem:[%s6307_s5] sm:$0xff] %vm89_vm0, %v3553_v39  ;;  %v3546_v29 = vmul.f32 %v3542_v37, %v3536_v31 }
0x15cf   :  { %v5107_v49 = vpop.eup %5106 }
0x15d0   :  { %v3556_v18 = vadd.f32 %v3552_v61, %v3546_v29  ;;  %v3535_v57 = vmul.f32 %v5107_v49, %v3487_v45 }
0x15d2   :  { %3562 = vst.msk [vmem:[%s6307_s5 + $0x18] sm:$0xff] %vm89_vm0, %v3556_v18  ;;  %v3545_v22 = vmul.f32 %v3542_v37, %v3535_v57 }
0x15d3   :  { %v5109_v26 = vpop.eup %5108 }
0x15d4   :  { %v5111_v59 = vpop.eup %5110  ;;  %v3555_v23 = vadd.f32 %v3552_v61, %v3545_v22  ;;  %v3537_v20 = vmul.f32 %v5109_v26, %v6265_v21 }
0x15d5   :  { %v3538_v54 = vmul.f32 %v5111_v59, %v3490_v0 }
0x15d6   :  { %3561 = vst.msk [vmem:[%s6307_s5 + $0x10] sm:$0xff] %vm89_vm0, %v3555_v23  ;;  %v3547_v63 = vmul.f32 %v3542_v37, %v3537_v20 }
0x15d7   :  { %v3548_v25 = vmul.f32 %v3542_v37, %v3538_v54 }
0x15d8   :  { %v3557_v51 = vadd.f32 %v3552_v61, %v3547_v63 }
0x15d9   :  { %v3558_v13 = vadd.f32 %v3552_v61, %v3548_v25 }
0x15da   :  { %3563 = vst.msk [vmem:[%s6307_s5 + $0x20] sm:$0xff] %vm89_vm0, %v3557_v51 }
0x15db   :  { %3564 = vst.msk [vmem:[%s6307_s5 + $0x28] sm:$0xff] %vm89_vm0, %v3558_v13 }
0x15dc   :  { %3569 = vsyncpa [#allocation3], 1 }
0x15dd   :  { %3570 = vsyncpa [#allocation5], 1 }

</bundles_post_ra>
